<compile_context>
chip_gen: v5e
topology: v5e:2x2
jax: 0.10.0
libtpu: 0.0.40
codegen_flags: <defaults>
</compile_context>

<pallas_src>
import functools
import math

import jax
import jax.numpy as jnp
from jax.experimental import pallas as pl
from jax.experimental.pallas import tpu as pltpu

VMEM_LIMIT = 48 * 1024 * 1024          # safe on v7x (64 MiB), above v6e default
_LN_EPS = 1e-5                         # torch LayerNorm default


def _row_tile(r, cap=512):
    """Row tile: full array if small, else 512 (multiple of 8)."""
    return r if r <= cap else cap


def _k_tile(h, cap=512):
    """Hidden-dim tile for the FFN reduction: must divide H exactly."""
    if h <= cap:
        return h
    for th in range(cap, 0, -128):
        if th % 128 == 0 and h % th == 0:
            return th
    return h


def _params(sem):
    return pltpu.CompilerParams(dimension_semantics=sem,
                                vmem_limit_bytes=VMEM_LIMIT)


# --------------------------------------------------------------------------
# Pallas kernels
# --------------------------------------------------------------------------

def _linear_kernel(x_ref, w_ref, b_ref, o_ref):
    x = x_ref[...].astype(jnp.bfloat16)
    o_ref[...] = (jnp.dot(x, w_ref[...], preferred_element_type=jnp.float32)
                  + b_ref[...]).astype(o_ref.dtype)


def linear(x, w_t, b):
    """y = x @ w_t + b.  w_t: (In, Out) pre-transposed bf16; b: (Out,) f32 or None."""
    orig = x.shape
    In = orig[-1]
    Out = w_t.shape[1]
    R = math.prod(orig[:-1])
    TM = _row_tile(R)
    if b is None:
        b = jnp.zeros((Out,), jnp.float32)
    y = pl.pallas_call(
        _linear_kernel,
        out_shape=jax.ShapeDtypeStruct((R, Out), jnp.float32),
        grid=(pl.cdiv(R, TM),),
        in_specs=[pl.BlockSpec((TM, In), lambda i: (i, 0)),
                  pl.BlockSpec((In, Out), lambda i: (0, 0)),
                  pl.BlockSpec((1, Out), lambda i: (0, 0))],
        out_specs=pl.BlockSpec((TM, Out), lambda i: (i, 0)),
        compiler_params=_params(("parallel",)),
    )(x.reshape(R, In), w_t, b.reshape(1, Out))
    return y.reshape(orig[:-1] + (Out,))


def _ln_res_kernel(a_ref, b_ref, g_ref, be_ref, o_ref):
    t = a_ref[...] + b_ref[...]
    mu = jnp.mean(t, axis=-1, keepdims=True)
    var = jnp.mean(jnp.square(t - mu), axis=-1, keepdims=True)
    o_ref[...] = (t - mu) * jax.lax.rsqrt(var + _LN_EPS) * g_ref[...] + be_ref[...]


def layernorm_residual(a, b, gamma, beta):
    """LayerNorm(a + b) over the last dim (dropout p=0 in the module)."""
    orig = a.shape
    E = orig[-1]
    R = math.prod(orig[:-1])
    TM = _row_tile(R)
    y = pl.pallas_call(
        _ln_res_kernel,
        out_shape=jax.ShapeDtypeStruct((R, E), jnp.float32),
        grid=(pl.cdiv(R, TM),),
        in_specs=[pl.BlockSpec((TM, E), lambda i: (i, 0)),
                  pl.BlockSpec((TM, E), lambda i: (i, 0)),
                  pl.BlockSpec((1, E), lambda i: (0, 0)),
                  pl.BlockSpec((1, E), lambda i: (0, 0))],
        out_specs=pl.BlockSpec((TM, E), lambda i: (i, 0)),
        compiler_params=_params(("parallel",)),
    )(a.reshape(R, E), b.reshape(R, E), gamma.reshape(1, E), beta.reshape(1, E))
    return y.reshape(orig)


def _linear_ln_res_kernel(x_ref, w_ref, b_ref, r_ref, g_ref, be_ref, o_ref):
    x = x_ref[...].astype(jnp.bfloat16)
    t = (jnp.dot(x, w_ref[...], preferred_element_type=jnp.float32)
         + b_ref[...] + r_ref[...])
    mu = jnp.mean(t, axis=-1, keepdims=True)
    var = jnp.mean(jnp.square(t - mu), axis=-1, keepdims=True)
    o_ref[...] = (t - mu) * jax.lax.rsqrt(var + _LN_EPS) * g_ref[...] + be_ref[...]


def linear_ln_residual(x, w_t, b, res, gamma, beta):
    """LayerNorm(x @ w_t + b + res): fused output projection + residual + norm."""
    orig = res.shape
    In = x.shape[-1]
    E = w_t.shape[1]
    R = math.prod(orig[:-1])
    TM = _row_tile(R)
    y = pl.pallas_call(
        _linear_ln_res_kernel,
        out_shape=jax.ShapeDtypeStruct((R, E), jnp.float32),
        grid=(pl.cdiv(R, TM),),
        in_specs=[pl.BlockSpec((TM, In), lambda i: (i, 0)),
                  pl.BlockSpec((In, E), lambda i: (0, 0)),
                  pl.BlockSpec((1, E), lambda i: (0, 0)),
                  pl.BlockSpec((TM, E), lambda i: (i, 0)),
                  pl.BlockSpec((1, E), lambda i: (0, 0)),
                  pl.BlockSpec((1, E), lambda i: (0, 0))],
        out_specs=pl.BlockSpec((TM, E), lambda i: (i, 0)),
        compiler_params=_params(("parallel",)),
    )(x.reshape(R, In), w_t, b.reshape(1, E), res.reshape(R, E),
      gamma.reshape(1, E), beta.reshape(1, E))
    return y.reshape(orig)


def _ffn_ln_res_kernel(x_ref, w1_ref, b1_ref, w2_ref, b2_ref, g_ref, be_ref,
                       o_ref, acc_ref):
    j = pl.program_id(1)

    @pl.when(j == 0)
    def _():
        acc_ref[...] = jnp.zeros_like(acc_ref)

    x = x_ref[...].astype(jnp.bfloat16)
    h = jnp.tanh(jnp.dot(x, w1_ref[...], preferred_element_type=jnp.float32)
                 + b1_ref[...])
    acc_ref[...] += jnp.dot(h.astype(jnp.bfloat16), w2_ref[...],
                            preferred_element_type=jnp.float32)

    @pl.when(j == pl.num_programs(1) - 1)
    def _():
        t = acc_ref[...] + b2_ref[...] + x_ref[...]
        mu = jnp.mean(t, axis=-1, keepdims=True)
        var = jnp.mean(jnp.square(t - mu), axis=-1, keepdims=True)
        o_ref[...] = (t - mu) * jax.lax.rsqrt(var + _LN_EPS) * g_ref[...] + be_ref[...]


def ffn_ln_residual(x, w1_t, b1, w2_t, b2, gamma, beta):
    """LayerNorm(Linear2(tanh(Linear1(x))) + x): fused FFN + residual + norm.
    Hidden dim is K-chunked with a VMEM accumulator (v7x VMEM budget)."""
    orig = x.shape
    E = orig[-1]
    H = w1_t.shape[1]
    R = math.prod(orig[:-1])
    TM = _row_tile(R)
    TH = _k_tile(H)
    y = pl.pallas_call(
        _ffn_ln_res_kernel,
        out_shape=jax.ShapeDtypeStruct((R, E), jnp.float32),
        grid=(pl.cdiv(R, TM), pl.cdiv(H, TH)),
        in_specs=[pl.BlockSpec((TM, E), lambda i, j: (i, 0)),
                  pl.BlockSpec((E, TH), lambda i, j: (0, j)),
                  pl.BlockSpec((1, TH), lambda i, j: (0, j)),
                  pl.BlockSpec((TH, E), lambda i, j: (j, 0)),
                  pl.BlockSpec((1, E), lambda i, j: (0, 0)),
                  pl.BlockSpec((1, E), lambda i, j: (0, 0)),
                  pl.BlockSpec((1, E), lambda i, j: (0, 0))],
        out_specs=pl.BlockSpec((TM, E), lambda i, j: (i, 0)),
        scratch_shapes=[pltpu.VMEM((TM, E), jnp.float32)],
        compiler_params=_params(("parallel", "arbitrary")),
    )(x.reshape(R, E), w1_t, b1.reshape(1, H), w2_t, b2.reshape(1, E),
      gamma.reshape(1, E), beta.reshape(1, E))
    return y.reshape(orig)


def _attn_kernel(q_ref, k_ref, v_ref, o_ref, *, scale):
    q = q_ref[...].astype(jnp.bfloat16)                   # (BT, L, D)
    k = k_ref[...].astype(jnp.bfloat16)
    v = v_ref[...].astype(jnp.bfloat16)
    energy = jax.lax.dot_general(                         # (BT, Lq, Lk)
        q, k, (((2,), (2,)), ((0,), (0,))),
        preferred_element_type=jnp.float32) * scale
    m = jnp.max(energy, axis=-1, keepdims=True)
    e = jnp.exp(energy - m)
    p = e * pl.reciprocal(jnp.sum(e, axis=-1, keepdims=True), approx=True)
    o_ref[...] = jax.lax.dot_general(                     # (BT, Lq, D)
        p.astype(jnp.bfloat16), v, (((2,), (1,)), ((0,), (0,))),
        preferred_element_type=jnp.float32)


def attention_core(q, k, v, scale):
    """q, k, v: (B, L, D) with B = batch*heads. softmax(q k^T * scale) @ v."""
    B, L, D = q.shape
    BT = B if B <= 8 else 8
    kern = functools.partial(_attn_kernel, scale=float(scale))
    return pl.pallas_call(
        kern,
        out_shape=jax.ShapeDtypeStruct((B, L, D), jnp.float32),
        grid=(pl.cdiv(B, BT),),
        in_specs=[pl.BlockSpec((BT, L, D), lambda i: (i, 0, 0)),
                  pl.BlockSpec((BT, L, D), lambda i: (i, 0, 0)),
                  pl.BlockSpec((BT, L, D), lambda i: (i, 0, 0))],
        out_specs=pl.BlockSpec((BT, L, D), lambda i: (i, 0, 0)),
        compiler_params=_params(("parallel",)),
    )(q, k, v)


def _cbam_kernel(x_ref, w1_ref, w2_ref, ws_ref, bs_ref, o_ref):
    # CBAMBlock (channel + spatial attention, kernel_size=1) with residual.
    x = x_ref[0]                                           # (C, S)
    C = x.shape[0]
    max_p = jnp.max(x, axis=1, keepdims=True)              # (C, 1)
    avg_p = jnp.mean(x, axis=1, keepdims=True)             # (C, 1)
    # fused SE-MLP on both pooled vectors at once: (C,2) columns = [max, avg]
    col = jax.lax.broadcasted_iota(jnp.int32, (C, 2), 1)
    pooled = jnp.where(col == 0, max_p, avg_p)             # (C, 2)
    h = jnp.maximum(jnp.dot(w1_ref[...], pooled,
                            preferred_element_type=jnp.float32), 0.0)   # (Cr, 2)
    se = jnp.dot(w2_ref[...], h, preferred_element_type=jnp.float32)    # (C, 2)
    ca = jax.nn.sigmoid(se[:, 0:1] + se[:, 1:2])            # (C, 1) channel attn
    y = x * ca
    max_c = jnp.max(y, axis=0, keepdims=True)               # (1, S)
    avg_c = jnp.mean(y, axis=0, keepdims=True)               # (1, S)
    ws = ws_ref[...]                                         # (1, 2) 1x1 conv
    sa = jax.nn.sigmoid(ws[:, 0:1] * max_c + ws[:, 1:2] * avg_c + bs_ref[...])
    o_ref[0] = y * sa + x


def cbam(x, w1, w2, ws, bs):
    """x: (N, C, S) flattened NCHW. Returns CBAM(x) + x (residual inside)."""
    N, C, S = x.shape
    Cr = w1.shape[0]
    return pl.pallas_call(
        _cbam_kernel,
        out_shape=jax.ShapeDtypeStruct((N, C, S), jnp.float32),
        grid=(N,),
        in_specs=[pl.BlockSpec((1, C, S), lambda i: (i, 0, 0)),
                  pl.BlockSpec((Cr, C), lambda i: (0, 0)),
                  pl.BlockSpec((C, Cr), lambda i: (0, 0)),
                  pl.BlockSpec((1, 2), lambda i: (0, 0)),
                  pl.BlockSpec((1, 1), lambda i: (0, 0))],
        out_specs=pl.BlockSpec((1, C, S), lambda i: (i, 0, 0)),
        compiler_params=_params(("parallel",)),
    )(x, w1, w2, ws, bs)


# --------------------------------------------------------------------------
# Module forward (JAX glue around the Pallas kernels)
# --------------------------------------------------------------------------

def self_attention(p, values, keys, query, heads):
    N, L, E = query.shape
    D = E // heads
    # lane-dense block-diagonal (E,E) per-head projections (built at init)
    v = linear(values, p["Wv_bd"], None)
    k = linear(keys, p["Wk_bd"], None)
    q = linear(query, p["Wq_bd"], None)
    qh = jnp.transpose(q.reshape(N, L, heads, D), (0, 2, 1, 3)).reshape(N * heads, L, D)
    kh = jnp.transpose(k.reshape(N, L, heads, D), (0, 2, 1, 3)).reshape(N * heads, L, D)
    vh = jnp.transpose(v.reshape(N, L, heads, D), (0, 2, 1, 3)).reshape(N * heads, L, D)
    oh = attention_core(qh, kh, vh, scale=1.0 / math.sqrt(E))   # torch: /sqrt(embed_size)
    return jnp.transpose(oh.reshape(N, heads, L, D), (0, 2, 1, 3)).reshape(N, L, E)


def transformer_block(p, value, key, query, heads):
    att = self_attention(p["attn"], value, key, query, heads)
    # fused: fc_out projection + residual(query) + LayerNorm1
    x = linear_ln_residual(att, p["attn"]["Wo_t"], p["attn"]["bo"], query,
                           p["norm1_g"], p["norm1_b"])
    # fused: FFN + residual(x) + LayerNorm2
    return ffn_ln_residual(x, p["ff_w1_t"], p["ff_b1"], p["ff_w2_t"], p["ff_b2"],
                           p["norm2_g"], p["norm2_b"])


def encoder_forward(p, x):
    out = linear(x, p["init_x_w_t"], p["init_x_b"])         # (N, L, E)
    N, L, E = out.shape
    s = int(math.isqrt(L))
    v_flat = out.reshape(N, E, s * s)                        # torch raw reshape (N,L,E)->(N,E,s,s)
    att = cbam(v_flat, p["cbam_w1"], p["cbam_w2"], p["cbam_ws"], p["cbam_bs"])
    att = att.reshape(N, L, E)                               # torch raw reshape back
    x1 = layernorm_residual(att, out, p["norm1_g"], p["norm1_b"])
    return ffn_ln_residual(x1, p["ff_w1_t"], p["ff_b1"], p["ff_w2_t"], p["ff_b2"],
                           p["norm2_g"], p["norm2_b"])


def decoder_forward(p, x, enc_out, enc_out2, heads):
    for lp in p["layers"]:
        x = transformer_block(lp, enc_out, enc_out2, x, heads)
    out = linear(x, p["fc_out1_w_t"], p["fc_out1_b"])        # (N, L, trg_vocab)
    return out.reshape(out.shape[0], 1, out.shape[1] * out.shape[2])


def transformer_forward(params, src, src2, trg, *, heads):
    # src_mask / trg_mask are None in the reference forward.
    # Run the three encoder passes as one batched call (shared params).
    N = src.shape[0]
    enc_all = encoder_forward(params["enc"], jnp.concatenate([src, src2, trg], axis=0))
    enc_src, enc_src2, enc_src3 = enc_all[:N], enc_all[N:2 * N], enc_all[2 * N:]
    return decoder_forward(params["dec"], enc_src3, enc_src, enc_src2, heads)


# --------------------------------------------------------------------------
# Deterministic parameter init (PyTorch-style uniform bounds, fixed JAX keys)
# Weights for matmuls are stored pre-transposed (In, Out) in bf16.
# --------------------------------------------------------------------------

def _init_linear(key, out_f, in_f, bias=True):
    k1, k2 = jax.random.split(key)
    bound = 1.0 / math.sqrt(in_f)
    w = jax.random.uniform(k1, (out_f, in_f), jnp.float32, -bound, bound)
    if bias:
        b = jax.random.uniform(k2, (out_f,), jnp.float32, -bound, bound)
    else:
        b = jnp.zeros((out_f,), jnp.float32)
    return w, b


def _t(w):
    """torch (Out, In) -> pre-transposed (In, Out) bf16 for the MXU."""
    return jnp.transpose(w).astype(jnp.bfloat16)


def _block_diag_t(w, heads):
    """Per-head (D,D) torch weight -> lane-dense block-diag (E,E) of w^T, bf16."""
    D = w.shape[0]
    wt = jnp.transpose(w)
    E = D * heads
    bd = jnp.zeros((E, E), jnp.float32)
    for h in range(heads):
        bd = bd.at[h * D:(h + 1) * D, h * D:(h + 1) * D].set(wt)
    return bd.astype(jnp.bfloat16)


def init_params(key, src_vocab, trg_vocab, E, heads, num_layers, fexp):
    assert E % heads == 0
    keys = iter(jax.random.split(key, 16 + 8 * num_layers))
    D = E // heads
    Cr = E // heads                                         # CBAM reduction = heads

    enc = {}
    w, b = _init_linear(next(keys), E, src_vocab)
    enc["init_x_w_t"], enc["init_x_b"] = _t(w), b
    enc["cbam_w1"], _ = _init_linear(next(keys), Cr, E, bias=False)
    enc["cbam_w2"], _ = _init_linear(next(keys), E, Cr, bias=False)
    ws, bs = _init_linear(next(keys), 1, 2)                  # spatial 1x1 conv (2->1)+bias
    enc["cbam_ws"], enc["cbam_bs"] = ws, bs.reshape(1, 1)
    enc["norm1_g"], enc["norm1_b"] = jnp.ones((E,), jnp.float32), jnp.zeros((E,), jnp.float32)
    enc["norm2_g"], enc["norm2_b"] = jnp.ones((E,), jnp.float32), jnp.zeros((E,), jnp.float32)
    fw1, fb1 = _init_linear(next(keys), fexp * E, E)
    fw2, fb2 = _init_linear(next(keys), E, fexp * E)
    enc["ff_w1_t"], enc["ff_b1"] = _t(fw1), fb1
    enc["ff_w2_t"], enc["ff_b2"] = _t(fw2), fb2

    layers = []
    for _ in range(num_layers):
        lp = {}
        wv, _ = _init_linear(next(keys), D, D, bias=False)
        wk, _ = _init_linear(next(keys), D, D, bias=False)
        wq, _ = _init_linear(next(keys), D, D, bias=False)
        wo, bo = _init_linear(next(keys), E, E)
        lp["attn"] = {"Wv_bd": _block_diag_t(wv, heads),
                      "Wk_bd": _block_diag_t(wk, heads),
                      "Wq_bd": _block_diag_t(wq, heads),
                      "Wo_t": _t(wo), "bo": bo}
        lp["norm1_g"], lp["norm1_b"] = jnp.ones((E,), jnp.float32), jnp.zeros((E,), jnp.float32)
        lp["norm2_g"], lp["norm2_b"] = jnp.ones((E,), jnp.float32), jnp.zeros((E,), jnp.float32)
        fw1, fb1 = _init_linear(next(keys), fexp * E, E)
        fw2, fb2 = _init_linear(next(keys), E, fexp * E)
        lp["ff_w1_t"], lp["ff_b1"] = _t(fw1), fb1
        lp["ff_w2_t"], lp["ff_b2"] = _t(fw2), fb2
        layers.append(lp)

    dec = {"layers": layers}
    w, b = _init_linear(next(keys), trg_vocab, E)
    dec["fc_out1_w_t"], dec["fc_out1_b"] = _t(w), b
    # TODO(synk): Transformer.conv2 / Transformer.lin and Decoder's embeddings /
    # init_x / fc_out2 are never used in the reference forward pass, so omitted.
    return {"enc": enc, "dec": dec}


if __name__ == "__main__":
    # small shapes consistent with the module: seq length must be a perfect square
    N, L = 2, 16
    SRC_V, TRG_V = 8, 8
    E, HEADS, NLAYERS, FEXP = 32, 4, 2, 2

    key = jax.random.PRNGKey(0)
    kp, ks, ks2, kt = jax.random.split(key, 4)
    params = init_params(kp, SRC_V, TRG_V, E, HEADS, NLAYERS, FEXP)

    src = jax.random.normal(ks, (N, L, SRC_V), jnp.float32)
    src2 = jax.random.normal(ks2, (N, L, SRC_V), jnp.float32)
    trg = jax.random.normal(kt, (N, L, SRC_V), jnp.float32)

    fwd = jax.jit(functools.partial(transformer_forward, heads=HEADS))
    out = fwd(params, src, src2, trg)
    out = jax.block_until_ready(out)
    assert out.shape == (N, 1, L * TRG_V), out.shape
    assert bool(jnp.all(jnp.isfinite(out)))
    print("KERNEL_OK")
</pallas_src>

<mosaic_0001>
module attributes {stable_mosaic.version = 11 : i64} {
  func.func @_linear_kernel(%arg0: i32, %arg1: memref<96x8xf32, #tpu.memory_space<vmem>>, %arg2: memref<8x32xbf16, #tpu.memory_space<vmem>>, %arg3: memref<1x32xf32, #tpu.memory_space<vmem>>, %arg4: memref<96x32xf32, #tpu.memory_space<vmem>>) attributes {dimension_semantics = [#tpu.dimension_semantics<parallel>], iteration_bounds = array<i64: 1>, scalar_prefetch = 0 : i64, scratch_operands = 0 : i64, tpu.core_type = #tpu.core_type<tc>, window_params = [{transform_indices = @transform_0, window_bounds = array<i64: 96, 8>}, {pipeline_mode = #tpu.pipeline_mode<synchronous>, transform_indices = @transform_1, window_bounds = array<i64: 8, 32>}, {pipeline_mode = #tpu.pipeline_mode<synchronous>, transform_indices = @transform_2, window_bounds = array<i64: 1, 32>}, {transform_indices = @transform_3, window_bounds = array<i64: 96, 32>}]} {
    %c0 = arith.constant 0 : index
    %c0_0 = arith.constant 0 : index
    %0 = vector.load %arg1[%c0, %c0_0] : memref<96x8xf32, #tpu.memory_space<vmem>>, vector<96x8xf32>
    %1 = arith.truncf %0 : vector<96x8xf32> to vector<96x8xbf16>
    %c0_1 = arith.constant 0 : index
    %c0_2 = arith.constant 0 : index
    %2 = vector.load %arg2[%c0_1, %c0_2] : memref<8x32xbf16, #tpu.memory_space<vmem>>, vector<8x32xbf16>
    %cst = arith.constant dense<0.000000e+00> : vector<96x32xf32>
    %3 = tpu.matmul %1, %2, %cst {dimension_numbers = #tpu.dot_dimension_numbers<[1], [0], [0], [1], [0, 0, 1, 1], [], []>} : vector<96x8xbf16>, vector<8x32xbf16>, vector<96x32xf32> -> vector<96x32xf32>
    %c0_3 = arith.constant 0 : index
    %c0_4 = arith.constant 0 : index
    %4 = vector.load %arg3[%c0_3, %c0_4] : memref<1x32xf32, #tpu.memory_space<vmem>>, vector<1x32xf32>
    %5 = vector.broadcast %4 : vector<1x32xf32> to vector<96x32xf32>
    %6 = arith.addf %3, %5 : vector<96x32xf32>
    %c0_5 = arith.constant 0 : index
    %c0_6 = arith.constant 0 : index
    %7 = vector.load %arg4[%c0_5, %c0_6] : memref<96x32xf32, #tpu.memory_space<vmem>>, vector<96x32xf32>
    tpu.vector_store %arg4[%c0_5, %c0_6], %6 {strides = array<i32>} : memref<96x32xf32, #tpu.memory_space<vmem>>, vector<96x32xf32>,
    return
  }
  func.func @transform_0(%arg0: i32) -> (i32, i32) {
    %c0_i32 = arith.constant 0 : i32
    %c0_i32_0 = arith.constant 0 : i32
    return %arg0, %c0_i32 : i32, i32
  }
  func.func @transform_1(%arg0: i32) -> (i32, i32) {
    %c0_i32 = arith.constant 0 : i32
    %c0_i32_0 = arith.constant 0 : i32
    %c0_i32_1 = arith.constant 0 : i32
    return %c0_i32, %c0_i32_0 : i32, i32
  }
  func.func @transform_2(%arg0: i32) -> (i32, i32) {
    %c0_i32 = arith.constant 0 : i32
    %c0_i32_0 = arith.constant 0 : i32
    %c0_i32_1 = arith.constant 0 : i32
    return %c0_i32, %c0_i32_0 : i32, i32
  }
  func.func @transform_3(%arg0: i32) -> (i32, i32) {
    %c0_i32 = arith.constant 0 : i32
    %c0_i32_0 = arith.constant 0 : i32
    return %arg0, %c0_i32 : i32, i32
  }
}

module attributes {stable_mosaic.version = 11 : i64} {
  func.func @_cbam_kernel(%arg0: i32, %arg1: memref<1x32x16xf32, #tpu.memory_space<vmem>>, %arg2: memref<8x32xf32, #tpu.memory_space<vmem>>, %arg3: memref<32x8xf32, #tpu.memory_space<vmem>>, %arg4: memref<1x2xf32, #tpu.memory_space<vmem>>, %arg5: memref<1x1xf32, #tpu.memory_space<vmem>>, %arg6: memref<1x32x16xf32, #tpu.memory_space<vmem>>) attributes {dimension_semantics = [#tpu.dimension_semantics<parallel>], iteration_bounds = array<i64: 6>, scalar_prefetch = 0 : i64, scratch_operands = 0 : i64, tpu.core_type = #tpu.core_type<tc>, window_params = [{transform_indices = @transform_0, window_bounds = array<i64: 1, 32, 16>}, {pipeline_mode = #tpu.pipeline_mode<synchronous>, transform_indices = @transform_1, window_bounds = array<i64: 8, 32>}, {pipeline_mode = #tpu.pipeline_mode<synchronous>, transform_indices = @transform_2, window_bounds = array<i64: 32, 8>}, {pipeline_mode = #tpu.pipeline_mode<synchronous>, transform_indices = @transform_3, window_bounds = array<i64: 1, 2>}, {pipeline_mode = #tpu.pipeline_mode<synchronous>, transform_indices = @transform_4, window_bounds = array<i64: 1, 1>}, {transform_indices = @transform_5, window_bounds = array<i64: 1, 32, 16>}]} {
    %c0 = arith.constant 0 : index
    %c0_0 = arith.constant 0 : index
    %c0_1 = arith.constant 0 : index
    %0 = vector.load %arg1[%c0, %c0_0, %c0_1] : memref<1x32x16xf32, #tpu.memory_space<vmem>>, vector<1x32x16xf32>
    %1 = vector.shape_cast %0 : vector<1x32x16xf32> to vector<32x16xf32>
    %cst = arith.constant dense<0xFF800000> : vector<32xf32>
    %2 = vector.multi_reduction <maximumf>, %1, %cst [1] : vector<32x16xf32> to vector<32xf32>
    %3 = vector.shape_cast %2 : vector<32xf32> to vector<32x1xf32>
    %cst_2 = arith.constant dense<0.000000e+00> : vector<32xf32>
    %4 = vector.multi_reduction <add>, %1, %cst_2 [1] : vector<32x16xf32> to vector<32xf32>
    %5 = vector.shape_cast %4 : vector<32xf32> to vector<32x1xf32>
    %cst_3 = arith.constant 1.600000e+01 : f32
    %6 = vector.broadcast %cst_3 : f32 to vector<32x1xf32>
    %7 = arith.divf %5, %6 : vector<32x1xf32>
    %8 = tpu.iota {dimensions = array<i32: 1>} : vector<32x2xi32>
    %c0_i32 = arith.constant 0 : i32
    %9 = vector.broadcast %c0_i32 : i32 to vector<32x2xi32>
    %10 = arith.cmpi eq, %8, %9 : vector<32x2xi32>
    %11 = vector.shape_cast %3 : vector<32x1xf32> to vector<32x1xf32>
    %12 = vector.broadcast %11 : vector<32x1xf32> to vector<32x2xf32>
    %13 = vector.shape_cast %7 : vector<32x1xf32> to vector<32x1xf32>
    %14 = vector.broadcast %13 : vector<32x1xf32> to vector<32x2xf32>
    %15 = arith.select %10, %12, %14 : vector<32x2xi1>, vector<32x2xf32>
    %c0_4 = arith.constant 0 : index
    %c0_5 = arith.constant 0 : index
    %16 = vector.load %arg2[%c0_4, %c0_5] : memref<8x32xf32, #tpu.memory_space<vmem>>, vector<8x32xf32>
    %cst_6 = arith.constant dense<0.000000e+00> : vector<8x2xf32>
    %17 = tpu.matmul %16, %15, %cst_6 {dimension_numbers = #tpu.dot_dimension_numbers<[1], [0], [0], [1], [0, 0, 1, 1], [], []>} : vector<8x32xf32>, vector<32x2xf32>, vector<8x2xf32> -> vector<8x2xf32>
    %cst_7 = arith.constant 0.000000e+00 : f32
    %18 = vector.broadcast %cst_7 : f32 to vector<8x2xf32>
    %19 = arith.maximumf %17, %18 : vector<8x2xf32>
    %c0_8 = arith.constant 0 : index
    %c0_9 = arith.constant 0 : index
    %20 = vector.load %arg3[%c0_8, %c0_9] : memref<32x8xf32, #tpu.memory_space<vmem>>, vector<32x8xf32>
    %cst_10 = arith.constant dense<0.000000e+00> : vector<32x2xf32>
    %21 = tpu.matmul %20, %19, %cst_10 {dimension_numbers = #tpu.dot_dimension_numbers<[1], [0], [0], [1], [0, 0, 1, 1], [], []>} : vector<32x8xf32>, vector<8x2xf32>, vector<32x2xf32> -> vector<32x2xf32>
    %22 = vector.extract_strided_slice %21 {offsets = [0, 0], sizes = [32, 1], strides = [1, 1]} : vector<32x2xf32> to vector<32x1xf32>
    %23 = vector.extract_strided_slice %21 {offsets = [0, 1], sizes = [32, 1], strides = [1, 1]} : vector<32x2xf32> to vector<32x1xf32>
    %24 = arith.addf %22, %23 : vector<32x1xf32>
    %25 = arith.negf %24 : vector<32x1xf32>
    %26 = math.exp %25 : vector<32x1xf32>
    %cst_11 = arith.constant 1.000000e+00 : f32
    %27 = vector.broadcast %cst_11 : f32 to vector<32x1xf32>
    %28 = arith.addf %27, %26 : vector<32x1xf32>
    %29 = arith.divf %27, %28 : vector<32x1xf32>
    %30 = vector.broadcast %29 : vector<32x1xf32> to vector<32x16xf32>
    %31 = arith.mulf %1, %30 : vector<32x16xf32>
    %cst_12 = arith.constant dense<0xFF800000> : vector<16xf32>
    %32 = vector.multi_reduction <maximumf>, %31, %cst_12 [0] : vector<32x16xf32> to vector<16xf32>
    %33 = vector.shape_cast %32 : vector<16xf32> to vector<1x16xf32>
    %cst_13 = arith.constant dense<0.000000e+00> : vector<16xf32>
    %34 = vector.multi_reduction <add>, %31, %cst_13 [0] : vector<32x16xf32> to vector<16xf32>
    %35 = vector.shape_cast %34 : vector<16xf32> to vector<1x16xf32>
    %cst_14 = arith.constant 3.200000e+01 : f32
    %36 = vector.broadcast %cst_14 : f32 to vector<1x16xf32>
    %37 = arith.divf %35, %36 : vector<1x16xf32>
    %c0_15 = arith.constant 0 : index
    %c0_16 = arith.constant 0 : index
    %38 = vector.load %arg4[%c0_15, %c0_16] : memref<1x2xf32, #tpu.memory_space<vmem>>, vector<1x2xf32>
    %39 = vector.extract_strided_slice %38 {offsets = [0, 0], sizes = [1, 1], strides = [1, 1]} : vector<1x2xf32> to vector<1x1xf32>
    %40 = vector.broadcast %39 : vector<1x1xf32> to vector<1x16xf32>
    %41 = arith.mulf %40, %33 : vector<1x16xf32>
    %42 = vector.extract_strided_slice %38 {offsets = [0, 1], sizes = [1, 1], strides = [1, 1]} : vector<1x2xf32> to vector<1x1xf32>
    %43 = vector.broadcast %42 : vector<1x1xf32> to vector<1x16xf32>
    %44 = arith.mulf %43, %37 : vector<1x16xf32>
    %45 = arith.addf %41, %44 : vector<1x16xf32>
    %c0_17 = arith.constant 0 : index
    %c0_18 = arith.constant 0 : index
    %46 = vector.load %arg5[%c0_17, %c0_18] : memref<1x1xf32, #tpu.memory_space<vmem>>, vector<1x1xf32>
    %47 = vector.broadcast %46 : vector<1x1xf32> to vector<1x16xf32>
    %48 = arith.addf %45, %47 : vector<1x16xf32>
    %49 = arith.negf %48 : vector<1x16xf32>
    %50 = math.exp %49 : vector<1x16xf32>
    %cst_19 = arith.constant 1.000000e+00 : f32
    %51 = vector.broadcast %cst_19 : f32 to vector<1x16xf32>
    %52 = arith.addf %51, %50 : vector<1x16xf32>
    %53 = arith.divf %51, %52 : vector<1x16xf32>
    %54 = vector.broadcast %53 : vector<1x16xf32> to vector<32x16xf32>
    %55 = arith.mulf %31, %54 : vector<32x16xf32>
    %56 = arith.addf %55, %1 : vector<32x16xf32>
    %c0_20 = arith.constant 0 : index
    %c0_21 = arith.constant 0 : index
    %c0_22 = arith.constant 0 : index
    %57 = vector.load %arg6[%c0_20, %c0_21, %c0_22] : memref<1x32x16xf32, #tpu.memory_space<vmem>>, vector<1x32x16xf32>
    %58 = vector.shape_cast %57 : vector<1x32x16xf32> to vector<32x16xf32>
    %59 = vector.shape_cast %56 : vector<32x16xf32> to vector<1x32x16xf32>
    tpu.vector_store %arg6[%c0_20, %c0_21, %c0_22], %59 {strides = array<i32>} : memref<1x32x16xf32, #tpu.memory_space<vmem>>, vector<1x32x16xf32>,
    return
  }
  func.func @transform_0(%arg0: i32) -> (i32, i32, i32) {
    %c0_i32 = arith.constant 0 : i32
    %c0_i32_0 = arith.constant 0 : i32
    %c0_i32_1 = arith.constant 0 : i32
    return %arg0, %c0_i32, %c0_i32_0 : i32, i32, i32
  }
  func.func @transform_1(%arg0: i32) -> (i32, i32) {
    %c0_i32 = arith.constant 0 : i32
    %c0_i32_0 = arith.constant 0 : i32
    %c0_i32_1 = arith.constant 0 : i32
    return %c0_i32, %c0_i32_0 : i32, i32
  }
  func.func @transform_2(%arg0: i32) -> (i32, i32) {
    %c0_i32 = arith.constant 0 : i32
    %c0_i32_0 = arith.constant 0 : i32
    %c0_i32_1 = arith.constant 0 : i32
    return %c0_i32, %c0_i32_0 : i32, i32
  }
  func.func @transform_3(%arg0: i32) -> (i32, i32) {
    %c0_i32 = arith.constant 0 : i32
    %c0_i32_0 = arith.constant 0 : i32
    %c0_i32_1 = arith.constant 0 : i32
    return %c0_i32, %c0_i32_0 : i32, i32
  }
  func.func @transform_4(%arg0: i32) -> (i32, i32) {
    %c0_i32 = arith.constant 0 : i32
    %c0_i32_0 = arith.constant 0 : i32
    %c0_i32_1 = arith.constant 0 : i32
    return %c0_i32, %c0_i32_0 : i32, i32
  }
  func.func @transform_5(%arg0: i32) -> (i32, i32, i32) {
    %c0_i32 = arith.constant 0 : i32
    %c0_i32_0 = arith.constant 0 : i32
    %c0_i32_1 = arith.constant 0 : i32
    return %arg0, %c0_i32, %c0_i32_0 : i32, i32, i32
  }
}

module attributes {stable_mosaic.version = 11 : i64} {
  func.func @_ln_res_kernel(%arg0: i32, %arg1: memref<96x32xf32, #tpu.memory_space<vmem>>, %arg2: memref<96x32xf32, #tpu.memory_space<vmem>>, %arg3: memref<1x32xf32, #tpu.memory_space<vmem>>, %arg4: memref<1x32xf32, #tpu.memory_space<vmem>>, %arg5: memref<96x32xf32, #tpu.memory_space<vmem>>) attributes {dimension_semantics = [#tpu.dimension_semantics<parallel>], iteration_bounds = array<i64: 1>, scalar_prefetch = 0 : i64, scratch_operands = 0 : i64, tpu.core_type = #tpu.core_type<tc>, window_params = [{transform_indices = @transform_0, window_bounds = array<i64: 96, 32>}, {transform_indices = @transform_1, window_bounds = array<i64: 96, 32>}, {pipeline_mode = #tpu.pipeline_mode<synchronous>, transform_indices = @transform_2, window_bounds = array<i64: 1, 32>}, {pipeline_mode = #tpu.pipeline_mode<synchronous>, transform_indices = @transform_3, window_bounds = array<i64: 1, 32>}, {transform_indices = @transform_4, window_bounds = array<i64: 96, 32>}]} {
    %c0 = arith.constant 0 : index
    %c0_0 = arith.constant 0 : index
    %0 = vector.load %arg1[%c0, %c0_0] : memref<96x32xf32, #tpu.memory_space<vmem>>, vector<96x32xf32>
    %c0_1 = arith.constant 0 : index
    %c0_2 = arith.constant 0 : index
    %1 = vector.load %arg2[%c0_1, %c0_2] : memref<96x32xf32, #tpu.memory_space<vmem>>, vector<96x32xf32>
    %2 = arith.addf %0, %1 : vector<96x32xf32>
    %cst = arith.constant dense<0.000000e+00> : vector<96xf32>
    %3 = vector.multi_reduction <add>, %2, %cst [1] : vector<96x32xf32> to vector<96xf32>
    %4 = vector.shape_cast %3 : vector<96xf32> to vector<96x1xf32>
    %cst_3 = arith.constant 3.200000e+01 : f32
    %5 = vector.broadcast %cst_3 : f32 to vector<96x1xf32>
    %6 = arith.divf %4, %5 : vector<96x1xf32>
    %7 = vector.broadcast %6 : vector<96x1xf32> to vector<96x32xf32>
    %8 = arith.subf %2, %7 : vector<96x32xf32>
    %9 = arith.mulf %8, %8 : vector<96x32xf32>
    %cst_4 = arith.constant dense<0.000000e+00> : vector<96xf32>
    %10 = vector.multi_reduction <add>, %9, %cst_4 [1] : vector<96x32xf32> to vector<96xf32>
    %11 = vector.shape_cast %10 : vector<96xf32> to vector<96x1xf32>
    %cst_5 = arith.constant 3.200000e+01 : f32
    %12 = vector.broadcast %cst_5 : f32 to vector<96x1xf32>
    %13 = arith.divf %11, %12 : vector<96x1xf32>
    %14 = vector.broadcast %6 : vector<96x1xf32> to vector<96x32xf32>
    %15 = arith.subf %2, %14 : vector<96x32xf32>
    %cst_6 = arith.constant 9.99999974E-6 : f32
    %16 = vector.broadcast %cst_6 : f32 to vector<96x1xf32>
    %17 = arith.addf %13, %16 : vector<96x1xf32>
    %18 = math.rsqrt %17 : vector<96x1xf32>
    %19 = vector.broadcast %18 : vector<96x1xf32> to vector<96x32xf32>
    %20 = arith.mulf %15, %19 : vector<96x32xf32>
    %c0_7 = arith.constant 0 : index
    %c0_8 = arith.constant 0 : index
    %21 = vector.load %arg3[%c0_7, %c0_8] : memref<1x32xf32, #tpu.memory_space<vmem>>, vector<1x32xf32>
    %22 = vector.broadcast %21 : vector<1x32xf32> to vector<96x32xf32>
    %23 = arith.mulf %20, %22 : vector<96x32xf32>
    %c0_9 = arith.constant 0 : index
    %c0_10 = arith.constant 0 : index
    %24 = vector.load %arg4[%c0_9, %c0_10] : memref<1x32xf32, #tpu.memory_space<vmem>>, vector<1x32xf32>
    %25 = vector.broadcast %24 : vector<1x32xf32> to vector<96x32xf32>
    %26 = arith.addf %23, %25 : vector<96x32xf32>
    %c0_11 = arith.constant 0 : index
    %c0_12 = arith.constant 0 : index
    %27 = vector.load %arg5[%c0_11, %c0_12] : memref<96x32xf32, #tpu.memory_space<vmem>>, vector<96x32xf32>
    tpu.vector_store %arg5[%c0_11, %c0_12], %26 {strides = array<i32>} : memref<96x32xf32, #tpu.memory_space<vmem>>, vector<96x32xf32>,
    return
  }
  func.func @transform_0(%arg0: i32) -> (i32, i32) {
    %c0_i32 = arith.constant 0 : i32
    %c0_i32_0 = arith.constant 0 : i32
    return %arg0, %c0_i32 : i32, i32
  }
  func.func @transform_1(%arg0: i32) -> (i32, i32) {
    %c0_i32 = arith.constant 0 : i32
    %c0_i32_0 = arith.constant 0 : i32
    return %arg0, %c0_i32 : i32, i32
  }
  func.func @transform_2(%arg0: i32) -> (i32, i32) {
    %c0_i32 = arith.constant 0 : i32
    %c0_i32_0 = arith.constant 0 : i32
    %c0_i32_1 = arith.constant 0 : i32
    return %c0_i32, %c0_i32_0 : i32, i32
  }
  func.func @transform_3(%arg0: i32) -> (i32, i32) {
    %c0_i32 = arith.constant 0 : i32
    %c0_i32_0 = arith.constant 0 : i32
    %c0_i32_1 = arith.constant 0 : i32
    return %c0_i32, %c0_i32_0 : i32, i32
  }
  func.func @transform_4(%arg0: i32) -> (i32, i32) {
    %c0_i32 = arith.constant 0 : i32
    %c0_i32_0 = arith.constant 0 : i32
    return %arg0, %c0_i32 : i32, i32
  }
}

module attributes {stable_mosaic.version = 11 : i64} {
  func.func @_ffn_ln_res_kernel(%arg0: i32, %arg1: i32, %arg2: memref<96x32xf32, #tpu.memory_space<vmem>>, %arg3: memref<32x64xbf16, #tpu.memory_space<vmem>>, %arg4: memref<1x64xf32, #tpu.memory_space<vmem>>, %arg5: memref<64x32xbf16, #tpu.memory_space<vmem>>, %arg6: memref<1x32xf32, #tpu.memory_space<vmem>>, %arg7: memref<1x32xf32, #tpu.memory_space<vmem>>, %arg8: memref<1x32xf32, #tpu.memory_space<vmem>>, %arg9: memref<96x32xf32, #tpu.memory_space<vmem>>, %arg10: memref<96x32xf32, #tpu.memory_space<vmem>>) attributes {dimension_semantics = [#tpu.dimension_semantics<parallel>, #tpu.dimension_semantics<arbitrary>], iteration_bounds = array<i64: 1, 1>, scalar_prefetch = 0 : i64, scratch_operands = 1 : i64, tpu.core_type = #tpu.core_type<tc>, window_params = [{transform_indices = @transform_0, window_bounds = array<i64: 96, 32>}, {transform_indices = @transform_1, window_bounds = array<i64: 32, 64>}, {transform_indices = @transform_2, window_bounds = array<i64: 1, 64>}, {transform_indices = @transform_3, window_bounds = array<i64: 64, 32>}, {pipeline_mode = #tpu.pipeline_mode<synchronous>, transform_indices = @transform_4, window_bounds = array<i64: 1, 32>}, {pipeline_mode = #tpu.pipeline_mode<synchronous>, transform_indices = @transform_5, window_bounds = array<i64: 1, 32>}, {pipeline_mode = #tpu.pipeline_mode<synchronous>, transform_indices = @transform_6, window_bounds = array<i64: 1, 32>}, {transform_indices = @transform_7, window_bounds = array<i64: 96, 32>}]} {
    %c0_i32 = arith.constant 0 : i32
    %0 = arith.cmpi eq, %arg1, %c0_i32 : i32
    %1 = arith.extui %0 : i1 to i32
    %c0_i32_0 = arith.constant 0 : i32
    %2 = arith.cmpi ne, %1, %c0_i32_0 : i32
    scf.if %2 {
      %cst_15 = arith.constant 0.000000e+00 : f32
      %20 = vector.broadcast %cst_15 : f32 to vector<96x32xf32>
      %c0_16 = arith.constant 0 : index
      %c0_17 = arith.constant 0 : index
      %21 = vector.load %arg10[%c0_16, %c0_17] : memref<96x32xf32, #tpu.memory_space<vmem>>, vector<96x32xf32>
      tpu.vector_store %arg10[%c0_16, %c0_17], %20 {strides = array<i32>} : memref<96x32xf32, #tpu.memory_space<vmem>>, vector<96x32xf32>,
    } else {
    }
    %c0 = arith.constant 0 : index
    %c0_1 = arith.constant 0 : index
    %3 = vector.load %arg2[%c0, %c0_1] : memref<96x32xf32, #tpu.memory_space<vmem>>, vector<96x32xf32>
    %4 = arith.truncf %3 : vector<96x32xf32> to vector<96x32xbf16>
    %c0_2 = arith.constant 0 : index
    %c0_3 = arith.constant 0 : index
    %5 = vector.load %arg3[%c0_2, %c0_3] : memref<32x64xbf16, #tpu.memory_space<vmem>>, vector<32x64xbf16>
    %cst = arith.constant dense<0.000000e+00> : vector<96x64xf32>
    %6 = tpu.matmul %4, %5, %cst {dimension_numbers = #tpu.dot_dimension_numbers<[1], [0], [0], [1], [0, 0, 1, 1], [], []>} : vector<96x32xbf16>, vector<32x64xbf16>, vector<96x64xf32> -> vector<96x64xf32>
    %c0_4 = arith.constant 0 : index
    %c0_5 = arith.constant 0 : index
    %7 = vector.load %arg4[%c0_4, %c0_5] : memref<1x64xf32, #tpu.memory_space<vmem>>, vector<1x64xf32>
    %8 = vector.broadcast %7 : vector<1x64xf32> to vector<96x64xf32>
    %9 = arith.addf %6, %8 : vector<96x64xf32>
    %10 = math.tanh %9 : vector<96x64xf32>
    %c0_6 = arith.constant 0 : index
    %c0_7 = arith.constant 0 : index
    %11 = vector.load %arg10[%c0_6, %c0_7] : memref<96x32xf32, #tpu.memory_space<vmem>>, vector<96x32xf32>
    %12 = arith.truncf %10 : vector<96x64xf32> to vector<96x64xbf16>
    %c0_8 = arith.constant 0 : index
    %c0_9 = arith.constant 0 : index
    %13 = vector.load %arg5[%c0_8, %c0_9] : memref<64x32xbf16, #tpu.memory_space<vmem>>, vector<64x32xbf16>
    %cst_10 = arith.constant dense<0.000000e+00> : vector<96x32xf32>
    %14 = tpu.matmul %12, %13, %cst_10 {dimension_numbers = #tpu.dot_dimension_numbers<[1], [0], [0], [1], [0, 0, 1, 1], [], []>} : vector<96x64xbf16>, vector<64x32xbf16>, vector<96x32xf32> -> vector<96x32xf32>
    %15 = arith.addf %11, %14 : vector<96x32xf32>
    %c0_11 = arith.constant 0 : index
    %c0_12 = arith.constant 0 : index
    %16 = vector.load %arg10[%c0_11, %c0_12] : memref<96x32xf32, #tpu.memory_space<vmem>>, vector<96x32xf32>
    tpu.vector_store %arg10[%c0_11, %c0_12], %15 {strides = array<i32>} : memref<96x32xf32, #tpu.memory_space<vmem>>, vector<96x32xf32>,
    %c0_i32_13 = arith.constant 0 : i32
    %17 = arith.cmpi eq, %arg1, %c0_i32_13 : i32
    %18 = arith.extui %17 : i1 to i32
    %c0_i32_14 = arith.constant 0 : i32
    %19 = arith.cmpi ne, %18, %c0_i32_14 : i32
    scf.if %19 {
      %c0_15 = arith.constant 0 : index
      %c0_16 = arith.constant 0 : index
      %20 = vector.load %arg10[%c0_15, %c0_16] : memref<96x32xf32, #tpu.memory_space<vmem>>, vector<96x32xf32>
      %c0_17 = arith.constant 0 : index
      %c0_18 = arith.constant 0 : index
      %21 = vector.load %arg6[%c0_17, %c0_18] : memref<1x32xf32, #tpu.memory_space<vmem>>, vector<1x32xf32>
      %22 = vector.broadcast %21 : vector<1x32xf32> to vector<96x32xf32>
      %23 = arith.addf %20, %22 : vector<96x32xf32>
      %c0_19 = arith.constant 0 : index
      %c0_20 = arith.constant 0 : index
      %24 = vector.load %arg2[%c0_19, %c0_20] : memref<96x32xf32, #tpu.memory_space<vmem>>, vector<96x32xf32>
      %25 = arith.addf %23, %24 : vector<96x32xf32>
      %cst_21 = arith.constant dense<0.000000e+00> : vector<96xf32>
      %26 = vector.multi_reduction <add>, %25, %cst_21 [1] : vector<96x32xf32> to vector<96xf32>
      %27 = vector.shape_cast %26 : vector<96xf32> to vector<96x1xf32>
      %cst_22 = arith.constant 3.200000e+01 : f32
      %28 = vector.broadcast %cst_22 : f32 to vector<96x1xf32>
      %29 = arith.divf %27, %28 : vector<96x1xf32>
      %30 = vector.broadcast %29 : vector<96x1xf32> to vector<96x32xf32>
      %31 = arith.subf %25, %30 : vector<96x32xf32>
      %32 = arith.mulf %31, %31 : vector<96x32xf32>
      %cst_23 = arith.constant dense<0.000000e+00> : vector<96xf32>
      %33 = vector.multi_reduction <add>, %32, %cst_23 [1] : vector<96x32xf32> to vector<96xf32>
      %34 = vector.shape_cast %33 : vector<96xf32> to vector<96x1xf32>
      %cst_24 = arith.constant 3.200000e+01 : f32
      %35 = vector.broadcast %cst_24 : f32 to vector<96x1xf32>
      %36 = arith.divf %34, %35 : vector<96x1xf32>
      %37 = vector.broadcast %29 : vector<96x1xf32> to vector<96x32xf32>
      %38 = arith.subf %25, %37 : vector<96x32xf32>
      %cst_25 = arith.constant 9.99999974E-6 : f32
      %39 = vector.broadcast %cst_25 : f32 to vector<96x1xf32>
      %40 = arith.addf %36, %39 : vector<96x1xf32>
      %41 = math.rsqrt %40 : vector<96x1xf32>
      %42 = vector.broadcast %41 : vector<96x1xf32> to vector<96x32xf32>
      %43 = arith.mulf %38, %42 : vector<96x32xf32>
      %c0_26 = arith.constant 0 : index
      %c0_27 = arith.constant 0 : index
      %44 = vector.load %arg7[%c0_26, %c0_27] : memref<1x32xf32, #tpu.memory_space<vmem>>, vector<1x32xf32>
      %45 = vector.broadcast %44 : vector<1x32xf32> to vector<96x32xf32>
      %46 = arith.mulf %43, %45 : vector<96x32xf32>
      %c0_28 = arith.constant 0 : index
      %c0_29 = arith.constant 0 : index
      %47 = vector.load %arg8[%c0_28, %c0_29] : memref<1x32xf32, #tpu.memory_space<vmem>>, vector<1x32xf32>
      %48 = vector.broadcast %47 : vector<1x32xf32> to vector<96x32xf32>
      %49 = arith.addf %46, %48 : vector<96x32xf32>
      %c0_30 = arith.constant 0 : index
      %c0_31 = arith.constant 0 : index
      %50 = vector.load %arg9[%c0_30, %c0_31] : memref<96x32xf32, #tpu.memory_space<vmem>>, vector<96x32xf32>
      tpu.vector_store %arg9[%c0_30, %c0_31], %49 {strides = array<i32>} : memref<96x32xf32, #tpu.memory_space<vmem>>, vector<96x32xf32>,
    } else {
    }
    return
  }
  func.func @transform_0(%arg0: i32, %arg1: i32) -> (i32, i32) {
    %c0_i32 = arith.constant 0 : i32
    %c0_i32_0 = arith.constant 0 : i32
    return %arg0, %c0_i32 : i32, i32
  }
  func.func @transform_1(%arg0: i32, %arg1: i32) -> (i32, i32) {
    %c0_i32 = arith.constant 0 : i32
    %c0_i32_0 = arith.constant 0 : i32
    return %c0_i32, %arg1 : i32, i32
  }
  func.func @transform_2(%arg0: i32, %arg1: i32) -> (i32, i32) {
    %c0_i32 = arith.constant 0 : i32
    %c0_i32_0 = arith.constant 0 : i32
    return %c0_i32, %arg1 : i32, i32
  }
  func.func @transform_3(%arg0: i32, %arg1: i32) -> (i32, i32) {
    %c0_i32 = arith.constant 0 : i32
    %c0_i32_0 = arith.constant 0 : i32
    return %arg1, %c0_i32 : i32, i32
  }
  func.func @transform_4(%arg0: i32, %arg1: i32) -> (i32, i32) {
    %c0_i32 = arith.constant 0 : i32
    %c0_i32_0 = arith.constant 0 : i32
    %c0_i32_1 = arith.constant 0 : i32
    return %c0_i32, %c0_i32_0 : i32, i32
  }
  func.func @transform_5(%arg0: i32, %arg1: i32) -> (i32, i32) {
    %c0_i32 = arith.constant 0 : i32
    %c0_i32_0 = arith.constant 0 : i32
    %c0_i32_1 = arith.constant 0 : i32
    return %c0_i32, %c0_i32_0 : i32, i32
  }
  func.func @transform_6(%arg0: i32, %arg1: i32) -> (i32, i32) {
    %c0_i32 = arith.constant 0 : i32
    %c0_i32_0 = arith.constant 0 : i32
    %c0_i32_1 = arith.constant 0 : i32
    return %c0_i32, %c0_i32_0 : i32, i32
  }
  func.func @transform_7(%arg0: i32, %arg1: i32) -> (i32, i32) {
    %c0_i32 = arith.constant 0 : i32
    %c0_i32_0 = arith.constant 0 : i32
    return %arg0, %c0_i32 : i32, i32
  }
}

module attributes {stable_mosaic.version = 11 : i64} {
  func.func @_linear_kernel(%arg0: i32, %arg1: memref<32x32xf32, #tpu.memory_space<vmem>>, %arg2: memref<32x32xbf16, #tpu.memory_space<vmem>>, %arg3: memref<1x32xf32, #tpu.memory_space<vmem>>, %arg4: memref<32x32xf32, #tpu.memory_space<vmem>>) attributes {dimension_semantics = [#tpu.dimension_semantics<parallel>], iteration_bounds = array<i64: 1>, scalar_prefetch = 0 : i64, scratch_operands = 0 : i64, tpu.core_type = #tpu.core_type<tc>, window_params = [{transform_indices = @transform_0, window_bounds = array<i64: 32, 32>}, {pipeline_mode = #tpu.pipeline_mode<synchronous>, transform_indices = @transform_1, window_bounds = array<i64: 32, 32>}, {pipeline_mode = #tpu.pipeline_mode<synchronous>, transform_indices = @transform_2, window_bounds = array<i64: 1, 32>}, {transform_indices = @transform_3, window_bounds = array<i64: 32, 32>}]} {
    %c0 = arith.constant 0 : index
    %c0_0 = arith.constant 0 : index
    %0 = vector.load %arg1[%c0, %c0_0] : memref<32x32xf32, #tpu.memory_space<vmem>>, vector<32x32xf32>
    %1 = arith.truncf %0 : vector<32x32xf32> to vector<32x32xbf16>
    %c0_1 = arith.constant 0 : index
    %c0_2 = arith.constant 0 : index
    %2 = vector.load %arg2[%c0_1, %c0_2] : memref<32x32xbf16, #tpu.memory_space<vmem>>, vector<32x32xbf16>
    %cst = arith.constant dense<0.000000e+00> : vector<32x32xf32>
    %3 = tpu.matmul %1, %2, %cst {dimension_numbers = #tpu.dot_dimension_numbers<[1], [0], [0], [1], [0, 0, 1, 1], [], []>} : vector<32x32xbf16>, vector<32x32xbf16>, vector<32x32xf32> -> vector<32x32xf32>
    %c0_3 = arith.constant 0 : index
    %c0_4 = arith.constant 0 : index
    %4 = vector.load %arg3[%c0_3, %c0_4] : memref<1x32xf32, #tpu.memory_space<vmem>>, vector<1x32xf32>
    %5 = vector.broadcast %4 : vector<1x32xf32> to vector<32x32xf32>
    %6 = arith.addf %3, %5 : vector<32x32xf32>
    %c0_5 = arith.constant 0 : index
    %c0_6 = arith.constant 0 : index
    %7 = vector.load %arg4[%c0_5, %c0_6] : memref<32x32xf32, #tpu.memory_space<vmem>>, vector<32x32xf32>
    tpu.vector_store %arg4[%c0_5, %c0_6], %6 {strides = array<i32>} : memref<32x32xf32, #tpu.memory_space<vmem>>, vector<32x32xf32>,
    return
  }
  func.func @transform_0(%arg0: i32) -> (i32, i32) {
    %c0_i32 = arith.constant 0 : i32
    %c0_i32_0 = arith.constant 0 : i32
    return %arg0, %c0_i32 : i32, i32
  }
  func.func @transform_1(%arg0: i32) -> (i32, i32) {
    %c0_i32 = arith.constant 0 : i32
    %c0_i32_0 = arith.constant 0 : i32
    %c0_i32_1 = arith.constant 0 : i32
    return %c0_i32, %c0_i32_0 : i32, i32
  }
  func.func @transform_2(%arg0: i32) -> (i32, i32) {
    %c0_i32 = arith.constant 0 : i32
    %c0_i32_0 = arith.constant 0 : i32
    %c0_i32_1 = arith.constant 0 : i32
    return %c0_i32, %c0_i32_0 : i32, i32
  }
  func.func @transform_3(%arg0: i32) -> (i32, i32) {
    %c0_i32 = arith.constant 0 : i32
    %c0_i32_0 = arith.constant 0 : i32
    return %arg0, %c0_i32 : i32, i32
  }
}

module attributes {stable_mosaic.version = 11 : i64} {
  func.func @_attn_kernel(%arg0: i32, %arg1: memref<8x16x8xf32, #tpu.memory_space<vmem>>, %arg2: memref<8x16x8xf32, #tpu.memory_space<vmem>>, %arg3: memref<8x16x8xf32, #tpu.memory_space<vmem>>, %arg4: memref<8x16x8xf32, #tpu.memory_space<vmem>>) attributes {dimension_semantics = [#tpu.dimension_semantics<parallel>], iteration_bounds = array<i64: 1>, scalar_prefetch = 0 : i64, scratch_operands = 0 : i64, tpu.core_type = #tpu.core_type<tc>, window_params = [{transform_indices = @transform_0, window_bounds = array<i64: 8, 16, 8>}, {transform_indices = @transform_1, window_bounds = array<i64: 8, 16, 8>}, {transform_indices = @transform_2, window_bounds = array<i64: 8, 16, 8>}, {transform_indices = @transform_3, window_bounds = array<i64: 8, 16, 8>}]} {
    %c0 = arith.constant 0 : index
    %c0_0 = arith.constant 0 : index
    %c0_1 = arith.constant 0 : index
    %0 = vector.load %arg1[%c0, %c0_0, %c0_1] : memref<8x16x8xf32, #tpu.memory_space<vmem>>, vector<8x16x8xf32>
    %1 = arith.truncf %0 : vector<8x16x8xf32> to vector<8x16x8xbf16>
    %c0_2 = arith.constant 0 : index
    %c0_3 = arith.constant 0 : index
    %c0_4 = arith.constant 0 : index
    %2 = vector.load %arg2[%c0_2, %c0_3, %c0_4] : memref<8x16x8xf32, #tpu.memory_space<vmem>>, vector<8x16x8xf32>
    %3 = arith.truncf %2 : vector<8x16x8xf32> to vector<8x16x8xbf16>
    %c0_5 = arith.constant 0 : index
    %c0_6 = arith.constant 0 : index
    %c0_7 = arith.constant 0 : index
    %4 = vector.load %arg3[%c0_5, %c0_6, %c0_7] : memref<8x16x8xf32, #tpu.memory_space<vmem>>, vector<8x16x8xf32>
    %5 = arith.truncf %4 : vector<8x16x8xf32> to vector<8x16x8xbf16>
    %cst = arith.constant dense<0.000000e+00> : vector<8x16x16xf32>
    %6 = tpu.matmul %1, %3, %cst {dimension_numbers = #tpu.dot_dimension_numbers<[2], [2], [1], [1], [0, 0, 0, 1, 1, 1], [0], [0]>} : vector<8x16x8xbf16>, vector<8x16x8xbf16>, vector<8x16x16xf32> -> vector<8x16x16xf32>
    %cst_8 = arith.constant 0.176776692 : f32
    %7 = vector.broadcast %cst_8 : f32 to vector<8x16x16xf32>
    %8 = arith.mulf %6, %7 : vector<8x16x16xf32>
    %cst_9 = arith.constant dense<0xFF800000> : vector<8x16xf32>
    %9 = vector.multi_reduction <maximumf>, %8, %cst_9 [2] : vector<8x16x16xf32> to vector<8x16xf32>
    %10 = vector.shape_cast %9 : vector<8x16xf32> to vector<8x16x1xf32>
    %11 = vector.broadcast %10 : vector<8x16x1xf32> to vector<8x16x16xf32>
    %12 = arith.subf %8, %11 : vector<8x16x16xf32>
    %13 = math.exp %12 : vector<8x16x16xf32>
    %cst_10 = arith.constant dense<0.000000e+00> : vector<8x16xf32>
    %14 = vector.multi_reduction <add>, %13, %cst_10 [2] : vector<8x16x16xf32> to vector<8x16xf32>
    %15 = vector.shape_cast %14 : vector<8x16xf32> to vector<8x16x1xf32>
    %16 = tpu.reciprocal %15 {approx = true} : vector<8x16x1xf32> -> vector<8x16x1xf32>
    %17 = vector.broadcast %16 : vector<8x16x1xf32> to vector<8x16x16xf32>
    %18 = arith.mulf %13, %17 : vector<8x16x16xf32>
    %19 = arith.truncf %18 : vector<8x16x16xf32> to vector<8x16x16xbf16>
    %cst_11 = arith.constant dense<0.000000e+00> : vector<8x16x8xf32>
    %20 = tpu.matmul %19, %5, %cst_11 {dimension_numbers = #tpu.dot_dimension_numbers<[2], [1], [1], [2], [0, 0, 0, 1, 1, 2], [0], [0]>} : vector<8x16x16xbf16>, vector<8x16x8xbf16>, vector<8x16x8xf32> -> vector<8x16x8xf32>
    %c0_12 = arith.constant 0 : index
    %c0_13 = arith.constant 0 : index
    %c0_14 = arith.constant 0 : index
    %21 = vector.load %arg4[%c0_12, %c0_13, %c0_14] : memref<8x16x8xf32, #tpu.memory_space<vmem>>, vector<8x16x8xf32>
    tpu.vector_store %arg4[%c0_12, %c0_13, %c0_14], %20 {strides = array<i32>} : memref<8x16x8xf32, #tpu.memory_space<vmem>>, vector<8x16x8xf32>,
    return
  }
  func.func @transform_0(%arg0: i32) -> (i32, i32, i32) {
    %c0_i32 = arith.constant 0 : i32
    %c0_i32_0 = arith.constant 0 : i32
    %c0_i32_1 = arith.constant 0 : i32
    return %arg0, %c0_i32, %c0_i32_0 : i32, i32, i32
  }
  func.func @transform_1(%arg0: i32) -> (i32, i32, i32) {
    %c0_i32 = arith.constant 0 : i32
    %c0_i32_0 = arith.constant 0 : i32
    %c0_i32_1 = arith.constant 0 : i32
    return %arg0, %c0_i32, %c0_i32_0 : i32, i32, i32
  }
  func.func @transform_2(%arg0: i32) -> (i32, i32, i32) {
    %c0_i32 = arith.constant 0 : i32
    %c0_i32_0 = arith.constant 0 : i32
    %c0_i32_1 = arith.constant 0 : i32
    return %arg0, %c0_i32, %c0_i32_0 : i32, i32, i32
  }
  func.func @transform_3(%arg0: i32) -> (i32, i32, i32) {
    %c0_i32 = arith.constant 0 : i32
    %c0_i32_0 = arith.constant 0 : i32
    %c0_i32_1 = arith.constant 0 : i32
    return %arg0, %c0_i32, %c0_i32_0 : i32, i32, i32
  }
}

module attributes {stable_mosaic.version = 11 : i64} {
  func.func @_ffn_ln_res_kernel(%arg0: i32, %arg1: i32, %arg2: memref<32x32xf32, #tpu.memory_space<vmem>>, %arg3: memref<32x64xbf16, #tpu.memory_space<vmem>>, %arg4: memref<1x64xf32, #tpu.memory_space<vmem>>, %arg5: memref<64x32xbf16, #tpu.memory_space<vmem>>, %arg6: memref<1x32xf32, #tpu.memory_space<vmem>>, %arg7: memref<1x32xf32, #tpu.memory_space<vmem>>, %arg8: memref<1x32xf32, #tpu.memory_space<vmem>>, %arg9: memref<32x32xf32, #tpu.memory_space<vmem>>, %arg10: memref<32x32xf32, #tpu.memory_space<vmem>>) attributes {dimension_semantics = [#tpu.dimension_semantics<parallel>, #tpu.dimension_semantics<arbitrary>], iteration_bounds = array<i64: 1, 1>, scalar_prefetch = 0 : i64, scratch_operands = 1 : i64, tpu.core_type = #tpu.core_type<tc>, window_params = [{transform_indices = @transform_0, window_bounds = array<i64: 32, 32>}, {transform_indices = @transform_1, window_bounds = array<i64: 32, 64>}, {transform_indices = @transform_2, window_bounds = array<i64: 1, 64>}, {transform_indices = @transform_3, window_bounds = array<i64: 64, 32>}, {pipeline_mode = #tpu.pipeline_mode<synchronous>, transform_indices = @transform_4, window_bounds = array<i64: 1, 32>}, {pipeline_mode = #tpu.pipeline_mode<synchronous>, transform_indices = @transform_5, window_bounds = array<i64: 1, 32>}, {pipeline_mode = #tpu.pipeline_mode<synchronous>, transform_indices = @transform_6, window_bounds = array<i64: 1, 32>}, {transform_indices = @transform_7, window_bounds = array<i64: 32, 32>}]} {
    %c0_i32 = arith.constant 0 : i32
    %0 = arith.cmpi eq, %arg1, %c0_i32 : i32
    %1 = arith.extui %0 : i1 to i32
    %c0_i32_0 = arith.constant 0 : i32
    %2 = arith.cmpi ne, %1, %c0_i32_0 : i32
    scf.if %2 {
      %cst_15 = arith.constant 0.000000e+00 : f32
      %20 = vector.broadcast %cst_15 : f32 to vector<32x32xf32>
      %c0_16 = arith.constant 0 : index
      %c0_17 = arith.constant 0 : index
      %21 = vector.load %arg10[%c0_16, %c0_17] : memref<32x32xf32, #tpu.memory_space<vmem>>, vector<32x32xf32>
      tpu.vector_store %arg10[%c0_16, %c0_17], %20 {strides = array<i32>} : memref<32x32xf32, #tpu.memory_space<vmem>>, vector<32x32xf32>,
    } else {
    }
    %c0 = arith.constant 0 : index
    %c0_1 = arith.constant 0 : index
    %3 = vector.load %arg2[%c0, %c0_1] : memref<32x32xf32, #tpu.memory_space<vmem>>, vector<32x32xf32>
    %4 = arith.truncf %3 : vector<32x32xf32> to vector<32x32xbf16>
    %c0_2 = arith.constant 0 : index
    %c0_3 = arith.constant 0 : index
    %5 = vector.load %arg3[%c0_2, %c0_3] : memref<32x64xbf16, #tpu.memory_space<vmem>>, vector<32x64xbf16>
    %cst = arith.constant dense<0.000000e+00> : vector<32x64xf32>
    %6 = tpu.matmul %4, %5, %cst {dimension_numbers = #tpu.dot_dimension_numbers<[1], [0], [0], [1], [0, 0, 1, 1], [], []>} : vector<32x32xbf16>, vector<32x64xbf16>, vector<32x64xf32> -> vector<32x64xf32>
    %c0_4 = arith.constant 0 : index
    %c0_5 = arith.constant 0 : index
    %7 = vector.load %arg4[%c0_4, %c0_5] : memref<1x64xf32, #tpu.memory_space<vmem>>, vector<1x64xf32>
    %8 = vector.broadcast %7 : vector<1x64xf32> to vector<32x64xf32>
    %9 = arith.addf %6, %8 : vector<32x64xf32>
    %10 = math.tanh %9 : vector<32x64xf32>
    %c0_6 = arith.constant 0 : index
    %c0_7 = arith.constant 0 : index
    %11 = vector.load %arg10[%c0_6, %c0_7] : memref<32x32xf32, #tpu.memory_space<vmem>>, vector<32x32xf32>
    %12 = arith.truncf %10 : vector<32x64xf32> to vector<32x64xbf16>
    %c0_8 = arith.constant 0 : index
    %c0_9 = arith.constant 0 : index
    %13 = vector.load %arg5[%c0_8, %c0_9] : memref<64x32xbf16, #tpu.memory_space<vmem>>, vector<64x32xbf16>
    %cst_10 = arith.constant dense<0.000000e+00> : vector<32x32xf32>
    %14 = tpu.matmul %12, %13, %cst_10 {dimension_numbers = #tpu.dot_dimension_numbers<[1], [0], [0], [1], [0, 0, 1, 1], [], []>} : vector<32x64xbf16>, vector<64x32xbf16>, vector<32x32xf32> -> vector<32x32xf32>
    %15 = arith.addf %11, %14 : vector<32x32xf32>
    %c0_11 = arith.constant 0 : index
    %c0_12 = arith.constant 0 : index
    %16 = vector.load %arg10[%c0_11, %c0_12] : memref<32x32xf32, #tpu.memory_space<vmem>>, vector<32x32xf32>
    tpu.vector_store %arg10[%c0_11, %c0_12], %15 {strides = array<i32>} : memref<32x32xf32, #tpu.memory_space<vmem>>, vector<32x32xf32>,
    %c0_i32_13 = arith.constant 0 : i32
    %17 = arith.cmpi eq, %arg1, %c0_i32_13 : i32
    %18 = arith.extui %17 : i1 to i32
    %c0_i32_14 = arith.constant 0 : i32
    %19 = arith.cmpi ne, %18, %c0_i32_14 : i32
    scf.if %19 {
      %c0_15 = arith.constant 0 : index
      %c0_16 = arith.constant 0 : index
      %20 = vector.load %arg10[%c0_15, %c0_16] : memref<32x32xf32, #tpu.memory_space<vmem>>, vector<32x32xf32>
      %c0_17 = arith.constant 0 : index
      %c0_18 = arith.constant 0 : index
      %21 = vector.load %arg6[%c0_17, %c0_18] : memref<1x32xf32, #tpu.memory_space<vmem>>, vector<1x32xf32>
      %22 = vector.broadcast %21 : vector<1x32xf32> to vector<32x32xf32>
      %23 = arith.addf %20, %22 : vector<32x32xf32>
      %c0_19 = arith.constant 0 : index
      %c0_20 = arith.constant 0 : index
      %24 = vector.load %arg2[%c0_19, %c0_20] : memref<32x32xf32, #tpu.memory_space<vmem>>, vector<32x32xf32>
      %25 = arith.addf %23, %24 : vector<32x32xf32>
      %cst_21 = arith.constant dense<0.000000e+00> : vector<32xf32>
      %26 = vector.multi_reduction <add>, %25, %cst_21 [1] : vector<32x32xf32> to vector<32xf32>
      %27 = vector.shape_cast %26 : vector<32xf32> to vector<32x1xf32>
      %cst_22 = arith.constant 3.200000e+01 : f32
      %28 = vector.broadcast %cst_22 : f32 to vector<32x1xf32>
      %29 = arith.divf %27, %28 : vector<32x1xf32>
      %30 = vector.broadcast %29 : vector<32x1xf32> to vector<32x32xf32>
      %31 = arith.subf %25, %30 : vector<32x32xf32>
      %32 = arith.mulf %31, %31 : vector<32x32xf32>
      %cst_23 = arith.constant dense<0.000000e+00> : vector<32xf32>
      %33 = vector.multi_reduction <add>, %32, %cst_23 [1] : vector<32x32xf32> to vector<32xf32>
      %34 = vector.shape_cast %33 : vector<32xf32> to vector<32x1xf32>
      %cst_24 = arith.constant 3.200000e+01 : f32
      %35 = vector.broadcast %cst_24 : f32 to vector<32x1xf32>
      %36 = arith.divf %34, %35 : vector<32x1xf32>
      %37 = vector.broadcast %29 : vector<32x1xf32> to vector<32x32xf32>
      %38 = arith.subf %25, %37 : vector<32x32xf32>
      %cst_25 = arith.constant 9.99999974E-6 : f32
      %39 = vector.broadcast %cst_25 : f32 to vector<32x1xf32>
      %40 = arith.addf %36, %39 : vector<32x1xf32>
      %41 = math.rsqrt %40 : vector<32x1xf32>
      %42 = vector.broadcast %41 : vector<32x1xf32> to vector<32x32xf32>
      %43 = arith.mulf %38, %42 : vector<32x32xf32>
      %c0_26 = arith.constant 0 : index
      %c0_27 = arith.constant 0 : index
      %44 = vector.load %arg7[%c0_26, %c0_27] : memref<1x32xf32, #tpu.memory_space<vmem>>, vector<1x32xf32>
      %45 = vector.broadcast %44 : vector<1x32xf32> to vector<32x32xf32>
      %46 = arith.mulf %43, %45 : vector<32x32xf32>
      %c0_28 = arith.constant 0 : index
      %c0_29 = arith.constant 0 : index
      %47 = vector.load %arg8[%c0_28, %c0_29] : memref<1x32xf32, #tpu.memory_space<vmem>>, vector<1x32xf32>
      %48 = vector.broadcast %47 : vector<1x32xf32> to vector<32x32xf32>
      %49 = arith.addf %46, %48 : vector<32x32xf32>
      %c0_30 = arith.constant 0 : index
      %c0_31 = arith.constant 0 : index
      %50 = vector.load %arg9[%c0_30, %c0_31] : memref<32x32xf32, #tpu.memory_space<vmem>>, vector<32x32xf32>
      tpu.vector_store %arg9[%c0_30, %c0_31], %49 {strides = array<i32>} : memref<32x32xf32, #tpu.memory_space<vmem>>, vector<32x32xf32>,
    } else {
    }
    return
  }
  func.func @transform_0(%arg0: i32, %arg1: i32) -> (i32, i32) {
    %c0_i32 = arith.constant 0 : i32
    %c0_i32_0 = arith.constant 0 : i32
    return %arg0, %c0_i32 : i32, i32
  }
  func.func @transform_1(%arg0: i32, %arg1: i32) -> (i32, i32) {
    %c0_i32 = arith.constant 0 : i32
    %c0_i32_0 = arith.constant 0 : i32
    return %c0_i32, %arg1 : i32, i32
  }
  func.func @transform_2(%arg0: i32, %arg1: i32) -> (i32, i32) {
    %c0_i32 = arith.constant 0 : i32
    %c0_i32_0 = arith.constant 0 : i32
    return %c0_i32, %arg1 : i32, i32
  }
  func.func @transform_3(%arg0: i32, %arg1: i32) -> (i32, i32) {
    %c0_i32 = arith.constant 0 : i32
    %c0_i32_0 = arith.constant 0 : i32
    return %arg1, %c0_i32 : i32, i32
  }
  func.func @transform_4(%arg0: i32, %arg1: i32) -> (i32, i32) {
    %c0_i32 = arith.constant 0 : i32
    %c0_i32_0 = arith.constant 0 : i32
    %c0_i32_1 = arith.constant 0 : i32
    return %c0_i32, %c0_i32_0 : i32, i32
  }
  func.func @transform_5(%arg0: i32, %arg1: i32) -> (i32, i32) {
    %c0_i32 = arith.constant 0 : i32
    %c0_i32_0 = arith.constant 0 : i32
    %c0_i32_1 = arith.constant 0 : i32
    return %c0_i32, %c0_i32_0 : i32, i32
  }
  func.func @transform_6(%arg0: i32, %arg1: i32) -> (i32, i32) {
    %c0_i32 = arith.constant 0 : i32
    %c0_i32_0 = arith.constant 0 : i32
    %c0_i32_1 = arith.constant 0 : i32
    return %c0_i32, %c0_i32_0 : i32, i32
  }
  func.func @transform_7(%arg0: i32, %arg1: i32) -> (i32, i32) {
    %c0_i32 = arith.constant 0 : i32
    %c0_i32_0 = arith.constant 0 : i32
    return %arg0, %c0_i32 : i32, i32
  }
}

module attributes {stable_mosaic.version = 11 : i64} {
  func.func @_linear_ln_res_kernel(%arg0: i32, %arg1: memref<32x32xf32, #tpu.memory_space<vmem>>, %arg2: memref<32x32xbf16, #tpu.memory_space<vmem>>, %arg3: memref<1x32xf32, #tpu.memory_space<vmem>>, %arg4: memref<32x32xf32, #tpu.memory_space<vmem>>, %arg5: memref<1x32xf32, #tpu.memory_space<vmem>>, %arg6: memref<1x32xf32, #tpu.memory_space<vmem>>, %arg7: memref<32x32xf32, #tpu.memory_space<vmem>>) attributes {dimension_semantics = [#tpu.dimension_semantics<parallel>], iteration_bounds = array<i64: 1>, scalar_prefetch = 0 : i64, scratch_operands = 0 : i64, tpu.core_type = #tpu.core_type<tc>, window_params = [{transform_indices = @transform_0, window_bounds = array<i64: 32, 32>}, {pipeline_mode = #tpu.pipeline_mode<synchronous>, transform_indices = @transform_1, window_bounds = array<i64: 32, 32>}, {pipeline_mode = #tpu.pipeline_mode<synchronous>, transform_indices = @transform_2, window_bounds = array<i64: 1, 32>}, {transform_indices = @transform_3, window_bounds = array<i64: 32, 32>}, {pipeline_mode = #tpu.pipeline_mode<synchronous>, transform_indices = @transform_4, window_bounds = array<i64: 1, 32>}, {pipeline_mode = #tpu.pipeline_mode<synchronous>, transform_indices = @transform_5, window_bounds = array<i64: 1, 32>}, {transform_indices = @transform_6, window_bounds = array<i64: 32, 32>}]} {
    %c0 = arith.constant 0 : index
    %c0_0 = arith.constant 0 : index
    %0 = vector.load %arg1[%c0, %c0_0] : memref<32x32xf32, #tpu.memory_space<vmem>>, vector<32x32xf32>
    %1 = arith.truncf %0 : vector<32x32xf32> to vector<32x32xbf16>
    %c0_1 = arith.constant 0 : index
    %c0_2 = arith.constant 0 : index
    %2 = vector.load %arg2[%c0_1, %c0_2] : memref<32x32xbf16, #tpu.memory_space<vmem>>, vector<32x32xbf16>
    %cst = arith.constant dense<0.000000e+00> : vector<32x32xf32>
    %3 = tpu.matmul %1, %2, %cst {dimension_numbers = #tpu.dot_dimension_numbers<[1], [0], [0], [1], [0, 0, 1, 1], [], []>} : vector<32x32xbf16>, vector<32x32xbf16>, vector<32x32xf32> -> vector<32x32xf32>
    %c0_3 = arith.constant 0 : index
    %c0_4 = arith.constant 0 : index
    %4 = vector.load %arg3[%c0_3, %c0_4] : memref<1x32xf32, #tpu.memory_space<vmem>>, vector<1x32xf32>
    %5 = vector.broadcast %4 : vector<1x32xf32> to vector<32x32xf32>
    %6 = arith.addf %3, %5 : vector<32x32xf32>
    %c0_5 = arith.constant 0 : index
    %c0_6 = arith.constant 0 : index
    %7 = vector.load %arg4[%c0_5, %c0_6] : memref<32x32xf32, #tpu.memory_space<vmem>>, vector<32x32xf32>
    %8 = arith.addf %6, %7 : vector<32x32xf32>
    %cst_7 = arith.constant dense<0.000000e+00> : vector<32xf32>
    %9 = vector.multi_reduction <add>, %8, %cst_7 [1] : vector<32x32xf32> to vector<32xf32>
    %10 = vector.shape_cast %9 : vector<32xf32> to vector<32x1xf32>
    %cst_8 = arith.constant 3.200000e+01 : f32
    %11 = vector.broadcast %cst_8 : f32 to vector<32x1xf32>
    %12 = arith.divf %10, %11 : vector<32x1xf32>
    %13 = vector.broadcast %12 : vector<32x1xf32> to vector<32x32xf32>
    %14 = arith.subf %8, %13 : vector<32x32xf32>
    %15 = arith.mulf %14, %14 : vector<32x32xf32>
    %cst_9 = arith.constant dense<0.000000e+00> : vector<32xf32>
    %16 = vector.multi_reduction <add>, %15, %cst_9 [1] : vector<32x32xf32> to vector<32xf32>
    %17 = vector.shape_cast %16 : vector<32xf32> to vector<32x1xf32>
    %cst_10 = arith.constant 3.200000e+01 : f32
    %18 = vector.broadcast %cst_10 : f32 to vector<32x1xf32>
    %19 = arith.divf %17, %18 : vector<32x1xf32>
    %20 = vector.broadcast %12 : vector<32x1xf32> to vector<32x32xf32>
    %21 = arith.subf %8, %20 : vector<32x32xf32>
    %cst_11 = arith.constant 9.99999974E-6 : f32
    %22 = vector.broadcast %cst_11 : f32 to vector<32x1xf32>
    %23 = arith.addf %19, %22 : vector<32x1xf32>
    %24 = math.rsqrt %23 : vector<32x1xf32>
    %25 = vector.broadcast %24 : vector<32x1xf32> to vector<32x32xf32>
    %26 = arith.mulf %21, %25 : vector<32x32xf32>
    %c0_12 = arith.constant 0 : index
    %c0_13 = arith.constant 0 : index
    %27 = vector.load %arg5[%c0_12, %c0_13] : memref<1x32xf32, #tpu.memory_space<vmem>>, vector<1x32xf32>
    %28 = vector.broadcast %27 : vector<1x32xf32> to vector<32x32xf32>
    %29 = arith.mulf %26, %28 : vector<32x32xf32>
    %c0_14 = arith.constant 0 : index
    %c0_15 = arith.constant 0 : index
    %30 = vector.load %arg6[%c0_14, %c0_15] : memref<1x32xf32, #tpu.memory_space<vmem>>, vector<1x32xf32>
    %31 = vector.broadcast %30 : vector<1x32xf32> to vector<32x32xf32>
    %32 = arith.addf %29, %31 : vector<32x32xf32>
    %c0_16 = arith.constant 0 : index
    %c0_17 = arith.constant 0 : index
    %33 = vector.load %arg7[%c0_16, %c0_17] : memref<32x32xf32, #tpu.memory_space<vmem>>, vector<32x32xf32>
    tpu.vector_store %arg7[%c0_16, %c0_17], %32 {strides = array<i32>} : memref<32x32xf32, #tpu.memory_space<vmem>>, vector<32x32xf32>,
    return
  }
  func.func @transform_0(%arg0: i32) -> (i32, i32) {
    %c0_i32 = arith.constant 0 : i32
    %c0_i32_0 = arith.constant 0 : i32
    return %arg0, %c0_i32 : i32, i32
  }
  func.func @transform_1(%arg0: i32) -> (i32, i32) {
    %c0_i32 = arith.constant 0 : i32
    %c0_i32_0 = arith.constant 0 : i32
    %c0_i32_1 = arith.constant 0 : i32
    return %c0_i32, %c0_i32_0 : i32, i32
  }
  func.func @transform_2(%arg0: i32) -> (i32, i32) {
    %c0_i32 = arith.constant 0 : i32
    %c0_i32_0 = arith.constant 0 : i32
    %c0_i32_1 = arith.constant 0 : i32
    return %c0_i32, %c0_i32_0 : i32, i32
  }
  func.func @transform_3(%arg0: i32) -> (i32, i32) {
    %c0_i32 = arith.constant 0 : i32
    %c0_i32_0 = arith.constant 0 : i32
    return %arg0, %c0_i32 : i32, i32
  }
  func.func @transform_4(%arg0: i32) -> (i32, i32) {
    %c0_i32 = arith.constant 0 : i32
    %c0_i32_0 = arith.constant 0 : i32
    %c0_i32_1 = arith.constant 0 : i32
    return %c0_i32, %c0_i32_0 : i32, i32
  }
  func.func @transform_5(%arg0: i32) -> (i32, i32) {
    %c0_i32 = arith.constant 0 : i32
    %c0_i32_0 = arith.constant 0 : i32
    %c0_i32_1 = arith.constant 0 : i32
    return %c0_i32, %c0_i32_0 : i32, i32
  }
  func.func @transform_6(%arg0: i32) -> (i32, i32) {
    %c0_i32 = arith.constant 0 : i32
    %c0_i32_0 = arith.constant 0 : i32
    return %arg0, %c0_i32 : i32, i32
  }
}

module attributes {stable_mosaic.version = 11 : i64} {
  func.func @_linear_kernel(%arg0: i32, %arg1: memref<32x32xf32, #tpu.memory_space<vmem>>, %arg2: memref<32x8xbf16, #tpu.memory_space<vmem>>, %arg3: memref<1x8xf32, #tpu.memory_space<vmem>>, %arg4: memref<32x8xf32, #tpu.memory_space<vmem>>) attributes {dimension_semantics = [#tpu.dimension_semantics<parallel>], iteration_bounds = array<i64: 1>, scalar_prefetch = 0 : i64, scratch_operands = 0 : i64, tpu.core_type = #tpu.core_type<tc>, window_params = [{transform_indices = @transform_0, window_bounds = array<i64: 32, 32>}, {pipeline_mode = #tpu.pipeline_mode<synchronous>, transform_indices = @transform_1, window_bounds = array<i64: 32, 8>}, {pipeline_mode = #tpu.pipeline_mode<synchronous>, transform_indices = @transform_2, window_bounds = array<i64: 1, 8>}, {transform_indices = @transform_3, window_bounds = array<i64: 32, 8>}]} {
    %c0 = arith.constant 0 : index
    %c0_0 = arith.constant 0 : index
    %0 = vector.load %arg1[%c0, %c0_0] : memref<32x32xf32, #tpu.memory_space<vmem>>, vector<32x32xf32>
    %1 = arith.truncf %0 : vector<32x32xf32> to vector<32x32xbf16>
    %c0_1 = arith.constant 0 : index
    %c0_2 = arith.constant 0 : index
    %2 = vector.load %arg2[%c0_1, %c0_2] : memref<32x8xbf16, #tpu.memory_space<vmem>>, vector<32x8xbf16>
    %cst = arith.constant dense<0.000000e+00> : vector<32x8xf32>
    %3 = tpu.matmul %1, %2, %cst {dimension_numbers = #tpu.dot_dimension_numbers<[1], [0], [0], [1], [0, 0, 1, 1], [], []>} : vector<32x32xbf16>, vector<32x8xbf16>, vector<32x8xf32> -> vector<32x8xf32>
    %c0_3 = arith.constant 0 : index
    %c0_4 = arith.constant 0 : index
    %4 = vector.load %arg3[%c0_3, %c0_4] : memref<1x8xf32, #tpu.memory_space<vmem>>, vector<1x8xf32>
    %5 = vector.broadcast %4 : vector<1x8xf32> to vector<32x8xf32>
    %6 = arith.addf %3, %5 : vector<32x8xf32>
    %c0_5 = arith.constant 0 : index
    %c0_6 = arith.constant 0 : index
    %7 = vector.load %arg4[%c0_5, %c0_6] : memref<32x8xf32, #tpu.memory_space<vmem>>, vector<32x8xf32>
    tpu.vector_store %arg4[%c0_5, %c0_6], %6 {strides = array<i32>} : memref<32x8xf32, #tpu.memory_space<vmem>>, vector<32x8xf32>,
    return
  }
  func.func @transform_0(%arg0: i32) -> (i32, i32) {
    %c0_i32 = arith.constant 0 : i32
    %c0_i32_0 = arith.constant 0 : i32
    return %arg0, %c0_i32 : i32, i32
  }
  func.func @transform_1(%arg0: i32) -> (i32, i32) {
    %c0_i32 = arith.constant 0 : i32
    %c0_i32_0 = arith.constant 0 : i32
    %c0_i32_1 = arith.constant 0 : i32
    return %c0_i32, %c0_i32_0 : i32, i32
  }
  func.func @transform_2(%arg0: i32) -> (i32, i32) {
    %c0_i32 = arith.constant 0 : i32
    %c0_i32_0 = arith.constant 0 : i32
    %c0_i32_1 = arith.constant 0 : i32
    return %c0_i32, %c0_i32_0 : i32, i32
  }
  func.func @transform_3(%arg0: i32) -> (i32, i32) {
    %c0_i32 = arith.constant 0 : i32
    %c0_i32_0 = arith.constant 0 : i32
    return %arg0, %c0_i32 : i32, i32
  }
}

</mosaic_0001>

<bundles_post_ra>
// kernel: transformer_forward.17
= control target key start
LH: loop header
LB: loop body
LE: loop exit
PB: predicated region body
PF: predicated region fallthrough
CT: control target
= control target key end

     0   :  { %vm57_vm0 = vcmask 1043456   ;;  %vm38_vm1 = vcmask 64512   ;;  %vm100_vm2 = vcmask 261120   ;;  %s243_s1 = inlined_call_operand.vmem [shape: bf16[8,32], index: 1, kind: input, shape index: {}]   ;;  %s244_s0 = inlined_call_operand.vmem [shape: f32[96,8], index: 0, kind: input, shape index: {}]   ;;  %s245_s2 = inlined_call_operand.vmem [shape: f32[1,32], index: 2, kind: input, shape index: {}]   ;;  %s246_s3 = inlined_call_operand.vmem [shape: f32[96,32], index: 3, kind: output, shape index: {}]  }
   0x1   :  { %v33_v0 = vld [vmem:[%s243_s1] sm:$0xf]  ;;  %v17_v1 = vld [vmem:[%s244_s0 + $0x10] sm:$0xff]  ;;  %v18_v2 = vld [vmem:[%s244_s0 + $0x18] sm:$0xff] }
   0x2   :  { %v59_v3 = vsel %vm57_vm0, %v33_v0, 0  ;;  %v28_v4 = vpack.c.bf16 %v18_v2, %v17_v1  ;;  %v21_v5 = vld [vmem:[%s244_s0 + $0x30] sm:$0xff]  ;;  %v22_v6 = vld [vmem:[%s244_s0 + $0x38] sm:$0xff]  ;;  %v15_v10 = vld [vmem:[%s244_s0] sm:$0xff] }
   0x3   :  { %v25_v7 = vld [vmem:[%s244_s0 + $0x50] sm:$0xff]  ;;  %123 = vmatpush.bf16.msra.mxu1 %v59_v3  ;;  %124 = vmatpush.bf16.msra.mxu2 %v59_v3  ;;  %v30_v8 = vpack.c.bf16 %v22_v6, %v21_v5  ;;  %v26_v9 = vld [vmem:[%s244_s0 + $0x58] sm:$0xff]  ;;  %v16_v11 = vld [vmem:[%s244_s0 + $0x8] sm:$0xff] }
   0x4   :  { %125 = vmatpush.bf16.msra.mxu3 %v59_v3  ;;  %v32_v12 = vpack.c.bf16 %v26_v9, %v25_v7  ;;  %68 = vmatpush.bf16.msra.mxu0 %v59_v3  ;;  %v27_v13 = vpack.c.bf16 %v16_v11, %v15_v10  ;;  %v19_v14 = vld [vmem:[%s244_s0 + $0x20] sm:$0xff]  ;;  %v20_v15 = vld [vmem:[%s244_s0 + $0x28] sm:$0xff] }
   0x5   :  { %v23_v16 = vld [vmem:[%s244_s0 + $0x40] sm:$0xff]  ;;  %v24_v17 = vld [vmem:[%s244_s0 + $0x48] sm:$0xff]  ;;  %v29_v18 = vpack.c.bf16 %v20_v15, %v19_v14 }
   0x6   :  { %118 = vmatmul.msk.bf16.vlgmr.msra.gmra.mxu1 %vm38_vm1, %v28_v4  ;;  %120 = vmatmul.msk.bf16.vlgmr.msra.gmra.mxu2 %vm38_vm1, %v30_v8  ;;  %v31_v19 = vpack.c.bf16 %v24_v17, %v23_v16  ;;  %v126_v20 = vld [vmem:[%s245_s2] ss:$0 sm:$0xff] }
   0x7   :  { %122 = vmatmul.msk.bf16.vlgmr.msra.gmra.mxu3 %vm38_vm1, %v32_v12  ;;  %117 = vmatmul.msk.bf16.vlgmr.msra.gmra.mxu0 %vm38_vm1, %v27_v13 }
  0x16   :  { %119 = vmatmul.msk.bf16.gmra.mxu1 %vm38_vm1, %v29_v18  ;;  %121 = vmatmul.msk.bf16.gmra.mxu2 %vm38_vm1, %v31_v19 }
  0x83   :  { %v75_v21 = vpop.f32.mrf.mxu1 }
  0x84   :  { %v76_v22 = vadd.f32 %v126_v20, %v75_v21  ;;  %v70_v23 = vpop.f32.mrf.mxu0 }
  0x85   :  { %v71_v24 = vadd.f32 %v126_v20, %v70_v23 }
  0x86   :  { %103 = vst.msk [vmem:[%s246_s3 + $0x10] sm:$0xff] %vm100_vm2, %v76_v22 }
  0x87   :  { %101 = vst.msk [vmem:[%s246_s3] sm:$0xff] %vm100_vm2, %v71_v24 }
  0x89   :  { %v85_v25 = vpop.f32.mrf.mxu2 }
  0x8a   :  { %v86_v26 = vadd.f32 %v126_v20, %v85_v25  ;;  %v95_v27 = vpop.f32.mrf.mxu3 }
  0x8b   :  { %v77_v28 = vpop.f32.mrf.mxu1  ;;  %v96_v29 = vadd.f32 %v126_v20, %v95_v27 }
  0x8c   :  { %107 = vst.msk [vmem:[%s246_s3 + $0x30] sm:$0xff] %vm100_vm2, %v86_v26  ;;  %v78_v30 = vadd.f32 %v126_v20, %v77_v28  ;;  %v72_v31 = vpop.f32.mrf.mxu0 }
  0x8d   :  { %111 = vst.msk [vmem:[%s246_s3 + $0x50] sm:$0xff] %vm100_vm2, %v96_v29  ;;  %v73_v32 = vadd.f32 %v126_v20, %v72_v31 }
  0x8e   :  { %104 = vst.msk [vmem:[%s246_s3 + $0x18] sm:$0xff] %vm100_vm2, %v78_v30 }
  0x8f   :  { %102 = vst.msk [vmem:[%s246_s3 + $0x8] sm:$0xff] %vm100_vm2, %v73_v32 }
  0x91   :  { %v87_v33 = vpop.f32.mrf.mxu2 }
  0x92   :  { %v88_v34 = vadd.f32 %v126_v20, %v87_v33  ;;  %v97_v35 = vpop.f32.mrf.mxu3 }
  0x93   :  { %v80_v36 = vpop.f32.mrf.mxu1  ;;  %v98_v37 = vadd.f32 %v126_v20, %v97_v35 }
  0x94   :  { %108 = vst.msk [vmem:[%s246_s3 + $0x38] sm:$0xff] %vm100_vm2, %v88_v34  ;;  %v81_v38 = vadd.f32 %v126_v20, %v80_v36 }
  0x95   :  { %112 = vst.msk [vmem:[%s246_s3 + $0x58] sm:$0xff] %vm100_vm2, %v98_v37 }
  0x96   :  { %105 = vst.msk [vmem:[%s246_s3 + $0x20] sm:$0xff] %vm100_vm2, %v81_v38 }
  0x99   :  { %v90_v39 = vpop.f32.mrf.mxu2 }
  0x9a   :  { %v91_v40 = vadd.f32 %v126_v20, %v90_v39 }
  0x9b   :  { %v82_v41 = vpop.f32.mrf.mxu1 }
  0x9c   :  { %109 = vst.msk [vmem:[%s246_s3 + $0x40] sm:$0xff] %vm100_vm2, %v91_v40  ;;  %v83_v42 = vadd.f32 %v126_v20, %v82_v41 }
  0x9e   :  { %106 = vst.msk [vmem:[%s246_s3 + $0x28] sm:$0xff] %vm100_vm2, %v83_v42 }
  0xa1   :  { %v92_v43 = vpop.f32.mrf.mxu2 }
  0xa2   :  { %v93_v44 = vadd.f32 %v126_v20, %v92_v43 }
  0xa4   :  { %110 = vst.msk [vmem:[%s246_s3 + $0x48] sm:$0xff] %vm100_vm2, %v93_v44 }

// kernel: transformer_forward.18
= control target key start
LH: loop header
LB: loop body
LE: loop exit
PB: predicated region body
PF: predicated region fallthrough
CT: control target
= control target key end

     0   :  { %s722_s20 = smov 0   ;;  %s827_s0 = inlined_call_operand.vmem [shape: f32[6,32,16], index: 0, kind: input, shape index: {}]   ;;  %s828_s1 = inlined_call_operand.vmem [shape: f32[8,32], index: 1, kind: input, shape index: {}]   ;;  %s829_s2 = inlined_call_operand.vmem [shape: f32[32,8], index: 2, kind: input, shape index: {}]   ;;  %s830_s3 = inlined_call_operand.vmem [shape: f32[1,2], index: 3, kind: input, shape index: {}]   ;;  %s831_s4 = inlined_call_operand.<no memory space> [shape: f32[1,1], index: 4, kind: input, shape index: {}]   ;;  %s832_s5 = inlined_call_operand.vmem [shape: f32[6,32,16], index: 5, kind: output, shape index: {}]  }
   0x1   :  { %v10_v0 = vstv %s831_s4 }
   0x2   :  { %11 = vst [vmem:[#allocation2] sm:$0x1] %v10_v0 }
   0x3 LB: > { %s609_s21 = sadd.s32 4294967295, %s682_s20   ;;  %p613_p0 = scmp.ge.s32.totalorder %s682_s20, 1  ;;  %s682_s20 = sphi %s722_s20, %s17_s20  }
   0x4   : > { %p189_p1 = scmp.lt.s32.totalorder %s682_s20, 7 }
   0x6   : > { %p190_p2 = pnand %p613_p0, %p189_p1 }
   0x7   : > { %p217_p3 = scmp.lt.s32.totalorder (!%p190_p2), %s609_s21, 5  ;;  %s685_s10 = smov (!%p190_p2), 127  }
   0x8   : > { %193 = sbr.rel (%p190_p2) target bundleno = 747 (0x2eb), region = 40 }
   0xd   : > { %s834_s21 = smov (!%p217_p3, %s609_s21), 5  ;;  %vm231_vm0 = vcmask 130048   ;;  %v684_v13 = vmov 16.0   ;;  %v267_v18 = vlaneseq  ;;  %v274_v37 = vld [vmem:[%s828_s1] sm:$0xff]  ;;  %vm275_vm3 = vcmask 261120   ;;  %v301_v42 = vld [vmem:[%s829_s2 + $0x8] sm:$0xff] }
   0xe   : > { %s630_s4 = sshll.u32 %s834_s21, 5  ;;  %652 = vrcp.f32 %v684_v13  ;;  %v300_v41 = vld [vmem:[%s829_s2] sm:$0xff]  ;;  %vm304_vm4 = vcmask 64512   ;;  %v303_v43 = vld [vmem:[%s829_s2 + $0x18] sm:$0xff]  ;;  %v302_v44 = vld [vmem:[%s829_s2 + $0x10] sm:$0xff]  ;;  %v686_v49 = vmov 0  }
   0xf   : > { %s221_s24 = scalar_lea.vmem %s827_s0, %s630_s4  ;;  %v268_v23 = vand.u32 127, %v267_v18  ;;  %647 = vset.pattern.permute.xlu0 %v686_v49  ;;  %648 = vset.pattern.permute.xlu2 %v686_v49  ;;  %s226_s15 = scalar_lea.vmem %s832_s5, %s630_s4 }
  0x10   : > { %v738_v1 = vld [vmem:[%s221_s24 + $0x18] sm:$0xff]  ;;  %v740_v2 = vld [vmem:[%s221_s24 + $0x10] sm:$0xff]  ;;  %v742_v3 = vld [vmem:[%s221_s24 + $0x8] sm:$0xff]  ;;  %649 = vset.pattern.permute.xlu1 %v686_v49 }
  0x11   : > { %v253_v4 = vsel %vm231_vm0, %v738_v1, 0.0  ;;  %v250_v5 = vsel %vm231_vm0, %v740_v2, 0.0  ;;  %v247_v6 = vsel %vm231_vm0, %v742_v3, 0.0  ;;  %v241_v7 = vsel %vm231_vm0, %v738_v1, -inf  ;;  %v756_v10 = vld [vmem:[%s221_s24] sm:$0xff] }
  0x12   : > { %254 = vadd.xlane.f32.xlu0 %v253_v4  ;;  %251 = vadd.xlane.f32.xlu1 %v250_v5  ;;  %v238_v8 = vsel %vm231_vm0, %v740_v2, -inf  ;;  %v235_v9 = vsel %vm231_vm0, %v742_v3, -inf  ;;  %v244_v11 = vsel %vm231_vm0, %v756_v10, 0.0  ;;  %v232_v12 = vsel %vm231_vm0, %v756_v10, -inf }
  0x13   : > { %248 = vadd.xlane.f32.xlu2 %v247_v6  ;;  %vm269_vm2 = vcmp.eq.s32.totalorder %v268_v23, 0 }
  0x14   : > { %v653_v14 = vpop.eup %652 }
  0x15   : > { %v257_v15 = vmul.f32 16.0, %v653_v14  ;;  %vm261_vm1 = vweird.f32 %v653_v14 }
  0x17   : > { %v258_v16 = vsub.f32 1.0, %v257_v15 }
  0x19   : > { %v259_v17 = vmul.f32 %v653_v14, %v258_v16 }
  0x1a   : > { %242 = vmax.xlane.f32.xlu0 %v241_v7  ;;  %239 = vmax.xlane.f32.xlu1 %v238_v8 }
  0x1b   : > { %236 = vmax.xlane.f32.xlu2 %v235_v9  ;;  %v260_v19 = vadd.f32 %v653_v14, %v259_v17 }
  0x1d   : > { %v262_v24 = vsel %vm261_vm1, %v653_v14, %v260_v19  ;;  %v500_v19 = vld [vmem:[%s830_s3] sm:$0x1] }
  0x22   : > { %245 = vadd.xlane.f32.xlu0 %v244_v11  ;;  %233 = vmax.xlane.f32.xlu1 %v232_v12 }
  0x85   : > { %v255_v20 = vpop.xlane.xlu0 %254  ;;  %v252_v21 = vpop.xlane.xlu1 %251 }
  0x86   : > { %v249_v22 = vpop.xlane.xlu2 %248  ;;  %v266_v25 = vmul.f32 %v262_v24, %v255_v20  ;;  %v265_v28 = vmul.f32 %v262_v24, %v252_v21  ;;  %v687_v20 = vmov 1  }
  0x87   : > { %v264_v29 = vmul.f32 %v262_v24, %v249_v22 }
  0x8d   : > { %v243_v26 = vpop.xlane.xlu0 %242  ;;  %v240_v27 = vpop.xlane.xlu1 %239 }
  0x8e   : > { %v273_v30 = vsel %vm269_vm2, %v243_v26, %v266_v25  ;;  %v237_v31 = vpop.xlane.xlu2 %236  ;;  %v272_v32 = vsel %vm269_vm2, %v240_v27, %v265_v28 }
  0x8f   : > { %291 = vmatpush.msra.mxu0 %v273_v30  ;;  %v271_v33 = vsel %vm269_vm2, %v237_v31, %v264_v29 }
  0x91   : > { %292 = vmatpush.msra.mxu0 %v272_v32 }
  0x93   : > { %293 = vmatpush.msra.mxu0 %v271_v33 }
  0x95   : > { %v246_v34 = vpop.xlane.xlu0 %245  ;;  %v234_v35 = vpop.xlane.xlu1 %233 }
  0x96   : > { %v263_v36 = vmul.f32 %v262_v24, %v246_v34 }
  0x98   : > { %v270_v38 = vsel %vm269_vm2, %v234_v35, %v263_v36 }
  0x99   : > { %294 = vmatpush.msra.mxu0 %v270_v38 }
  0x9a   : > { %618 = vmatmul.msk.f32.vlgmr.msra.gmra.mxu0 %vm275_vm3, %v274_v37 }
 0x117   : > { %v296_v39 = vpop.f32.mrf.mxu0 }
 0x118   : > { %v299_v40 = vmax.f32 %v296_v39, 0.0 }
 0x11a   : > { %332 = vmatpush.msra.mxu1 %v299_v40  ;;  %632 = vmatpush.msra.mxu2 %v299_v40 }
 0x11b   : > { %633 = vmatpush.msra.mxu3 %v299_v40  ;;  %619 = vmatmul.msk.f32.vlgmr.msra.gmra.mxu1 %vm304_vm4, %v300_v41 }
 0x11c   : > { %620 = vmatmul.msk.f32.vlgmr.msra.gmra.mxu2 %vm304_vm4, %v301_v42  ;;  %622 = vmatmul.msk.f32.vlgmr.msra.gmra.mxu3 %vm304_vm4, %v303_v43 }
 0x124   : > { %621 = vmatmul.msk.f32.gmra.mxu2 %vm304_vm4, %v302_v44 }
 0x198   : > { %v334_v45 = vpop.f32.mrf.mxu1 }
 0x199   : > { %350 = vrot.lane.b32.xlu2 %v334_v45, %s685_s10 }
 0x19f   : > { %v337_v46 = vpop.f32.mrf.mxu2  ;;  %v343_v47 = vpop.f32.mrf.mxu3 }
 0x1a0   : > { %352 = vrot.lane.b32.xlu0 %v337_v46, %s685_s10 }
 0x1a1   : > { %356 = vrot.lane.b32.xlu2 %v343_v47, %s685_s10 }
 0x1a7   : > { %v340_v48 = vpop.f32.mrf.mxu2 }
 0x1a8   : > { %354 = vrot.lane.b32.xlu1 %v340_v48, %s685_s10 }
 0x1f3   : > { %v351_v50 = vpop.permute.xlu2 %350 }
 0x1f4   : > { %v362_v51 = vadd.f32 %v351_v50, %v334_v45 }
 0x1f6   : > { %v623_v52 = vmul.f32 -1.442695, %v362_v51 }
 0x1f8   : > { %654 = vpow2.f32 %v623_v52  ;;  %v515_v52 = vld [vmem:[#allocation2] sm:$0x1] }
 0x1fb   : > { %v357_v55 = vpop.permute.xlu2 %356 }
 0x1fc   : > { %v365_v57 = vadd.f32 %v357_v55, %v343_v47 }
 0x1fe   : > { %v655_v53 = vpop.eup %654  ;;  %v626_v60 = vmul.f32 -1.442695, %v365_v57 }
 0x1ff   : > { %v378_v54 = vadd.f32 1.0, %v655_v53 }
 0x201   : > { %656 = vrcp.f32 %v378_v54  ;;  %v393_v61 = vand.u32 2147483648, %v378_v54  ;;  %v391_v63 = vand.u32 2147483647, %v378_v54  ;;  %vm387_vm6 = vweird.f32 %v378_v54 }
 0x202   : > { %658 = vpow2.f32 %v626_v60 }
 0x203   : > { %v394_v4 = vor.u32 1.1754944e-38, %v393_v61  ;;  %vm392_vm8 = vcmp.eq.f32.partialorder %v391_v63, 8.507059e+37 }
 0x207   : > { %v657_v56 = vpop.eup %656 }
 0x208   : > { %v383_v58 = vmul.f32 %v657_v56, %v378_v54  ;;  %vm388_vm5 = vweird.f32 %v657_v56  ;;  %v659_v9 = vpop.eup %658  ;;  %v688_v54 = vmov 32.0  }
 0x209   : > { %vm389_vm7 = vmor %vm387_vm6, %vm388_vm5  ;;  %v381_v12 = vadd.f32 1.0, %v659_v9 }
 0x20a   : > { %v384_v59 = vsub.f32 1.0, %v383_v58 }
 0x20b   : > { %vm432_vm14 = vweird.f32 %v381_v12  ;;  %v438_v41 = vand.u32 2147483648, %v381_v12  ;;  %v436_v44 = vand.u32 2147483647, %v381_v12 }
 0x20c   : > { %v385_v62 = vmul.f32 %v657_v56, %v384_v59 }
 0x20d   : > { %vm437_vm5 = vcmp.eq.f32.partialorder %v436_v44, 8.507059e+37 }
 0x20e   : > { %v386_v0 = vadd.f32 %v657_v56, %v385_v62 }
 0x210   : > { %v390_v5 = vsel %vm389_vm7, %v657_v56, %v386_v0 }
 0x211   : > { %v395_v6 = vsel %vm392_vm8, %v394_v4, %v390_v5 }
 0x212   : > { %v353_v7 = vpop.permute.xlu0 %352  ;;  %444 = vperm.xlu0 %647, %v395_v6  }
 0x213   : > { %v363_v8 = vadd.f32 %v353_v7, %v337_v46 }
 0x215   : > { %v624_v11 = vmul.f32 -1.442695, %v363_v8 }
 0x217   : > { %660 = vpow2.f32 %v624_v11 }
 0x218   : > { %662 = vrcp.f32 %v381_v12 }
 0x21a   : > { %v355_v13 = vpop.permute.xlu1 %354  ;;  %650 = vset.pattern.permute.xlu0 %v687_v20 }
 0x21b   : > { %v364_v14 = vadd.f32 %v355_v13, %v340_v48  ;;  %509 = vperm.xlu0 %650, %v500_v19   ;;  %v439_v48 = vor.u32 1.1754944e-38, %v438_v41 }
 0x21d   : > { %v661_v15 = vpop.eup %660  ;;  %v625_v16 = vmul.f32 -1.442695, %v364_v14 }
 0x21e   : > { %v379_v17 = vadd.f32 1.0, %v661_v15  ;;  %v663_v18 = vpop.eup %662 }
 0x21f   : > { %664 = vpow2.f32 %v625_v16  ;;  %v428_v22 = vmul.f32 %v663_v18, %v381_v12  ;;  %vm433_vm13 = vweird.f32 %v663_v18 }
 0x220   : > { %666 = vrcp.f32 %v379_v17  ;;  %v408_v28 = vand.u32 2147483648, %v379_v17  ;;  %v406_v30 = vand.u32 2147483647, %v379_v17  ;;  %vm402_vm10 = vweird.f32 %v379_v17  ;;  %vm434_vm1 = vmor %vm432_vm14, %vm433_vm13 }
 0x221   : > { %v429_v27 = vsub.f32 1.0, %v428_v22 }
 0x222   : > { %v409_v34 = vor.u32 1.1754944e-38, %v408_v28  ;;  %vm407_vm12 = vcmp.eq.f32.partialorder %v406_v30, 8.507059e+37 }
 0x223   : > { %651 = vset.pattern.permute.xlu0 %v686_v49  ;;  %v430_v32 = vmul.f32 %v663_v18, %v429_v27 }
 0x225   : > { %v665_v21 = vpop.eup %664  ;;  %v431_v39 = vadd.f32 %v663_v18, %v430_v32 }
 0x226   : > { %v667_v23 = vpop.eup %666  ;;  %v380_v24 = vadd.f32 1.0, %v665_v21 }
 0x227   : > { %v398_v25 = vmul.f32 %v667_v23, %v379_v17  ;;  %vm403_vm9 = vweird.f32 %v667_v23  ;;  %v435_v46 = vsel %vm434_vm1, %v663_v18, %v431_v39 }
 0x228   : > { %668 = vrcp.f32 %v380_v24  ;;  %vm404_vm11 = vmor %vm402_vm10, %vm403_vm9  ;;  %v423_v40 = vand.u32 2147483648, %v380_v24  ;;  %v421_v43 = vand.u32 2147483647, %v380_v24  ;;  %vm417_vm2 = vweird.f32 %v380_v24 }
 0x229   : > { %v399_v26 = vsub.f32 1.0, %v398_v25  ;;  %v440_v51 = vsel %vm437_vm5, %v439_v48, %v435_v46  ;;  %670 = vrcp.f32 %v688_v54 }
 0x22a   : > { %v424_v47 = vor.u32 1.1754944e-38, %v423_v40  ;;  %vm422_vm4 = vcmp.eq.f32.partialorder %v421_v43, 8.507059e+37 }
 0x22b   : > { %v400_v29 = vmul.f32 %v667_v23, %v399_v26 }
 0x22d   : > { %v401_v31 = vadd.f32 %v667_v23, %v400_v29 }
 0x22e   : > { %v669_v33 = vpop.eup %668 }
 0x22f   : > { %v405_v35 = vsel %vm404_vm11, %v667_v23, %v401_v31  ;;  %v413_v36 = vmul.f32 %v669_v33, %v380_v24  ;;  %vm418_vm15 = vweird.f32 %v669_v33  ;;  %v671_v59 = vpop.eup %670 }
 0x230   : > { %v410_v37 = vsel %vm407_vm12, %v409_v34, %v405_v35  ;;  %vm419_vm3 = vmor %vm417_vm2, %vm418_vm15  ;;  %v493_v5 = vmul.f32 32.0, %v671_v59  ;;  %vm497_vm6 = vweird.f32 %v671_v59 }
 0x231   : > { %449 = vperm.xlu2 %648, %v410_v37   ;;  %v414_v38 = vsub.f32 1.0, %v413_v36 }
 0x232   : > { %v494_v16 = vsub.f32 1.0, %v493_v5 }
 0x233   : > { %v415_v42 = vmul.f32 %v669_v33, %v414_v38 }
 0x234   : > { %v495_v21 = vmul.f32 %v671_v59, %v494_v16 }
 0x235   : > { %v416_v45 = vadd.f32 %v669_v33, %v415_v42 }
 0x236   : > { %v496_v26 = vadd.f32 %v671_v59, %v495_v21 }
 0x237   : > { %v420_v49 = vsel %vm419_vm3, %v669_v33, %v416_v45 }
 0x238   : > { %v425_v50 = vsel %vm422_vm4, %v424_v47, %v420_v49  ;;  %v498_v33 = vsel %vm497_vm6, %v671_v59, %v496_v26 }
 0x239   : > { %454 = vperm.xlu1 %649, %v425_v50   ;;  %459 = vperm.xlu2 %648, %v440_v51  }
 0x241   : > { %503 = vperm.xlu1 %649, %v500_v19   ;;  %518 = vperm.xlu2 %648, %v515_v52  }
 0x284   : > { %v445_v55 = vpop.permute.xlu0 %444 }
 0x285   : > { %v788_v58 = vmul.f32 %v445_v55, %v756_v10 }
 0x287   : > { %v479_v63 = vsel %vm231_vm0, %v788_v58, 0.0  ;;  %v466_v7 = vsel %vm231_vm0, %v788_v58, -inf }
 0x28b   : > { %v450_v53 = vpop.permute.xlu2 %449 }
 0x28c   : > { %v785_v56 = vmul.f32 %v450_v53, %v742_v3 }
 0x28d   : > { %v510_v29 = vpop.permute.xlu0 %509 }
 0x28e   : > { %v480_v60 = vsel %vm231_vm0, %v785_v56, 0.0  ;;  %v467_v0 = vsel %vm231_vm0, %v785_v56, -inf  ;;  %v512_v36 = vperm.slane %v510_v29, 0 }
 0x28f   : > { %v481_v6 = vadd.f32 %v480_v60, %v479_v63  ;;  %v470_v12 = vmax.f32 %v466_v7, %v467_v0 }
 0x293   : > { %v460_v57 = vpop.permute.xlu2 %459 }
 0x294   : > { %v793_v61 = vmul.f32 %v460_v57, %v738_v1 }
 0x296   : > { %v469_v8 = vsel %vm231_vm0, %v793_v61, -inf  ;;  %v484_v15 = vsel %vm231_vm0, %v793_v61, 0.0 }
 0x29b   : > { %v519_v39 = vpop.permute.xlu2 %518 }
 0x29c   : > { %v521_v42 = vperm.slane %v519_v39, 0 }
 0x2ab   : > { %v455_v62 = vpop.permute.xlu1 %454 }
 0x2ac   : > { %v464_v4 = vmul.f32 %v455_v62, %v740_v2 }
 0x2ae   : > { %v468_v9 = vsel %vm231_vm0, %v464_v4, -inf  ;;  %v482_v11 = vsel %vm231_vm0, %v464_v4, 0.0 }
 0x2af   : > { %v471_v13 = vmax.f32 %v468_v9, %v469_v8  ;;  %v483_v14 = vadd.f32 %v482_v11, %v481_v6 }
 0x2b1   : > { %v472_v17 = vmax.f32 %v470_v12, %v471_v13  ;;  %v485_v18 = vadd.f32 %v484_v15, %v483_v14 }
 0x2b3   : > { %v486_v19 = vrot.slane %v485_v18, 4  ;;  %v473_v20 = vrot.slane %v472_v17, 4  ;;  %v504_v32 = vpop.permute.xlu1 %503 }
 0x2b4   : > { %v506_v37 = vperm.slane %v504_v32, 0 }
 0x2b5   : > { %v474_v22 = vmax.f32 %v472_v17, %v473_v20  ;;  %v487_v23 = vadd.f32 %v486_v19, %v485_v18 }
 0x2b7   : > { %v475_v24 = vrot.slane %v474_v22, 2  ;;  %v488_v25 = vrot.slane %v487_v23, 2 }
 0x2b9   : > { %v476_v27 = vmax.f32 %v474_v22, %v475_v24  ;;  %v489_v28 = vadd.f32 %v488_v25, %v487_v23 }
 0x2bb   : > { %v477_v30 = vrot.slane %v476_v27, 1  ;;  %v490_v31 = vrot.slane %v489_v28, 1 }
 0x2bd   : > { %v478_v34 = vmax.f32 %v476_v27, %v477_v30  ;;  %v491_v35 = vadd.f32 %v490_v31, %v489_v28 }
 0x2bf   : > { %v499_v38 = vmul.f32 %v498_v33, %v491_v35  ;;  %v507_v40 = vmul.f32 %v506_v37, %v478_v34 }
 0x2c1   : > { %v513_v41 = vmul.f32 %v512_v36, %v499_v38 }
 0x2c3   : > { %v514_v43 = vadd.f32 %v513_v41, %v507_v40 }
 0x2c5   : > { %v522_v44 = vadd.f32 %v521_v42, %v514_v43 }
 0x2c7   : > { %v627_v45 = vmul.f32 -1.442695, %v522_v44 }
 0x2c9   : > { %672 = vpow2.f32 %v627_v45 }
 0x2cf   : > { %v673_v46 = vpop.eup %672 }
 0x2d0   : > { %v526_v47 = vadd.f32 1.0, %v673_v46 }
 0x2d2   : > { %674 = vrcp.f32 %v526_v47  ;;  %v538_v51 = vand.u32 2147483648, %v526_v47  ;;  %v536_v53 = vand.u32 2147483647, %v526_v47  ;;  %vm532_vm8 = vweird.f32 %v526_v47 }
 0x2d4   : > { %v539_v55 = vor.u32 1.1754944e-38, %v538_v51  ;;  %vm537_vm10 = vcmp.eq.f32.partialorder %v536_v53, 8.507059e+37 }
 0x2d8   : > { %v675_v48 = vpop.eup %674 }
 0x2d9   : > { %v528_v49 = vmul.f32 %v675_v48, %v526_v47  ;;  %vm533_vm7 = vweird.f32 %v675_v48 }
 0x2da   : > { %vm534_vm9 = vmor %vm532_vm8, %vm533_vm7 }
 0x2db   : > { %v529_v50 = vsub.f32 1.0, %v528_v49 }
 0x2dd   : > { %v530_v52 = vmul.f32 %v675_v48, %v529_v50 }
 0x2df   : > { %v531_v54 = vadd.f32 %v675_v48, %v530_v52 }
 0x2e1   : > { %v535_v57 = vsel %vm534_vm9, %v675_v48, %v531_v54 }
 0x2e2   : > { %v540_v59 = vsel %vm537_vm10, %v539_v55, %v535_v57 }
 0x2e3   : > { %v542_v60 = vmul.f32 %v540_v59, %v788_v58  ;;  %v543_v62 = vmul.f32 %v540_v59, %v785_v56  ;;  %v544_v63 = vmul.f32 %v540_v59, %v464_v4  ;;  %v545_v0 = vmul.f32 %v540_v59, %v793_v61 }
 0x2e5   : > { %v546_v5 = vadd.f32 %v542_v60, %v756_v10  ;;  %v547_v6 = vadd.f32 %v543_v62, %v742_v3  ;;  %v548_v7 = vadd.f32 %v544_v63, %v740_v2  ;;  %v549_v8 = vadd.f32 %v545_v0, %v738_v1 }
 0x2e7   : > { %550 = vst.msk [vmem:[%s226_s15] sm:$0xff] %vm231_vm0, %v546_v5 }
 0x2e8   : > { %551 = vst.msk [vmem:[%s226_s15 + $0x8] sm:$0xff] %vm231_vm0, %v547_v6 }
 0x2e9   : > { %552 = vst.msk [vmem:[%s226_s15 + $0x10] sm:$0xff] %vm231_vm0, %v548_v7 }
 0x2ea   : > { %553 = vst.msk [vmem:[%s226_s15 + $0x18] sm:$0xff] %vm231_vm0, %v549_v8 }
 0x2eb PF: > { %s17_s20 = sadd.s32 1, %s682_s20  }
 0x2ec   : > { %p14_p4 = scmp.ge.s32.totalorder %s17_s20, 8  }
 0x2ee   :  { %16 = sbr.rel (!%p14_p4) target bundleno = 3 (0x3), region = 70 }

// kernel: transformer_forward.19
= control target key start
LH: loop header
LB: loop body
LE: loop exit
PB: predicated region body
PF: predicated region fallthrough
CT: control target
= control target key end

     0   :  { %vm53_vm0 = vcmask 261120   ;;  %v402_v48 = vmov 32.0   ;;  %s832_s0 = inlined_call_operand.vmem [shape: f32[96,32], index: 0, kind: input, shape index: {}]   ;;  %s833_s1 = inlined_call_operand.vmem [shape: f32[96,32], index: 1, kind: input, shape index: {}]   ;;  %s834_s2 = inlined_call_operand.vmem [shape: f32[1,32], index: 2, kind: input, shape index: {}]   ;;  %s835_s3 = inlined_call_operand.vmem [shape: f32[1,32], index: 3, kind: input, shape index: {}]   ;;  %s836_s4 = inlined_call_operand.vmem [shape: f32[96,32], index: 4, kind: output, shape index: {}]  }
   0x1   :  { %v21_v0 = vld [vmem:[%s832_s0 + $0x20] sm:$0xff]  ;;  %v19_v2 = vld [vmem:[%s832_s0 + $0x10] sm:$0xff]  ;;  %v22_v9 = vld [vmem:[%s832_s0 + $0x28] sm:$0xff]  ;;  %376 = vrcp.f32 %v402_v48 }
   0x2   :  { %v33_v1 = vld [vmem:[%s833_s1 + $0x20] sm:$0xff]  ;;  %v31_v4 = vld [vmem:[%s833_s1 + $0x10] sm:$0xff]  ;;  %v34_v10 = vld [vmem:[%s833_s1 + $0x28] sm:$0xff] }
   0x3   :  { %v437_v3 = vadd.f32 %v33_v1, %v21_v0  ;;  %v17_v5 = vld [vmem:[%s832_s0] sm:$0xff]  ;;  %v448_v7 = vadd.f32 %v31_v4, %v19_v2  ;;  %v20_v11 = vld [vmem:[%s832_s0 + $0x18] sm:$0xff]  ;;  %v18_v14 = vld [vmem:[%s832_s0 + $0x8] sm:$0xff]  ;;  %v476_v18 = vadd.f32 %v34_v10, %v22_v9 }
   0x4   :  { %v29_v6 = vld [vmem:[%s833_s1] sm:$0xff]  ;;  %v32_v13 = vld [vmem:[%s833_s1 + $0x18] sm:$0xff]  ;;  %v30_v15 = vld [vmem:[%s833_s1 + $0x8] sm:$0xff] }
   0x5   :  { %v450_v8 = vadd.f32 %v29_v6, %v17_v5  ;;  %v66_v12 = vsel %vm53_vm0, %v437_v3, 0.0  ;;  %v60_v16 = vsel %vm53_vm0, %v448_v7, 0.0  ;;  %v478_v19 = vadd.f32 %v32_v13, %v20_v11  ;;  %v25_v24 = vld [vmem:[%s832_s0 + $0x40] sm:$0xff]  ;;  %v23_v26 = vld [vmem:[%s832_s0 + $0x30] sm:$0xff]  ;;  %v24_v28 = vld [vmem:[%s832_s0 + $0x38] sm:$0xff] }
   0x6   :  { %67 = vadd.xlane.f32.xlu2 %v66_v12  ;;  %61 = vadd.xlane.f32.xlu1 %v60_v16  ;;  %v480_v20 = vadd.f32 %v30_v15, %v18_v14  ;;  %v69_v21 = vsel %vm53_vm0, %v476_v18, 0.0  ;;  %v37_v25 = vld [vmem:[%s833_s1 + $0x40] sm:$0xff]  ;;  %v35_v27 = vld [vmem:[%s833_s1 + $0x30] sm:$0xff]  ;;  %v36_v29 = vld [vmem:[%s833_s1 + $0x38] sm:$0xff] }
   0x7   :  { %v54_v17 = vsel %vm53_vm0, %v450_v8, 0.0  ;;  %v63_v22 = vsel %vm53_vm0, %v478_v19, 0.0  ;;  %v506_v30 = vadd.f32 %v37_v25, %v25_v24  ;;  %v508_v31 = vadd.f32 %v35_v27, %v23_v26  ;;  %v28_v35 = vld [vmem:[%s832_s0 + $0x58] sm:$0xff]  ;;  %v26_v38 = vld [vmem:[%s832_s0 + $0x48] sm:$0xff]  ;;  %v27_v40 = vld [vmem:[%s832_s0 + $0x50] sm:$0xff]  ;;  %v377_v49 = vpop.eup %376 }
   0x8   :  { %55 = vadd.xlane.f32.xlu0 %v54_v17  ;;  %v57_v23 = vsel %vm53_vm0, %v480_v20, 0.0  ;;  %v510_v32 = vadd.f32 %v36_v29, %v24_v28  ;;  %v40_v36 = vld [vmem:[%s833_s1 + $0x58] sm:$0xff]  ;;  %v38_v39 = vld [vmem:[%s833_s1 + $0x48] sm:$0xff]  ;;  %v39_v41 = vld [vmem:[%s833_s1 + $0x50] sm:$0xff]  ;;  %v91_v50 = vmul.f32 32.0, %v377_v49  ;;  %vm95_vm1 = vweird.f32 %v377_v49 }
   0x9   :  { %v78_v33 = vsel %vm53_vm0, %v506_v30, 0.0  ;;  %v72_v34 = vsel %vm53_vm0, %v508_v31, 0.0  ;;  %v536_v42 = vadd.f32 %v40_v36, %v28_v35  ;;  %v538_v43 = vadd.f32 %v38_v39, %v26_v38 }
   0xa   :  { %v75_v37 = vsel %vm53_vm0, %v510_v32, 0.0  ;;  %v540_v44 = vadd.f32 %v39_v41, %v27_v40  ;;  %v92_v51 = vsub.f32 1.0, %v91_v50 }
   0xb   :  { %v87_v45 = vsel %vm53_vm0, %v536_v42, 0.0  ;;  %v81_v46 = vsel %vm53_vm0, %v538_v43, 0.0 }
   0xc   :  { %v84_v47 = vsel %vm53_vm0, %v540_v44, 0.0  ;;  %v93_v52 = vmul.f32 %v377_v49, %v92_v51 }
   0xe   :  { %70 = vadd.xlane.f32.xlu2 %v69_v21  ;;  %64 = vadd.xlane.f32.xlu1 %v63_v22  ;;  %v94_v53 = vadd.f32 %v377_v49, %v93_v52 }
  0x10   :  { %58 = vadd.xlane.f32.xlu0 %v57_v23  ;;  %v548_v54 = vsel %vm95_vm1, %v377_v49, %v94_v53 }
  0x16   :  { %79 = vadd.xlane.f32.xlu2 %v78_v33  ;;  %76 = vadd.xlane.f32.xlu1 %v75_v37 }
  0x18   :  { %73 = vadd.xlane.f32.xlu0 %v72_v34 }
  0x1e   :  { %88 = vadd.xlane.f32.xlu2 %v87_v45  ;;  %85 = vadd.xlane.f32.xlu1 %v84_v47 }
  0x20   :  { %82 = vadd.xlane.f32.xlu0 %v81_v46 }
  0x79   :  { %v68_v55 = vpop.xlane.xlu2 %67  ;;  %v62_v56 = vpop.xlane.xlu1 %61 }
  0x7a   :  { %v99_v58 = vmul.f32 %v548_v54, %v62_v56  ;;  %v101_v12 = vmul.f32 %v548_v54, %v68_v55 }
  0x7b   :  { %v56_v57 = vpop.xlane.xlu0 %55 }
  0x7c   :  { %v97_v59 = vmul.f32 %v548_v54, %v56_v57  ;;  %v553_v60 = vsub.f32 %v448_v7, %v99_v58 }
  0x7e   :  { %v556_v61 = vsub.f32 %v450_v8, %v97_v59  ;;  %v123_v62 = vmul.f32 %v553_v60, %v553_v60 }
  0x80   :  { %v121_v63 = vmul.f32 %v556_v61, %v556_v61  ;;  %v139_v1 = vsel %vm53_vm0, %v123_v62, 0.0 }
  0x81   :  { %v71_v0 = vpop.xlane.xlu2 %70  ;;  %140 = vadd.xlane.f32.xlu2 %v139_v1  ;;  %v65_v5 = vpop.xlane.xlu1 %64 }
  0x82   :  { %v133_v2 = vsel %vm53_vm0, %v121_v63, 0.0  ;;  %v102_v4 = vmul.f32 %v548_v54, %v71_v0  ;;  %v100_v7 = vmul.f32 %v548_v54, %v65_v5 }
  0x83   :  { %134 = vadd.xlane.f32.xlu0 %v133_v2  ;;  %v59_v6 = vpop.xlane.xlu0 %58 }
  0x84   :  { %v98_v8 = vmul.f32 %v548_v54, %v59_v6  ;;  %v568_v9 = vsub.f32 %v476_v18, %v102_v4  ;;  %v571_v10 = vsub.f32 %v478_v19, %v100_v7 }
  0x86   :  { %v574_v11 = vsub.f32 %v480_v20, %v98_v8  ;;  %v126_v13 = vmul.f32 %v568_v9, %v568_v9  ;;  %v124_v14 = vmul.f32 %v571_v10, %v571_v10  ;;  %v587_v20 = vsub.f32 %v437_v3, %v101_v12 }
  0x88   :  { %v122_v15 = vmul.f32 %v574_v11, %v574_v11  ;;  %v148_v16 = vsel %vm53_vm0, %v126_v13, 0.0  ;;  %v142_v18 = vsel %vm53_vm0, %v124_v14, 0.0  ;;  %v125_v28 = vmul.f32 %v587_v20, %v587_v20 }
  0x89   :  { %v80_v17 = vpop.xlane.xlu2 %79  ;;  %149 = vadd.xlane.f32.xlu2 %v148_v16  ;;  %v77_v23 = vpop.xlane.xlu1 %76 }
  0x8a   :  { %v136_v19 = vsel %vm53_vm0, %v122_v15, 0.0  ;;  %v105_v21 = vmul.f32 %v548_v54, %v80_v17  ;;  %v104_v26 = vmul.f32 %v548_v54, %v77_v23  ;;  %v145_v36 = vsel %vm53_vm0, %v125_v28, 0.0 }
  0x8b   :  { %143 = vadd.xlane.f32.xlu0 %v142_v18  ;;  %v74_v22 = vpop.xlane.xlu0 %73  ;;  %137 = vadd.xlane.f32.xlu1 %v136_v19 }
  0x8c   :  { %v103_v24 = vmul.f32 %v548_v54, %v74_v22  ;;  %v592_v25 = vsub.f32 %v506_v30, %v105_v21  ;;  %v606_v34 = vsub.f32 %v510_v32, %v104_v26 }
  0x8e   :  { %v596_v27 = vsub.f32 %v508_v31, %v103_v24  ;;  %v129_v3 = vmul.f32 %v592_v25, %v592_v25  ;;  %v128_v41 = vmul.f32 %v606_v34, %v606_v34 }
  0x90   :  { %v127_v29 = vmul.f32 %v596_v27, %v596_v27  ;;  %v157_v33 = vsel %vm53_vm0, %v129_v3, 0.0 }
  0x91   :  { %v89_v30 = vpop.xlane.xlu2 %88  ;;  %158 = vadd.xlane.f32.xlu2 %v157_v33  ;;  %v86_v38 = vpop.xlane.xlu1 %85 }
  0x92   :  { %v151_v35 = vsel %vm53_vm0, %v127_v29, 0.0  ;;  %v108_v31 = vmul.f32 %v548_v54, %v89_v30  ;;  %v107_v32 = vmul.f32 %v548_v54, %v86_v38 }
  0x93   :  { %152 = vadd.xlane.f32.xlu0 %v151_v35  ;;  %v83_v37 = vpop.xlane.xlu0 %82  ;;  %146 = vadd.xlane.f32.xlu1 %v145_v36  ;;  %v667_v36 = vld [vmem:[%s834_s2] ss:$0 sm:$0xff] }
  0x94   :  { %v106_v39 = vmul.f32 %v548_v54, %v83_v37  ;;  %v613_v40 = vsub.f32 %v536_v42, %v108_v31  ;;  %v627_v49 = vsub.f32 %v540_v44, %v107_v32  ;;  %v154_v42 = vsel %vm53_vm0, %v128_v41, 0.0 }
  0x96   :  { %v619_v45 = vsub.f32 %v538_v43, %v106_v39  ;;  %v132_v46 = vmul.f32 %v613_v40, %v613_v40  ;;  %v131_v43 = vmul.f32 %v627_v49, %v627_v49 }
  0x98   :  { %v130_v47 = vmul.f32 %v619_v45, %v619_v45  ;;  %v166_v48 = vsel %vm53_vm0, %v132_v46, 0.0  ;;  %v163_v51 = vsel %vm53_vm0, %v131_v43, 0.0 }
  0x99   :  { %167 = vadd.xlane.f32.xlu2 %v166_v48 }
  0x9a   :  { %v160_v50 = vsel %vm53_vm0, %v130_v47, 0.0  ;;  %v684_v47 = vld [vmem:[%s835_s3] ss:$0 sm:$0xff] }
  0x9b   :  { %161 = vadd.xlane.f32.xlu0 %v160_v50  ;;  %155 = vadd.xlane.f32.xlu1 %v154_v42 }
  0xa3   :  { %164 = vadd.xlane.f32.xlu1 %v163_v51 }
  0xf4   :  { %v141_v52 = vpop.xlane.xlu2 %140 }
  0xf5   :  { %v171_v55 = vmul.f32 %v141_v52, %v548_v54 }
  0xf6   :  { %v135_v53 = vpop.xlane.xlu0 %134 }
  0xf7   :  { %v169_v44 = vmul.f32 %v135_v53, %v548_v54  ;;  %v183_v56 = vadd.f32 1e-05, %v171_v55 }
  0xf9   :  { %v181_v57 = vadd.f32 1e-05, %v169_v44  ;;  %378 = vrsqrt.f32 %v183_v56  ;;  %vm219_vm2 = vweird.f32 %v183_v56 }
  0xfb   :  { %380 = vrsqrt.f32 %v181_v57  ;;  %vm199_vm4 = vweird.f32 %v181_v57 }
  0xfc   :  { %v150_v58 = vpop.xlane.xlu2 %149 }
  0xfd   :  { %v174_v62 = vmul.f32 %v150_v58, %v548_v54 }
  0xfe   :  { %v144_v59 = vpop.xlane.xlu0 %143  ;;  %v138_v63 = vpop.xlane.xlu1 %137 }
  0xff   :  { %v172_v0 = vmul.f32 %v144_v59, %v548_v54  ;;  %v170_v1 = vmul.f32 %v138_v63, %v548_v54  ;;  %v379_v2 = vpop.eup %378  ;;  %v639_v4 = vadd.f32 1e-05, %v174_v62 }
 0x100   :  { %v214_v7 = vmul.f32 %v379_v2, %v183_v56  ;;  %vm220_vm3 = vweird.f32 %v379_v2 }
 0x101   :  { %v641_v5 = vadd.f32 1e-05, %v172_v0  ;;  %v381_v6 = vpop.eup %380  ;;  %v643_v8 = vadd.f32 1e-05, %v170_v1  ;;  %382 = vrsqrt.f32 %v639_v4  ;;  %vm249_vm6 = vweird.f32 %v639_v4  ;;  %vm221_vm7 = vmor %vm219_vm2, %vm220_vm3 }
 0x102   :  { %v194_v12 = vmul.f32 %v381_v6, %v181_v57  ;;  %v215_v13 = vmul.f32 %v379_v2, %v214_v7  ;;  %vm200_vm5 = vweird.f32 %v381_v6 }
 0x103   :  { %384 = vrsqrt.f32 %v643_v8  ;;  %vm201_vm8 = vmor %vm199_vm4, %vm200_vm5  ;;  %vm229_vm9 = vweird.f32 %v641_v5  ;;  %vm209_vm14 = vweird.f32 %v643_v8 }
 0x104   :  { %v195_v14 = vmul.f32 %v381_v6, %v194_v12  ;;  %386 = vrsqrt.f32 %v641_v5  ;;  %v216_v15 = vmul.f32 0.5, %v215_v13  ;;  %v159_v16 = vpop.xlane.xlu2 %158 }
 0x105   :  { %v177_v19 = vmul.f32 %v159_v16, %v548_v54 }
 0x106   :  { %v153_v17 = vpop.xlane.xlu0 %152  ;;  %v196_v18 = vmul.f32 0.5, %v195_v14  ;;  %v147_v21 = vpop.xlane.xlu1 %146  ;;  %v217_v23 = vsub.f32 1.5, %v216_v15 }
 0x107   :  { %v175_v22 = vmul.f32 %v153_v17, %v548_v54  ;;  %v173_v24 = vmul.f32 %v147_v21, %v548_v54  ;;  %v651_v26 = vpop.eup %382  ;;  %v653_v28 = vadd.f32 1e-05, %v177_v19 }
 0x108   :  { %v197_v3 = vsub.f32 1.5, %v196_v18  ;;  %v218_v33 = vmul.f32 %v379_v2, %v217_v23  ;;  %v244_v30 = vmul.f32 %v651_v26, %v639_v4  ;;  %vm250_vm10 = vweird.f32 %v651_v26 }
 0x109   :  { %v655_v29 = vpop.eup %384  ;;  %v660_v35 = vadd.f32 1e-05, %v173_v24  ;;  %388 = vrsqrt.f32 %v653_v28  ;;  %v673_v39 = vadd.f32 1e-05, %v175_v22  ;;  %vm251_vm13 = vmor %vm249_vm6, %vm250_vm10  ;;  %vm279_vm15 = vweird.f32 %v653_v28 }
 0x10a   :  { %v662_v31 = vpop.eup %386  ;;  %v198_v37 = vmul.f32 %v381_v6, %v197_v3  ;;  %v204_v38 = vmul.f32 %v655_v29, %v643_v8  ;;  %v222_v32 = vsel %vm221_vm7, %v379_v2, %v218_v33  ;;  %v245_v41 = vmul.f32 %v651_v26, %v244_v30 }
 0x10b   :  { %v224_v46 = vmul.f32 %v662_v31, %v641_v5  ;;  %v315_v48 = vmul.f32 %v222_v32, %v553_v60  ;;  %390 = vrsqrt.f32 %v660_v35  ;;  %vm210_vm11 = vweird.f32 %v655_v29 }
 0x10c   :  { %v202_v42 = vsel %vm201_vm8, %v381_v6, %v198_v37  ;;  %v205_v50 = vmul.f32 %v655_v29, %v204_v38  ;;  %v246_v51 = vmul.f32 0.5, %v245_v41  ;;  %v168_v53 = vpop.xlane.xlu2 %167  ;;  %392 = vrsqrt.f32 %v673_v39  ;;  %vm211_vm2 = vmor %vm209_vm14, %vm210_vm11 }
 0x10d   :  { %v313_v43 = vmul.f32 %v202_v42, %v556_v61  ;;  %v225_v52 = vmul.f32 %v662_v31, %v224_v46  ;;  %v331_v55 = vmul.f32 %v667_v36, %v315_v48  ;;  %vm230_vm12 = vweird.f32 %v662_v31 }
 0x10e   :  { %v206_v44 = vmul.f32 0.5, %v205_v50  ;;  %v156_v60 = vpop.xlane.xlu1 %155  ;;  %v247_v57 = vsub.f32 1.5, %v246_v51  ;;  %v180_v63 = vmul.f32 %v168_v53, %v548_v54  ;;  %v162_v16 = vpop.xlane.xlu0 %161  ;;  %vm231_vm3 = vmor %vm229_vm9, %vm230_vm12  ;;  %vm259_vm4 = vweird.f32 %v673_v39 }
 0x10f   :  { %v329_v56 = vmul.f32 %v667_v36, %v313_v43  ;;  %v226_v58 = vmul.f32 0.5, %v225_v52  ;;  %v697_v61 = vpop.eup %388  ;;  %v347_v59 = vadd.f32 %v684_v47, %v331_v55  ;;  %v176_v0 = vmul.f32 %v156_v60, %v548_v54 }
 0x110   :  { %v207_v62 = vsub.f32 1.5, %v206_v44  ;;  %v248_v2 = vmul.f32 %v651_v26, %v247_v57  ;;  %v274_v7 = vmul.f32 %v697_v61, %v653_v28  ;;  %vm280_vm1 = vweird.f32 %v697_v61 }
 0x111   :  { %v345_v1 = vadd.f32 %v684_v47, %v329_v56  ;;  %v227_v6 = vsub.f32 1.5, %v226_v58  ;;  %359 = vst.msk [vmem:[%s836_s4 + $0x10] sm:$0xff] %vm53_vm0, %v347_v59  ;;  %v391_v13 = vpop.eup %390  ;;  %v727_v8 = vadd.f32 1e-05, %v180_v63  ;;  %v736_v22 = vadd.f32 1e-05, %v176_v0  ;;  %vm281_vm5 = vmor %vm279_vm15, %vm280_vm1 }
 0x112   :  { %v208_v12 = vmul.f32 %v655_v29, %v207_v62  ;;  %v252_v14 = vsel %vm251_vm13, %v651_v26, %v248_v2  ;;  %v275_v15 = vmul.f32 %v697_v61, %v274_v7  ;;  %v393_v17 = vpop.eup %392  ;;  %v234_v21 = vmul.f32 %v391_v13, %v660_v35 }
 0x113   :  { %357 = vst.msk [vmem:[%s836_s4] sm:$0xff] %vm53_vm0, %v345_v1  ;;  %v228_v4 = vmul.f32 %v662_v31, %v227_v6  ;;  %v318_v18 = vmul.f32 %v252_v14, %v568_v9  ;;  %v254_v3 = vmul.f32 %v393_v17, %v673_v39  ;;  %v178_v30 = vmul.f32 %v162_v16, %v548_v54 }
 0x114   :  { %v212_v19 = vsel %vm211_vm2, %v655_v29, %v208_v12  ;;  %v276_v26 = vmul.f32 0.5, %v275_v15  ;;  %v235_v33 = vmul.f32 %v391_v13, %v234_v21  ;;  %394 = vrsqrt.f32 %v727_v8 }
 0x115   :  { %v314_v23 = vmul.f32 %v212_v19, %v574_v11  ;;  %v232_v24 = vsel %vm231_vm3, %v662_v31, %v228_v4  ;;  %v334_v9 = vmul.f32 %v667_v36, %v318_v18  ;;  %v255_v38 = vmul.f32 %v393_v17, %v254_v3 }
 0x116   :  { %v316_v29 = vmul.f32 %v232_v24, %v571_v10  ;;  %v277_v37 = vsub.f32 1.5, %v276_v26  ;;  %v236_v32 = vmul.f32 0.5, %v235_v33  ;;  %v165_v41 = vpop.xlane.xlu1 %164  ;;  %396 = vrsqrt.f32 %v736_v22 }
 0x117   :  { %v330_v5 = vmul.f32 %v667_v36, %v314_v23  ;;  %v350_v11 = vadd.f32 %v684_v47, %v334_v9  ;;  %v256_v48 = vmul.f32 0.5, %v255_v38  ;;  %vm240_vm6 = vweird.f32 %v391_v13 }
 0x118   :  { %v332_v31 = vmul.f32 %v667_v36, %v316_v29  ;;  %v278_v10 = vmul.f32 %v697_v61, %v277_v37  ;;  %v237_v50 = vsub.f32 1.5, %v236_v32  ;;  %v761_v43 = vadd.f32 1e-05, %v178_v30 }
 0x119   :  { %v346_v46 = vadd.f32 %v684_v47, %v330_v5  ;;  %362 = vst.msk [vmem:[%s836_s4 + $0x28] sm:$0xff] %vm53_vm0, %v350_v11  ;;  %v257_v52 = vsub.f32 1.5, %v256_v48  ;;  %vm260_vm7 = vweird.f32 %v393_v17  ;;  %v179_v53 = vmul.f32 %v165_v41, %v548_v54 }
 0x11a   :  { %v348_v42 = vadd.f32 %v684_v47, %v332_v31  ;;  %v282_v51 = vsel %vm281_vm5, %v697_v61, %v278_v10  ;;  %v238_v55 = vmul.f32 %v391_v13, %v237_v50  ;;  %vm239_vm8 = vweird.f32 %v660_v35  ;;  %v395_v44 = vpop.eup %394  ;;  %vm261_vm10 = vmor %vm259_vm4, %vm260_vm7 }
 0x11b   :  { %358 = vst.msk [vmem:[%s836_s4 + $0x8] sm:$0xff] %vm53_vm0, %v346_v46  ;;  %v321_v28 = vmul.f32 %v282_v51, %v592_v25  ;;  %398 = vrsqrt.f32 %v761_v43  ;;  %vm241_vm9 = vmor %vm239_vm8, %vm240_vm6  ;;  %v258_v60 = vmul.f32 %v393_v17, %v257_v52  ;;  %v191_v56 = vadd.f32 1e-05, %v179_v53 }
 0x11c   :  { %360 = vst.msk [vmem:[%s836_s4 + $0x18] sm:$0xff] %vm53_vm0, %v348_v42  ;;  %v242_v58 = vsel %vm241_vm9, %v391_v13, %v238_v55  ;;  %v304_v54 = vmul.f32 %v395_v44, %v727_v8  ;;  %v397_v61 = vpop.eup %396  ;;  %vm309_vm11 = vweird.f32 %v727_v8  ;;  %vm310_vm12 = vweird.f32 %v395_v44 }
 0x11d   :  { %v337_v57 = vmul.f32 %v667_v36, %v321_v28  ;;  %v317_v25 = vmul.f32 %v242_v58, %v587_v20  ;;  %v262_v59 = vsel %vm261_vm10, %v393_v17, %v258_v60  ;;  %400 = vrsqrt.f32 %v191_v56  ;;  %vm311_vm14 = vmor %vm309_vm11, %vm310_vm12 }
 0x11e   :  { %v319_v62 = vmul.f32 %v262_v59, %v596_v27  ;;  %v305_v63 = vmul.f32 %v395_v44, %v304_v54  ;;  %v264_v0 = vmul.f32 %v397_v61, %v736_v22  ;;  %vm270_vm13 = vweird.f32 %v397_v61 }
 0x11f   :  { %v353_v35 = vadd.f32 %v684_v47, %v337_v57  ;;  %v333_v1 = vmul.f32 %v667_v36, %v317_v25  ;;  %vm269_vm15 = vweird.f32 %v736_v22  ;;  %vm289_vm2 = vweird.f32 %v761_v43 }
 0x120   :  { %v335_v39 = vmul.f32 %v667_v36, %v319_v62  ;;  %v306_v20 = vmul.f32 0.5, %v305_v63  ;;  %v265_v6 = vmul.f32 %v397_v61, %v264_v0  ;;  %vm271_vm1 = vmor %vm269_vm15, %vm270_vm13  ;;  %vm299_vm6 = vweird.f32 %v191_v56 }
 0x121   :  { %v399_v2 = vpop.eup %398  ;;  %365 = vst.msk [vmem:[%s836_s4 + $0x40] sm:$0xff] %vm53_vm0, %v353_v35  ;;  %v349_v7 = vadd.f32 %v684_v47, %v333_v1 }
 0x122   :  { %v284_v27 = vmul.f32 %v399_v2, %v761_v43  ;;  %v351_v12 = vadd.f32 %v684_v47, %v335_v39  ;;  %v307_v13 = vsub.f32 1.5, %v306_v20  ;;  %v266_v14 = vmul.f32 0.5, %v265_v6 }
 0x123   :  { %v401_v4 = vpop.eup %400  ;;  %361 = vst.msk [vmem:[%s836_s4 + $0x20] sm:$0xff] %vm53_vm0, %v349_v7  ;;  %vm290_vm3 = vweird.f32 %v399_v2 }
 0x124   :  { %v285_v15 = vmul.f32 %v399_v2, %v284_v27  ;;  %363 = vst.msk [vmem:[%s836_s4 + $0x30] sm:$0xff] %vm53_vm0, %v351_v12  ;;  %v308_v8 = vmul.f32 %v395_v44, %v307_v13  ;;  %v267_v16 = vsub.f32 1.5, %v266_v14  ;;  %v294_v17 = vmul.f32 %v401_v4, %v191_v56  ;;  %vm291_vm4 = vmor %vm289_vm2, %vm290_vm3 }
 0x125   :  { %vm300_vm5 = vweird.f32 %v401_v4 }
 0x126   :  { %v286_v18 = vmul.f32 0.5, %v285_v15  ;;  %v312_v19 = vsel %vm311_vm14, %v395_v44, %v308_v8  ;;  %v268_v21 = vmul.f32 %v397_v61, %v267_v16  ;;  %v295_v23 = vmul.f32 %v401_v4, %v294_v17  ;;  %vm301_vm7 = vmor %vm299_vm6, %vm300_vm5 }
 0x127   :  { %v324_v24 = vmul.f32 %v312_v19, %v613_v40 }
 0x128   :  { %v287_v26 = vsub.f32 1.5, %v286_v18  ;;  %v272_v3 = vsel %vm271_vm1, %v397_v61, %v268_v21  ;;  %v296_v9 = vmul.f32 0.5, %v295_v23 }
 0x129   :  { %v340_v29 = vmul.f32 %v667_v36, %v324_v24  ;;  %v320_v33 = vmul.f32 %v272_v3, %v606_v34 }
 0x12a   :  { %v288_v30 = vmul.f32 %v399_v2, %v287_v26  ;;  %v297_v5 = vsub.f32 1.5, %v296_v9 }
 0x12b   :  { %v356_v22 = vadd.f32 %v684_v47, %v340_v29  ;;  %v336_v37 = vmul.f32 %v667_v36, %v320_v33 }
 0x12c   :  { %v292_v40 = vsel %vm291_vm4, %v399_v2, %v288_v30  ;;  %v298_v11 = vmul.f32 %v401_v4, %v297_v5 }
 0x12d   :  { %v322_v38 = vmul.f32 %v292_v40, %v619_v45  ;;  %368 = vst.msk [vmem:[%s836_s4 + $0x58] sm:$0xff] %vm53_vm0, %v356_v22  ;;  %v352_v34 = vadd.f32 %v684_v47, %v336_v37 }
 0x12e   :  { %v302_v32 = vsel %vm301_vm7, %v401_v4, %v298_v11 }
 0x12f   :  { %v338_v31 = vmul.f32 %v667_v36, %v322_v38  ;;  %364 = vst.msk [vmem:[%s836_s4 + $0x38] sm:$0xff] %vm53_vm0, %v352_v34  ;;  %v323_v45 = vmul.f32 %v302_v32, %v627_v49 }
 0x131   :  { %v354_v41 = vadd.f32 %v684_v47, %v338_v31  ;;  %v339_v46 = vmul.f32 %v667_v36, %v323_v45 }
 0x133   :  { %366 = vst.msk [vmem:[%s836_s4 + $0x48] sm:$0xff] %vm53_vm0, %v354_v41  ;;  %v355_v10 = vadd.f32 %v684_v47, %v339_v46 }
 0x135   :  { %367 = vst.msk [vmem:[%s836_s4 + $0x50] sm:$0xff] %vm53_vm0, %v355_v10 }

// kernel: transformer_forward.20
= control target key start
LH: loop header
LB: loop body
LE: loop exit
PB: predicated region body
PF: predicated region fallthrough
CT: control target
= control target key end

     0   :  { %vm31_vm0 = vcmask 261120   ;;  %vm202_vm1 = vcmask 523264   ;;  %v762_v57 = vmov 0.0   ;;  %s1216_s1 = inlined_call_operand.vmem [shape: bf16[32,64], index: 1, kind: input, shape index: {}]   ;;  %s1217_s0 = inlined_call_operand.vmem [shape: f32[96,32], index: 0, kind: input, shape index: {}]   ;;  %s1218_s2 = inlined_call_operand.vmem [shape: f32[1,64], index: 2, kind: input, shape index: {}]   ;;  %s1219_s3 = inlined_call_operand.vmem [shape: bf16[64,32], index: 3, kind: input, shape index: {}]   ;;  %s1220_s4 = inlined_call_operand.vmem [shape: f32[1,32], index: 4, kind: input, shape index: {}]   ;;  %s1221_s5 = inlined_call_operand.vmem [shape: f32[1,32], index: 5, kind: input, shape index: {}]   ;;  %s1222_s6 = inlined_call_operand.vmem [shape: f32[1,32], index: 6, kind: input, shape index: {}]   ;;  %s1223_s7 = inlined_call_operand.vmem [shape: f32[96,32], index: 7, kind: output, shape index: {}]  }
   0x1   :  { %v695_v0 = vld [vmem:[%s1216_s1 + $0x8] sm:$0xff]  ;;  %v694_v1 = vld [vmem:[%s1216_s1] sm:$0xff]  ;;  %v826_v5 = vld [vmem:[%s1217_s0 + $0x10] sm:$0xff]  ;;  %32 = vst.msk [vmem:[#allocation2] sm:$0xff] %vm31_vm0, %v762_v57 }
   0x2   :  { %107 = vmatpush.bf16.msra.mxu0 %v695_v0  ;;  %v813_v2 = vld [vmem:[%s1217_s0] sm:$0xff]  ;;  %v818_v3 = vld [vmem:[%s1217_s0 + $0x8] sm:$0xff]  ;;  %700 = vmatpush.bf16.msra.mxu3 %v695_v0  ;;  %v831_v6 = vld [vmem:[%s1217_s0 + $0x18] sm:$0xff]  ;;  %33 = vst.msk [vmem:[#allocation2 + $0x8] sm:$0xff] %vm31_vm0, %v762_v57 }
   0x3   :  { %v56_v4 = vpack.c.bf16 %v818_v3, %v813_v2  ;;  %v57_v7 = vpack.c.bf16 %v831_v6, %v826_v5  ;;  %v838_v8 = vld [vmem:[%s1217_s0 + $0x40] sm:$0xff]  ;;  %v843_v9 = vld [vmem:[%s1217_s0 + $0x48] sm:$0xff]  ;;  %v862_v13 = vld [vmem:[%s1217_s0 + $0x50] sm:$0xff]  ;;  %34 = vst.msk [vmem:[#allocation2 + $0x10] sm:$0xff] %vm31_vm0, %v762_v57 }
   0x4   :  { %v60_v10 = vpack.c.bf16 %v843_v9, %v838_v8  ;;  %v852_v11 = vld [vmem:[%s1217_s0 + $0x20] sm:$0xff]  ;;  %v857_v12 = vld [vmem:[%s1217_s0 + $0x28] sm:$0xff]  ;;  %v867_v14 = vld [vmem:[%s1217_s0 + $0x58] sm:$0xff]  ;;  %35 = vst.msk [vmem:[#allocation2 + $0x18] sm:$0xff] %vm31_vm0, %v762_v57 }
   0x5   :  { %v58_v15 = vpack.c.bf16 %v857_v12, %v852_v11  ;;  %v61_v16 = vpack.c.bf16 %v867_v14, %v862_v13  ;;  %v878_v17 = vld [vmem:[%s1217_s0 + $0x30] sm:$0xff]  ;;  %v883_v18 = vld [vmem:[%s1217_s0 + $0x38] sm:$0xff]  ;;  %v697_v22 = vld [vmem:[%s1219_s3 + $0x8] sm:$0xff]  ;;  %36 = vst.msk [vmem:[#allocation2 + $0x20] sm:$0xff] %vm31_vm0, %v762_v57 }
   0x6   :  { %108 = vmatpush.bf16.msra.mxu0 %v694_v1  ;;  %701 = vmatpush.bf16.msra.mxu3 %v694_v1  ;;  %v59_v19 = vpack.c.bf16 %v883_v18, %v878_v17  ;;  %v699_v20 = vld [vmem:[%s1219_s3 + $0x18] sm:$0xff]  ;;  %v698_v21 = vld [vmem:[%s1219_s3 + $0x10] sm:$0xff]  ;;  %v696_v23 = vld [vmem:[%s1219_s3] sm:$0xff]  ;;  %37 = vst.msk [vmem:[#allocation2 + $0x28] sm:$0xff] %vm31_vm0, %v762_v57 }
   0x7   :  { %225 = vmatpush.bf16.msra.mxu1 %v699_v20  ;;  %702 = vmatpush.bf16.msra.mxu2 %v699_v20  ;;  %v903_v25 = vld [vmem:[%s1218_s2] ss:$0 sm:$0xff]  ;;  %38 = vst.msk [vmem:[#allocation2 + $0x30] sm:$0xff] %vm31_vm0, %v762_v57 }
   0x8   :  { %39 = vst.msk [vmem:[#allocation2 + $0x38] sm:$0xff] %vm31_vm0, %v762_v57  ;;  %v939_v20 = vld [vmem:[%s1220_s4] ss:$0 sm:$0xff] }
   0x9   :  { %666 = vmatmul.msk.bf16.vlgmr.msra.gmra.mxu0 %vm31_vm0, %v56_v4  ;;  %670 = vmatmul.msk.bf16.vlgmr.msra.gmra.mxu3 %vm31_vm0, %v60_v10  ;;  %40 = vst.msk [vmem:[#allocation2 + $0x40] sm:$0xff] %vm31_vm0, %v762_v57  ;;  %v152_v10 = vld [vmem:[#allocation2] sm:$0xff] }
   0xa   :  { %41 = vst.msk [vmem:[#allocation2 + $0x48] sm:$0xff] %vm31_vm0, %v762_v57 }
   0xb   :  { %226 = vmatpush.bf16.msra.mxu1 %v698_v21  ;;  %703 = vmatpush.bf16.msra.mxu2 %v698_v21  ;;  %42 = vst.msk [vmem:[#allocation2 + $0x50] sm:$0xff] %vm31_vm0, %v762_v57 }
   0xc   :  { %43 = vst.msk [vmem:[#allocation2 + $0x58] sm:$0xff] %vm31_vm0, %v762_v57 }
   0xf   :  { %227 = vmatpush.bf16.msra.mxu1 %v697_v22  ;;  %704 = vmatpush.bf16.msra.mxu2 %v697_v22 }
  0x13   :  { %228 = vmatpush.bf16.msra.mxu1 %v696_v23  ;;  %705 = vmatpush.bf16.msra.mxu2 %v696_v23 }
  0x19   :  { %667 = vmatmul.msk.bf16.gmra.mxu0 %vm31_vm0, %v57_v7  ;;  %671 = vmatmul.msk.bf16.gmra.mxu3 %vm31_vm0, %v61_v16 }
  0x29   :  { %668 = vmatmul.msk.bf16.gmra.mxu0 %vm31_vm0, %v58_v15 }
  0x39   :  { %669 = vmatmul.msk.bf16.gmra.mxu0 %vm31_vm0, %v59_v19  ;;  %v153_v19 = vld [vmem:[#allocation2 + $0x8] sm:$0xff] }
  0x86   :  { %v110_v24 = vpop.f32.mrf.mxu0 }
  0x87   :  { %v111_v26 = vadd.f32 %v903_v25, %v110_v24 }
  0x89   :  { %712 = vtanh.f32 %v111_v26  ;;  %v154_v26 = vld [vmem:[#allocation2 + $0x10] sm:$0xff] }
  0x8c   :  { %v130_v47 = vpop.f32.mrf.mxu3 }
  0x8d   :  { %v131_v55 = vadd.f32 %v903_v25, %v130_v47 }
  0x8e   :  { %v112_v27 = vpop.f32.mrf.mxu0 }
  0x8f   :  { %v113_v28 = vadd.f32 %v903_v25, %v112_v27  ;;  %v713_v29 = vpop.eup %712 }
  0x91   :  { %714 = vtanh.f32 %v113_v28 }
  0x94   :  { %v132_v51 = vpop.f32.mrf.mxu3 }
  0x95   :  { %v133_v56 = vadd.f32 %v903_v25, %v132_v51 }
  0x96   :  { %v115_v30 = vpop.f32.mrf.mxu0 }
  0x97   :  { %v715_v31 = vpop.eup %714  ;;  %v116_v33 = vadd.f32 %v903_v25, %v115_v30 }
  0x98   :  { %v164_v32 = vpack.c.bf16 %v715_v31, %v713_v29 }
  0x99   :  { %716 = vtanh.f32 %v116_v33  ;;  %v155_v33 = vld [vmem:[#allocation2 + $0x18] sm:$0xff] }
  0x9a   :  { %688 = vmatmul.msk.bf16.vlgmr.msra.gmra.mxu1 %vm202_vm1, %v164_v32 }
  0x9c   :  { %v135_v58 = vpop.f32.mrf.mxu3 }
  0x9d   :  { %v136_v63 = vadd.f32 %v903_v25, %v135_v58 }
  0x9e   :  { %v117_v34 = vpop.f32.mrf.mxu0 }
  0x9f   :  { %v118_v35 = vadd.f32 %v903_v25, %v117_v34  ;;  %v717_v36 = vpop.eup %716 }
  0xa1   :  { %718 = vtanh.f32 %v118_v35 }
  0xa4   :  { %v137_v61 = vpop.f32.mrf.mxu3 }
  0xa5   :  { %v138_v0 = vadd.f32 %v903_v25, %v137_v61 }
  0xa6   :  { %v120_v37 = vpop.f32.mrf.mxu0 }
  0xa7   :  { %v719_v38 = vpop.eup %718  ;;  %v121_v40 = vadd.f32 %v903_v25, %v120_v37 }
  0xa8   :  { %v165_v39 = vpack.c.bf16 %v719_v38, %v717_v36 }
  0xa9   :  { %720 = vtanh.f32 %v121_v40 }
  0xaa   :  { %689 = vmatmul.msk.bf16.gmra.mxu1 %vm202_vm1, %v165_v39  ;;  %v156_v39 = vld [vmem:[#allocation2 + $0x20] sm:$0xff] }
  0xae   :  { %v122_v41 = vpop.f32.mrf.mxu0 }
  0xaf   :  { %v123_v42 = vadd.f32 %v903_v25, %v122_v41  ;;  %v721_v43 = vpop.eup %720 }
  0xb1   :  { %722 = vtanh.f32 %v123_v42 }
  0xb6   :  { %v125_v44 = vpop.f32.mrf.mxu0 }
  0xb7   :  { %v723_v45 = vpop.eup %722  ;;  %v126_v48 = vadd.f32 %v903_v25, %v125_v44 }
  0xb8   :  { %v166_v46 = vpack.c.bf16 %v723_v45, %v721_v43  ;;  %v157_v45 = vld [vmem:[#allocation2 + $0x28] sm:$0xff] }
  0xb9   :  { %724 = vtanh.f32 %v126_v48 }
  0xba   :  { %690 = vmatmul.msk.bf16.gmra.mxu1 %vm202_vm1, %v166_v46 }
  0xbe   :  { %v127_v49 = vpop.f32.mrf.mxu0 }
  0xbf   :  { %v128_v50 = vadd.f32 %v903_v25, %v127_v49  ;;  %v725_v52 = vpop.eup %724 }
  0xc1   :  { %726 = vtanh.f32 %v128_v50 }
  0xc2   :  { %728 = vtanh.f32 %v131_v55 }
  0xc3   :  { %730 = vtanh.f32 %v133_v56 }
  0xc4   :  { %732 = vtanh.f32 %v136_v63 }
  0xc5   :  { %734 = vtanh.f32 %v138_v0 }
  0xc7   :  { %v727_v53 = vpop.eup %726 }
  0xc8   :  { %v167_v54 = vpack.c.bf16 %v727_v53, %v725_v52  ;;  %v729_v59 = vpop.eup %728  ;;  %v158_v53 = vld [vmem:[#allocation2 + $0x30] sm:$0xff] }
  0xc9   :  { %v731_v60 = vpop.eup %730 }
  0xca   :  { %691 = vmatmul.msk.bf16.vlgmr.msra.gmra.mxu2 %vm202_vm1, %v167_v54  ;;  %v168_v62 = vpack.c.bf16 %v731_v60, %v729_v59  ;;  %v733_v1 = vpop.eup %732 }
  0xcb   :  { %v735_v4 = vpop.eup %734 }
  0xcc   :  { %v169_v7 = vpack.c.bf16 %v735_v4, %v733_v1 }
  0xda   :  { %692 = vmatmul.msk.bf16.gmra.mxu2 %vm202_vm1, %v168_v62 }
  0xea   :  { %693 = vmatmul.msk.bf16.gmra.mxu2 %vm202_vm1, %v169_v7 }
 0x117   :  { %v230_v15 = vpop.f32.mrf.mxu1 }
 0x118   :  { %v260_v16 = vadd.f32 %v230_v15, %v152_v10  ;;  %v161_v15 = vld [vmem:[#allocation2 + $0x48] sm:$0xff] }
 0x11a   :  { %272 = vst.msk [vmem:[#allocation2] sm:$0xff] %vm31_vm0, %v260_v16 }
 0x11f   :  { %v232_v21 = vpop.f32.mrf.mxu1 }
 0x120   :  { %v261_v22 = vadd.f32 %v232_v21, %v153_v19 }
 0x121   :  { %v287_v23 = vld [vmem:[#allocation2] sm:$0xff] }
 0x122   :  { %273 = vst.msk [vmem:[#allocation2 + $0x8] sm:$0xff] %vm31_vm0, %v261_v22  ;;  %v303_v24 = vadd.f32 %v939_v20, %v287_v23 }
 0x124   :  { %v944_v25 = vadd.f32 %v303_v24, %v813_v2  ;;  %v162_v24 = vld [vmem:[#allocation2 + $0x50] sm:$0xff] }
 0x126   :  { %v339_v27 = vsel %vm31_vm0, %v944_v25, 0.0 }
 0x127   :  { %340 = vadd.xlane.f32.xlu0 %v339_v27  ;;  %v235_v28 = vpop.f32.mrf.mxu1 }
 0x128   :  { %v262_v29 = vadd.f32 %v235_v28, %v154_v26 }
 0x129   :  { %v288_v30 = vld [vmem:[#allocation2 + $0x8] sm:$0xff] }
 0x12a   :  { %274 = vst.msk [vmem:[#allocation2 + $0x10] sm:$0xff] %vm31_vm0, %v262_v29  ;;  %v304_v31 = vadd.f32 %v939_v20, %v288_v30 }
 0x12c   :  { %v951_v32 = vadd.f32 %v304_v31, %v818_v3  ;;  %v163_v31 = vld [vmem:[#allocation2 + $0x58] sm:$0xff] }
 0x12e   :  { %v342_v2 = vsel %vm31_vm0, %v951_v32, 0.0 }
 0x12f   :  { %343 = vadd.xlane.f32.xlu0 %v342_v2  ;;  %v237_v34 = vpop.f32.mrf.mxu1 }
 0x130   :  { %v263_v35 = vadd.f32 %v237_v34, %v155_v33 }
 0x131   :  { %v289_v36 = vld [vmem:[#allocation2 + $0x10] sm:$0xff] }
 0x132   :  { %275 = vst.msk [vmem:[#allocation2 + $0x18] sm:$0xff] %vm31_vm0, %v263_v35  ;;  %v305_v37 = vadd.f32 %v939_v20, %v289_v36 }
 0x134   :  { %v958_v38 = vadd.f32 %v305_v37, %v826_v5 }
 0x136   :  { %v345_v3 = vsel %vm31_vm0, %v958_v38, 0.0 }
 0x137   :  { %346 = vadd.xlane.f32.xlu1 %v345_v3  ;;  %v240_v40 = vpop.f32.mrf.mxu1 }
 0x138   :  { %v264_v41 = vadd.f32 %v240_v40, %v156_v39  ;;  %v763_v39 = vmov 32.0  }
 0x139   :  { %v290_v42 = vld [vmem:[#allocation2 + $0x18] sm:$0xff]  ;;  %736 = vrcp.f32 %v763_v39 }
 0x13a   :  { %276 = vst.msk [vmem:[#allocation2 + $0x20] sm:$0xff] %vm31_vm0, %v264_v41  ;;  %v306_v43 = vadd.f32 %v939_v20, %v290_v42 }
 0x13c   :  { %v965_v44 = vadd.f32 %v306_v43, %v831_v6 }
 0x13e   :  { %v348_v5 = vsel %vm31_vm0, %v965_v44, 0.0 }
 0x13f   :  { %349 = vadd.xlane.f32.xlu1 %v348_v5  ;;  %v242_v46 = vpop.f32.mrf.mxu1  ;;  %v737_v42 = vpop.eup %736 }
 0x140   :  { %v265_v47 = vadd.f32 %v242_v46, %v157_v45  ;;  %v376_v43 = vmul.f32 32.0, %v737_v42  ;;  %vm380_vm2 = vweird.f32 %v737_v42 }
 0x141   :  { %v291_v48 = vld [vmem:[#allocation2 + $0x20] sm:$0xff] }
 0x142   :  { %277 = vst.msk [vmem:[#allocation2 + $0x28] sm:$0xff] %vm31_vm0, %v265_v47  ;;  %v307_v49 = vadd.f32 %v939_v20, %v291_v48 }
 0x144   :  { %v972_v50 = vadd.f32 %v307_v49, %v852_v11  ;;  %v159_v11 = vld [vmem:[#allocation2 + $0x38] sm:$0xff] }
 0x146   :  { %v351_v51 = vsel %vm31_vm0, %v972_v50, 0.0 }
 0x147   :  { %352 = vadd.xlane.f32.xlu2 %v351_v51 }
 0x149   :  { %v292_v6 = vld [vmem:[#allocation2 + $0x28] sm:$0xff] }
 0x14a   :  { %v308_v52 = vadd.f32 %v939_v20, %v292_v6 }
 0x14c   :  { %v978_v54 = vadd.f32 %v308_v52, %v857_v12  ;;  %v160_v12 = vld [vmem:[#allocation2 + $0x40] sm:$0xff] }
 0x14d   :  { %v245_v55 = vpop.f32.mrf.mxu2 }
 0x14e   :  { %v266_v56 = vadd.f32 %v245_v55, %v158_v53  ;;  %v354_v57 = vsel %vm31_vm0, %v978_v54, 0.0 }
 0x14f   :  { %355 = vadd.xlane.f32.xlu2 %v354_v57 }
 0x150   :  { %278 = vst.msk [vmem:[#allocation2 + $0x30] sm:$0xff] %vm31_vm0, %v266_v56 }
 0x155   :  { %v247_v58 = vpop.f32.mrf.mxu2 }
 0x156   :  { %v267_v59 = vadd.f32 %v247_v58, %v159_v11 }
 0x157   :  { %v293_v60 = vld [vmem:[#allocation2 + $0x30] sm:$0xff] }
 0x158   :  { %279 = vst.msk [vmem:[#allocation2 + $0x38] sm:$0xff] %vm31_vm0, %v267_v59  ;;  %v309_v61 = vadd.f32 %v939_v20, %v293_v60 }
 0x15a   :  { %v986_v62 = vadd.f32 %v309_v61, %v878_v17 }
 0x15c   :  { %v357_v63 = vsel %vm31_vm0, %v986_v62, 0.0 }
 0x15d   :  { %v250_v0 = vpop.f32.mrf.mxu2  ;;  %358 = vadd.xlane.f32.xlu0 %v357_v63 }
 0x15e   :  { %v268_v1 = vadd.f32 %v250_v0, %v160_v12 }
 0x15f   :  { %v294_v4 = vld [vmem:[#allocation2 + $0x38] sm:$0xff] }
 0x160   :  { %280 = vst.msk [vmem:[#allocation2 + $0x40] sm:$0xff] %vm31_vm0, %v268_v1  ;;  %v310_v7 = vadd.f32 %v939_v20, %v294_v4 }
 0x162   :  { %v993_v10 = vadd.f32 %v310_v7, %v883_v18 }
 0x164   :  { %v360_v17 = vsel %vm31_vm0, %v993_v10, 0.0 }
 0x165   :  { %v252_v16 = vpop.f32.mrf.mxu2  ;;  %361 = vadd.xlane.f32.xlu1 %v360_v17 }
 0x166   :  { %v269_v19 = vadd.f32 %v252_v16, %v161_v15 }
 0x167   :  { %v295_v21 = vld [vmem:[#allocation2 + $0x40] sm:$0xff] }
 0x168   :  { %281 = vst.msk [vmem:[#allocation2 + $0x48] sm:$0xff] %vm31_vm0, %v269_v19  ;;  %v311_v22 = vadd.f32 %v939_v20, %v295_v21 }
 0x16a   :  { %v1000_v23 = vadd.f32 %v311_v22, %v838_v8 }
 0x16c   :  { %v363_v18 = vsel %vm31_vm0, %v1000_v23, 0.0 }
 0x16d   :  { %v255_v26 = vpop.f32.mrf.mxu2  ;;  %364 = vadd.xlane.f32.xlu2 %v363_v18 }
 0x16e   :  { %v270_v27 = vadd.f32 %v255_v26, %v162_v24 }
 0x16f   :  { %v296_v28 = vld [vmem:[#allocation2 + $0x48] sm:$0xff] }
 0x170   :  { %282 = vst.msk [vmem:[#allocation2 + $0x50] sm:$0xff] %vm31_vm0, %v270_v27  ;;  %v312_v29 = vadd.f32 %v939_v20, %v296_v28 }
 0x172   :  { %v1007_v30 = vadd.f32 %v312_v29, %v843_v9 }
 0x174   :  { %v366_v8 = vsel %vm31_vm0, %v1007_v30, 0.0 }
 0x175   :  { %v257_v33 = vpop.f32.mrf.mxu2  ;;  %367 = vadd.xlane.f32.xlu0 %v366_v8 }
 0x176   :  { %v271_v2 = vadd.f32 %v257_v33, %v163_v31 }
 0x177   :  { %v297_v34 = vld [vmem:[#allocation2 + $0x50] sm:$0xff] }
 0x178   :  { %283 = vst.msk [vmem:[#allocation2 + $0x58] sm:$0xff] %vm31_vm0, %v271_v2  ;;  %v313_v35 = vadd.f32 %v939_v20, %v297_v34 }
 0x17a   :  { %v1014_v36 = vadd.f32 %v313_v35, %v862_v13  ;;  %v377_v13 = vsub.f32 1.0, %v376_v43 }
 0x17c   :  { %v369_v37 = vsel %vm31_vm0, %v1014_v36, 0.0  ;;  %v378_v45 = vmul.f32 %v737_v42, %v377_v13 }
 0x17d   :  { %370 = vadd.xlane.f32.xlu1 %v369_v37 }
 0x17e   :  { %v379_v5 = vadd.f32 %v737_v42, %v378_v45 }
 0x17f   :  { %v298_v9 = vld [vmem:[#allocation2 + $0x58] sm:$0xff] }
 0x180   :  { %v314_v3 = vadd.f32 %v939_v20, %v298_v9  ;;  %v1024_v46 = vsel %vm380_vm2, %v737_v42, %v379_v5 }
 0x182   :  { %v1020_v40 = vadd.f32 %v314_v3, %v867_v14 }
 0x184   :  { %v372_v41 = vsel %vm31_vm0, %v1020_v40, 0.0 }
 0x185   :  { %373 = vadd.xlane.f32.xlu2 %v372_v41 }
 0x19a   :  { %v341_v47 = vpop.xlane.xlu0 %340 }
 0x19b   :  { %v382_v48 = vmul.f32 %v1024_v46, %v341_v47 }
 0x19d   :  { %v1028_v20 = vsub.f32 %v944_v25, %v382_v48 }
 0x19f   :  { %v406_v14 = vmul.f32 %v1028_v20, %v1028_v20 }
 0x1a1   :  { %v418_v49 = vsel %vm31_vm0, %v406_v14, 0.0 }
 0x1a2   :  { %419 = vadd.xlane.f32.xlu0 %v418_v49  ;;  %v344_v51 = vpop.xlane.xlu0 %343 }
 0x1a3   :  { %v383_v6 = vmul.f32 %v1024_v46, %v344_v51 }
 0x1a5   :  { %v1035_v52 = vsub.f32 %v951_v32, %v383_v6 }
 0x1a7   :  { %v407_v53 = vmul.f32 %v1035_v52, %v1035_v52 }
 0x1a9   :  { %v421_v55 = vsel %vm31_vm0, %v407_v53, 0.0 }
 0x1aa   :  { %v347_v56 = vpop.xlane.xlu1 %346  ;;  %422 = vadd.xlane.f32.xlu1 %v421_v55 }
 0x1ab   :  { %v384_v25 = vmul.f32 %v1024_v46, %v347_v56 }
 0x1ad   :  { %v1042_v57 = vsub.f32 %v958_v38, %v384_v25 }
 0x1af   :  { %v408_v11 = vmul.f32 %v1042_v57, %v1042_v57 }
 0x1b1   :  { %v424_v58 = vsel %vm31_vm0, %v408_v11, 0.0 }
 0x1b2   :  { %v350_v59 = vpop.xlane.xlu1 %349  ;;  %425 = vadd.xlane.f32.xlu2 %v424_v58 }
 0x1b3   :  { %v385_v32 = vmul.f32 %v1024_v46, %v350_v59 }
 0x1b5   :  { %v1049_v60 = vsub.f32 %v965_v44, %v385_v32 }
 0x1b7   :  { %v409_v61 = vmul.f32 %v1049_v60, %v1049_v60 }
 0x1b9   :  { %v427_v12 = vsel %vm31_vm0, %v409_v61, 0.0  ;;  %v1116_v61 = vld [vmem:[%s1221_s5] ss:$0 sm:$0xff] }
 0x1ba   :  { %428 = vadd.xlane.f32.xlu0 %v427_v12  ;;  %v353_v38 = vpop.xlane.xlu2 %352 }
 0x1bb   :  { %v386_v63 = vmul.f32 %v1024_v46, %v353_v38 }
 0x1bd   :  { %v1056_v0 = vsub.f32 %v972_v50, %v386_v63  ;;  %v1121_v63 = vld [vmem:[%s1222_s6] ss:$0 sm:$0xff] }
 0x1bf   :  { %v410_v1 = vmul.f32 %v1056_v0, %v1056_v0 }
 0x1c1   :  { %v430_v4 = vsel %vm31_vm0, %v410_v1, 0.0 }
 0x1c2   :  { %431 = vadd.xlane.f32.xlu1 %v430_v4  ;;  %v356_v44 = vpop.xlane.xlu2 %355 }
 0x1c3   :  { %v387_v7 = vmul.f32 %v1024_v46, %v356_v44 }
 0x1c5   :  { %v1063_v15 = vsub.f32 %v978_v54, %v387_v7 }
 0x1c7   :  { %v411_v17 = vmul.f32 %v1063_v15, %v1063_v15 }
 0x1c9   :  { %v433_v16 = vsel %vm31_vm0, %v411_v17, 0.0 }
 0x1ca   :  { %434 = vadd.xlane.f32.xlu2 %v433_v16 }
 0x1d0   :  { %v359_v50 = vpop.xlane.xlu0 %358 }
 0x1d1   :  { %v388_v19 = vmul.f32 %v1024_v46, %v359_v50 }
 0x1d3   :  { %v1070_v21 = vsub.f32 %v986_v62, %v388_v19 }
 0x1d5   :  { %v412_v22 = vmul.f32 %v1070_v21, %v1070_v21 }
 0x1d7   :  { %v436_v24 = vsel %vm31_vm0, %v412_v22, 0.0 }
 0x1d8   :  { %437 = vadd.xlane.f32.xlu0 %v436_v24  ;;  %v362_v54 = vpop.xlane.xlu1 %361 }
 0x1d9   :  { %v389_v18 = vmul.f32 %v1024_v46, %v362_v54 }
 0x1db   :  { %v1077_v26 = vsub.f32 %v993_v10, %v389_v18 }
 0x1dd   :  { %v413_v27 = vmul.f32 %v1077_v26, %v1077_v26 }
 0x1df   :  { %v439_v28 = vsel %vm31_vm0, %v413_v27, 0.0 }
 0x1e0   :  { %440 = vadd.xlane.f32.xlu1 %v439_v28  ;;  %v365_v62 = vpop.xlane.xlu2 %364 }
 0x1e1   :  { %v390_v29 = vmul.f32 %v1024_v46, %v365_v62 }
 0x1e3   :  { %v1084_v31 = vsub.f32 %v1000_v23, %v390_v29 }
 0x1e5   :  { %v414_v8 = vmul.f32 %v1084_v31, %v1084_v31 }
 0x1e7   :  { %v442_v33 = vsel %vm31_vm0, %v414_v8, 0.0 }
 0x1e8   :  { %v368_v2 = vpop.xlane.xlu0 %367  ;;  %443 = vadd.xlane.f32.xlu2 %v442_v33 }
 0x1e9   :  { %v391_v10 = vmul.f32 %v1024_v46, %v368_v2 }
 0x1eb   :  { %v1091_v34 = vsub.f32 %v1007_v30, %v391_v10 }
 0x1ed   :  { %v415_v35 = vmul.f32 %v1091_v34, %v1091_v34 }
 0x1ef   :  { %v445_v37 = vsel %vm31_vm0, %v415_v35, 0.0 }
 0x1f0   :  { %446 = vadd.xlane.f32.xlu0 %v445_v37  ;;  %v371_v23 = vpop.xlane.xlu1 %370 }
 0x1f1   :  { %v392_v9 = vmul.f32 %v1024_v46, %v371_v23 }
 0x1f3   :  { %v1098_v39 = vsub.f32 %v1014_v36, %v392_v9 }
 0x1f5   :  { %v416_v3 = vmul.f32 %v1098_v39, %v1098_v39 }
 0x1f7   :  { %v448_v41 = vsel %vm31_vm0, %v416_v3, 0.0 }
 0x1f8   :  { %449 = vadd.xlane.f32.xlu1 %v448_v41  ;;  %v374_v30 = vpop.xlane.xlu2 %373 }
 0x1f9   :  { %v393_v42 = vmul.f32 %v1024_v46, %v374_v30 }
 0x1fb   :  { %v1105_v43 = vsub.f32 %v1020_v40, %v393_v42 }
 0x1fd   :  { %v417_v13 = vmul.f32 %v1105_v43, %v1105_v43 }
 0x1ff   :  { %v451_v45 = vsel %vm31_vm0, %v417_v13, 0.0 }
 0x200   :  { %452 = vadd.xlane.f32.xlu2 %v451_v45 }
 0x215   :  { %v420_v36 = vpop.xlane.xlu0 %419 }
 0x216   :  { %v454_v5 = vmul.f32 %v420_v36, %v1024_v46 }
 0x218   :  { %v466_v47 = vadd.f32 1e-05, %v454_v5 }
 0x21a   :  { %738 = vrsqrt.f32 %v466_v47  ;;  %vm484_vm4 = vweird.f32 %v466_v47 }
 0x21d   :  { %v423_v48 = vpop.xlane.xlu1 %422 }
 0x21e   :  { %v455_v14 = vmul.f32 %v423_v48, %v1024_v46 }
 0x220   :  { %v739_v49 = vpop.eup %738  ;;  %v467_v51 = vadd.f32 1e-05, %v455_v14 }
 0x221   :  { %v479_v6 = vmul.f32 %v739_v49, %v466_v47  ;;  %vm485_vm3 = vweird.f32 %v739_v49 }
 0x222   :  { %740 = vrsqrt.f32 %v467_v51  ;;  %vm486_vm5 = vmor %vm484_vm4, %vm485_vm3  ;;  %vm494_vm7 = vweird.f32 %v467_v51 }
 0x223   :  { %v480_v40 = vmul.f32 %v739_v49, %v479_v6 }
 0x225   :  { %v481_v53 = vmul.f32 0.5, %v480_v40  ;;  %v426_v55 = vpop.xlane.xlu2 %425 }
 0x226   :  { %v456_v56 = vmul.f32 %v426_v55, %v1024_v46 }
 0x227   :  { %v482_v25 = vsub.f32 1.5, %v481_v53 }
 0x228   :  { %v741_v11 = vpop.eup %740  ;;  %v468_v58 = vadd.f32 1e-05, %v456_v56 }
 0x229   :  { %v483_v59 = vmul.f32 %v739_v49, %v482_v25  ;;  %v489_v32 = vmul.f32 %v741_v11, %v467_v51  ;;  %vm495_vm6 = vweird.f32 %v741_v11 }
 0x22a   :  { %742 = vrsqrt.f32 %v468_v58  ;;  %vm496_vm8 = vmor %vm494_vm7, %vm495_vm6  ;;  %vm504_vm10 = vweird.f32 %v468_v58 }
 0x22b   :  { %v487_v12 = vsel %vm486_vm5, %v739_v49, %v483_v59  ;;  %v490_v38 = vmul.f32 %v741_v11, %v489_v32 }
 0x22c   :  { %v598_v1 = vmul.f32 %v487_v12, %v1028_v20 }
 0x22d   :  { %v491_v4 = vmul.f32 0.5, %v490_v38  ;;  %v429_v44 = vpop.xlane.xlu0 %428 }
 0x22e   :  { %v614_v7 = vmul.f32 %v1116_v61, %v598_v1  ;;  %v457_v17 = vmul.f32 %v429_v44, %v1024_v46 }
 0x22f   :  { %v492_v16 = vsub.f32 1.5, %v491_v4 }
 0x230   :  { %v743_v50 = vpop.eup %742  ;;  %v630_v19 = vadd.f32 %v1121_v63, %v614_v7  ;;  %v469_v22 = vadd.f32 1e-05, %v457_v17 }
 0x231   :  { %v493_v24 = vmul.f32 %v741_v11, %v492_v16  ;;  %v499_v54 = vmul.f32 %v743_v50, %v468_v58  ;;  %vm505_vm9 = vweird.f32 %v743_v50 }
 0x232   :  { %642 = vst.msk [vmem:[%s1223_s7] sm:$0xff] %vm31_vm0, %v630_v19  ;;  %744 = vrsqrt.f32 %v469_v22  ;;  %vm506_vm11 = vmor %vm504_vm10, %vm505_vm9  ;;  %vm514_vm13 = vweird.f32 %v469_v22 }
 0x233   :  { %v497_v20 = vsel %vm496_vm8, %v741_v11, %v493_v24  ;;  %v500_v18 = vmul.f32 %v743_v50, %v499_v54 }
 0x234   :  { %v599_v27 = vmul.f32 %v497_v20, %v1035_v52 }
 0x235   :  { %v501_v28 = vmul.f32 0.5, %v500_v18  ;;  %v432_v62 = vpop.xlane.xlu1 %431 }
 0x236   :  { %v615_v29 = vmul.f32 %v1116_v61, %v599_v27  ;;  %v458_v8 = vmul.f32 %v432_v62, %v1024_v46 }
 0x237   :  { %v502_v33 = vsub.f32 1.5, %v501_v28 }
 0x238   :  { %v745_v2 = vpop.eup %744  ;;  %v631_v10 = vadd.f32 %v1121_v63, %v615_v29  ;;  %v470_v35 = vadd.f32 1e-05, %v458_v8 }
 0x239   :  { %v503_v37 = vmul.f32 %v743_v50, %v502_v33  ;;  %v509_v23 = vmul.f32 %v745_v2, %v469_v22  ;;  %vm515_vm12 = vweird.f32 %v745_v2 }
 0x23a   :  { %643 = vst.msk [vmem:[%s1223_s7 + $0x8] sm:$0xff] %vm31_vm0, %v631_v10  ;;  %746 = vrsqrt.f32 %v470_v35  ;;  %vm516_vm14 = vmor %vm514_vm13, %vm515_vm12  ;;  %vm524_vm1 = vweird.f32 %v470_v35 }
 0x23b   :  { %v507_v52 = vsel %vm506_vm11, %v743_v50, %v503_v37  ;;  %v510_v9 = vmul.f32 %v745_v2, %v509_v23 }
 0x23c   :  { %v600_v3 = vmul.f32 %v507_v52, %v1042_v57 }
 0x23d   :  { %v511_v41 = vmul.f32 0.5, %v510_v9  ;;  %v435_v30 = vpop.xlane.xlu2 %434 }
 0x23e   :  { %v616_v42 = vmul.f32 %v1116_v61, %v600_v3  ;;  %v459_v13 = vmul.f32 %v435_v30, %v1024_v46 }
 0x23f   :  { %v512_v45 = vsub.f32 1.5, %v511_v41 }
 0x240   :  { %v747_v36 = vpop.eup %746  ;;  %v632_v5 = vadd.f32 %v1121_v63, %v616_v42  ;;  %v471_v47 = vadd.f32 1e-05, %v459_v13 }
 0x241   :  { %v513_v48 = vmul.f32 %v745_v2, %v512_v45  ;;  %v519_v14 = vmul.f32 %v747_v36, %v470_v35  ;;  %vm525_vm15 = vweird.f32 %v747_v36 }
 0x242   :  { %644 = vst.msk [vmem:[%s1223_s7 + $0x10] sm:$0xff] %vm31_vm0, %v632_v5  ;;  %748 = vrsqrt.f32 %v471_v47  ;;  %vm526_vm2 = vmor %vm524_vm1, %vm525_vm15  ;;  %vm534_vm4 = vweird.f32 %v471_v47 }
 0x243   :  { %v517_v57 = vsel %vm516_vm14, %v745_v2, %v513_v48  ;;  %v520_v49 = vmul.f32 %v747_v36, %v519_v14 }
 0x244   :  { %v601_v51 = vmul.f32 %v517_v57, %v1049_v60 }
 0x245   :  { %v521_v6 = vmul.f32 0.5, %v520_v49 }
 0x246   :  { %v617_v40 = vmul.f32 %v1116_v61, %v601_v51 }
 0x247   :  { %v522_v53 = vsub.f32 1.5, %v521_v6 }
 0x248   :  { %v749_v55 = vpop.eup %748  ;;  %v633_v56 = vadd.f32 %v1121_v63, %v617_v40 }
 0x249   :  { %v523_v25 = vmul.f32 %v747_v36, %v522_v53  ;;  %v529_v11 = vmul.f32 %v749_v55, %v471_v47  ;;  %vm535_vm3 = vweird.f32 %v749_v55 }
 0x24a   :  { %645 = vst.msk [vmem:[%s1223_s7 + $0x18] sm:$0xff] %vm31_vm0, %v633_v56  ;;  %vm536_vm5 = vmor %vm534_vm4, %vm535_vm3 }
 0x24b   :  { %v527_v58 = vsel %vm526_vm2, %v747_v36, %v523_v25  ;;  %v530_v59 = vmul.f32 %v749_v55, %v529_v11  ;;  %v438_v60 = vpop.xlane.xlu0 %437 }
 0x24c   :  { %v602_v32 = vmul.f32 %v527_v58, %v1056_v0  ;;  %v460_v12 = vmul.f32 %v438_v60, %v1024_v46 }
 0x24d   :  { %v531_v38 = vmul.f32 0.5, %v530_v59 }
 0x24e   :  { %v618_v1 = vmul.f32 %v1116_v61, %v602_v32  ;;  %v472_v4 = vadd.f32 1e-05, %v460_v12 }
 0x24f   :  { %v532_v44 = vsub.f32 1.5, %v531_v38 }
 0x250   :  { %v634_v7 = vadd.f32 %v1121_v63, %v618_v1  ;;  %750 = vrsqrt.f32 %v472_v4  ;;  %vm544_vm7 = vweird.f32 %v472_v4 }
 0x251   :  { %v533_v17 = vmul.f32 %v749_v55, %v532_v44 }
 0x252   :  { %646 = vst.msk [vmem:[%s1223_s7 + $0x20] sm:$0xff] %vm31_vm0, %v634_v7 }
 0x253   :  { %v537_v0 = vsel %vm536_vm5, %v749_v55, %v533_v17  ;;  %v441_v16 = vpop.xlane.xlu1 %440 }
 0x254   :  { %v603_v50 = vmul.f32 %v537_v0, %v1063_v15  ;;  %v461_v19 = vmul.f32 %v441_v16, %v1024_v46 }
 0x256   :  { %v751_v22 = vpop.eup %750  ;;  %v619_v24 = vmul.f32 %v1116_v61, %v603_v50  ;;  %v473_v54 = vadd.f32 1e-05, %v461_v19 }
 0x257   :  { %v539_v20 = vmul.f32 %v751_v22, %v472_v4  ;;  %vm545_vm6 = vweird.f32 %v751_v22 }
 0x258   :  { %v635_v18 = vadd.f32 %v1121_v63, %v619_v24  ;;  %752 = vrsqrt.f32 %v473_v54  ;;  %vm546_vm8 = vmor %vm544_vm7, %vm545_vm6  ;;  %vm554_vm10 = vweird.f32 %v473_v54 }
 0x259   :  { %v540_v27 = vmul.f32 %v751_v22, %v539_v20 }
 0x25a   :  { %647 = vst.msk [vmem:[%s1223_s7 + $0x28] sm:$0xff] %vm31_vm0, %v635_v18 }
 0x25b   :  { %v541_v28 = vmul.f32 0.5, %v540_v27  ;;  %v444_v62 = vpop.xlane.xlu2 %443 }
 0x25c   :  { %v462_v15 = vmul.f32 %v444_v62, %v1024_v46 }
 0x25d   :  { %v542_v29 = vsub.f32 1.5, %v541_v28 }
 0x25e   :  { %v753_v8 = vpop.eup %752  ;;  %v474_v33 = vadd.f32 1e-05, %v462_v15 }
 0x25f   :  { %v543_v2 = vmul.f32 %v751_v22, %v542_v29  ;;  %v549_v10 = vmul.f32 %v753_v8, %v473_v54  ;;  %vm555_vm9 = vweird.f32 %v753_v8 }
 0x260   :  { %754 = vrsqrt.f32 %v474_v33  ;;  %vm556_vm11 = vmor %vm554_vm10, %vm555_vm9  ;;  %vm564_vm13 = vweird.f32 %v474_v33 }
 0x261   :  { %v547_v35 = vsel %vm546_vm8, %v751_v22, %v543_v2  ;;  %v550_v37 = vmul.f32 %v753_v8, %v549_v10 }
 0x262   :  { %v604_v23 = vmul.f32 %v547_v35, %v1070_v21 }
 0x263   :  { %v551_v52 = vmul.f32 0.5, %v550_v37  ;;  %v447_v9 = vpop.xlane.xlu0 %446 }
 0x264   :  { %v620_v3 = vmul.f32 %v1116_v61, %v604_v23  ;;  %v463_v41 = vmul.f32 %v447_v9, %v1024_v46 }
 0x265   :  { %v552_v30 = vsub.f32 1.5, %v551_v52 }
 0x266   :  { %v755_v42 = vpop.eup %754  ;;  %v636_v13 = vadd.f32 %v1121_v63, %v620_v3  ;;  %v475_v45 = vadd.f32 1e-05, %v463_v41 }
 0x267   :  { %v553_v36 = vmul.f32 %v753_v8, %v552_v30  ;;  %v559_v5 = vmul.f32 %v755_v42, %v474_v33  ;;  %vm565_vm12 = vweird.f32 %v755_v42 }
 0x268   :  { %648 = vst.msk [vmem:[%s1223_s7 + $0x30] sm:$0xff] %vm31_vm0, %v636_v13  ;;  %756 = vrsqrt.f32 %v475_v45  ;;  %vm566_vm14 = vmor %vm564_vm13, %vm565_vm12  ;;  %vm574_vm1 = vweird.f32 %v475_v45 }
 0x269   :  { %v557_v21 = vsel %vm556_vm11, %v753_v8, %v553_v36  ;;  %v560_v47 = vmul.f32 %v755_v42, %v559_v5 }
 0x26a   :  { %v605_v48 = vmul.f32 %v557_v21, %v1077_v26 }
 0x26b   :  { %v561_v14 = vmul.f32 0.5, %v560_v47  ;;  %v450_v57 = vpop.xlane.xlu1 %449 }
 0x26c   :  { %v621_v49 = vmul.f32 %v1116_v61, %v605_v48  ;;  %v464_v51 = vmul.f32 %v450_v57, %v1024_v46 }
 0x26d   :  { %v562_v6 = vsub.f32 1.5, %v561_v14 }
 0x26e   :  { %v757_v40 = vpop.eup %756  ;;  %v637_v53 = vadd.f32 %v1121_v63, %v621_v49  ;;  %v476_v55 = vadd.f32 1e-05, %v464_v51 }
 0x26f   :  { %v563_v56 = vmul.f32 %v755_v42, %v562_v6  ;;  %v569_v25 = vmul.f32 %v757_v40, %v475_v45  ;;  %vm575_vm15 = vweird.f32 %v757_v40 }
 0x270   :  { %649 = vst.msk [vmem:[%s1223_s7 + $0x38] sm:$0xff] %vm31_vm0, %v637_v53  ;;  %758 = vrsqrt.f32 %v476_v55  ;;  %vm576_vm2 = vmor %vm574_vm1, %vm575_vm15  ;;  %vm584_vm4 = vweird.f32 %v476_v55 }
 0x271   :  { %v567_v26 = vsel %vm566_vm14, %v755_v42, %v563_v56  ;;  %v570_v11 = vmul.f32 %v757_v40, %v569_v25 }
 0x272   :  { %v606_v58 = vmul.f32 %v567_v26, %v1084_v31 }
 0x273   :  { %v571_v59 = vmul.f32 0.5, %v570_v11  ;;  %v453_v60 = vpop.xlane.xlu2 %452 }
 0x274   :  { %v622_v32 = vmul.f32 %v1116_v61, %v606_v58  ;;  %v465_v12 = vmul.f32 %v453_v60, %v1024_v46 }
 0x275   :  { %v572_v38 = vsub.f32 1.5, %v571_v59 }
 0x276   :  { %v759_v1 = vpop.eup %758  ;;  %v638_v4 = vadd.f32 %v1121_v63, %v622_v32  ;;  %v477_v44 = vadd.f32 1e-05, %v465_v12 }
 0x277   :  { %v573_v7 = vmul.f32 %v757_v40, %v572_v38  ;;  %v579_v17 = vmul.f32 %v759_v1, %v476_v55  ;;  %vm585_vm3 = vweird.f32 %v759_v1 }
 0x278   :  { %650 = vst.msk [vmem:[%s1223_s7 + $0x40] sm:$0xff] %vm31_vm0, %v638_v4  ;;  %760 = vrsqrt.f32 %v477_v44  ;;  %vm586_vm5 = vmor %vm584_vm4, %vm585_vm3  ;;  %vm594_vm7 = vweird.f32 %v477_v44 }
 0x279   :  { %v577_v31 = vsel %vm576_vm2, %v757_v40, %v573_v7  ;;  %v580_v0 = vmul.f32 %v759_v1, %v579_v17 }
 0x27a   :  { %v607_v46 = vmul.f32 %v577_v31, %v1091_v34 }
 0x27b   :  { %v581_v16 = vmul.f32 0.5, %v580_v0 }
 0x27c   :  { %v623_v50 = vmul.f32 %v1116_v61, %v607_v46 }
 0x27d   :  { %v582_v19 = vsub.f32 1.5, %v581_v16 }
 0x27e   :  { %v761_v22 = vpop.eup %760  ;;  %v639_v24 = vadd.f32 %v1121_v63, %v623_v50 }
 0x27f   :  { %v583_v54 = vmul.f32 %v759_v1, %v582_v19  ;;  %v589_v20 = vmul.f32 %v761_v22, %v477_v44  ;;  %vm595_vm6 = vweird.f32 %v761_v22 }
 0x280   :  { %651 = vst.msk [vmem:[%s1223_s7 + $0x48] sm:$0xff] %vm31_vm0, %v639_v24  ;;  %vm596_vm8 = vmor %vm594_vm7, %vm595_vm6 }
 0x281   :  { %v587_v18 = vsel %vm586_vm5, %v759_v1, %v583_v54  ;;  %v590_v27 = vmul.f32 %v761_v22, %v589_v20 }
 0x282   :  { %v608_v34 = vmul.f32 %v587_v18, %v1098_v39 }
 0x283   :  { %v591_v28 = vmul.f32 0.5, %v590_v27 }
 0x284   :  { %v624_v62 = vmul.f32 %v1116_v61, %v608_v34 }
 0x285   :  { %v592_v15 = vsub.f32 1.5, %v591_v28 }
 0x286   :  { %v640_v29 = vadd.f32 %v1121_v63, %v624_v62 }
 0x287   :  { %v593_v8 = vmul.f32 %v761_v22, %v592_v15 }
 0x288   :  { %652 = vst.msk [vmem:[%s1223_s7 + $0x50] sm:$0xff] %vm31_vm0, %v640_v29 }
 0x289   :  { %v597_v33 = vsel %vm596_vm8, %v761_v22, %v593_v8 }
 0x28a   :  { %v609_v2 = vmul.f32 %v597_v33, %v1105_v43 }
 0x28c   :  { %v625_v39 = vmul.f32 %v1116_v61, %v609_v2 }
 0x28e   :  { %v641_v10 = vadd.f32 %v1121_v63, %v625_v39 }
 0x290   :  { %653 = vst.msk [vmem:[%s1223_s7 + $0x58] sm:$0xff] %vm31_vm0, %v641_v10 }

// kernel: transformer_forward.23
= control target key start
LH: loop header
LB: loop body
LE: loop exit
PB: predicated region body
PF: predicated region fallthrough
CT: control target
= control target key end

     0   :  { %vm41_vm0 = vcmask 261120   ;;  %s149_s1 = inlined_call_operand.vmem [shape: bf16[32,32], index: 1, kind: input, shape index: {}]   ;;  %s150_s0 = inlined_call_operand.vmem [shape: f32[32,32], index: 0, kind: input, shape index: {}]   ;;  %s151_s2 = inlined_call_operand.vmem [shape: f32[1,32], index: 2, kind: input, shape index: {}]   ;;  %s152_s3 = inlined_call_operand.vmem [shape: f32[32,32], index: 3, kind: output, shape index: {}]  }
   0x1   :  { %v86_v0 = vld [vmem:[%s149_s1 + $0x8] sm:$0xff]  ;;  %v85_v1 = vld [vmem:[%s149_s1] sm:$0xff]  ;;  %v17_v4 = vld [vmem:[%s150_s0 + $0x10] sm:$0xff] }
   0x2   :  { %v15_v2 = vld [vmem:[%s150_s0] sm:$0xff]  ;;  %v16_v3 = vld [vmem:[%s150_s0 + $0x8] sm:$0xff]  ;;  %54 = vmatpush.bf16.msra.mxu0 %v86_v0  ;;  %87 = vmatpush.bf16.msra.mxu1 %v86_v0  ;;  %v18_v5 = vld [vmem:[%s150_s0 + $0x18] sm:$0xff] }
   0x3   :  { %v19_v6 = vpack.c.bf16 %v16_v3, %v15_v2  ;;  %v20_v7 = vpack.c.bf16 %v18_v5, %v17_v4  ;;  %v89_v8 = vld [vmem:[%s151_s2] ss:$0 sm:$0xff] }
   0x6   :  { %55 = vmatpush.bf16.msra.mxu0 %v85_v1  ;;  %88 = vmatpush.bf16.msra.mxu1 %v85_v1 }
   0x9   :  { %83 = vmatmul.msk.bf16.vlgmr.msra.gmra.mxu0 %vm41_vm0, %v19_v6  ;;  %84 = vmatmul.msk.bf16.vlgmr.msra.gmra.mxu1 %vm41_vm0, %v20_v7 }
  0x86   :  { %v57_v9 = vpop.f32.mrf.mxu0  ;;  %v62_v10 = vpop.f32.mrf.mxu1 }
  0x87   :  { %v58_v11 = vadd.f32 %v89_v8, %v57_v9  ;;  %v63_v12 = vadd.f32 %v89_v8, %v62_v10 }
  0x89   :  { %67 = vst.msk [vmem:[%s152_s3] sm:$0xff] %vm41_vm0, %v58_v11 }
  0x8a   :  { %69 = vst.msk [vmem:[%s152_s3 + $0x10] sm:$0xff] %vm41_vm0, %v63_v12 }
  0x8e   :  { %v59_v13 = vpop.f32.mrf.mxu0  ;;  %v64_v14 = vpop.f32.mrf.mxu1 }
  0x8f   :  { %v60_v15 = vadd.f32 %v89_v8, %v59_v13  ;;  %v65_v16 = vadd.f32 %v89_v8, %v64_v14 }
  0x91   :  { %68 = vst.msk [vmem:[%s152_s3 + $0x8] sm:$0xff] %vm41_vm0, %v60_v15 }
  0x92   :  { %70 = vst.msk [vmem:[%s152_s3 + $0x18] sm:$0xff] %vm41_vm0, %v65_v16 }

// kernel: transformer_forward.33
= control target key start
LH: loop header
LB: loop body
LE: loop exit
PB: predicated region body
PF: predicated region fallthrough
CT: control target
= control target key end

     0   :  { %vm41_vm0 = vcmask 261120   ;;  %vm67_vm1 = vcmask 64512   ;;  %s144_s1 = inlined_call_operand.vmem [shape: bf16[32,8], index: 1, kind: input, shape index: {}]   ;;  %s145_s0 = inlined_call_operand.vmem [shape: f32[32,32], index: 0, kind: input, shape index: {}]   ;;  %s146_s2 = inlined_call_operand.vmem [shape: f32[1,8], index: 2, kind: input, shape index: {}]   ;;  %s147_s3 = inlined_call_operand.vmem [shape: f32[32,8], index: 3, kind: output, shape index: {}]  }
   0x1   :  { %v87_v0 = vld [vmem:[%s144_s1 + $0x8] sm:$0xff]  ;;  %v86_v1 = vld [vmem:[%s144_s1] sm:$0xff]  ;;  %v17_v4 = vld [vmem:[%s145_s0 + $0x10] sm:$0xff] }
   0x2   :  { %v15_v2 = vld [vmem:[%s145_s0] sm:$0xff]  ;;  %v16_v3 = vld [vmem:[%s145_s0 + $0x8] sm:$0xff]  ;;  %54 = vmatpush.bf16.msra.mxu0 %v87_v0  ;;  %88 = vmatpush.bf16.msra.mxu1 %v87_v0  ;;  %v18_v5 = vld [vmem:[%s145_s0 + $0x18] sm:$0xff] }
   0x3   :  { %v19_v6 = vpack.c.bf16 %v16_v3, %v15_v2  ;;  %v20_v7 = vpack.c.bf16 %v18_v5, %v17_v4  ;;  %v90_v8 = vld [vmem:[%s146_s2] ss:$0 sm:$0xff] }
   0x6   :  { %55 = vmatpush.bf16.msra.mxu0 %v86_v1  ;;  %89 = vmatpush.bf16.msra.mxu1 %v86_v1 }
   0x9   :  { %84 = vmatmul.msk.bf16.vlgmr.msra.gmra.mxu0 %vm41_vm0, %v19_v6  ;;  %85 = vmatmul.msk.bf16.vlgmr.msra.gmra.mxu1 %vm41_vm0, %v20_v7 }
  0x86   :  { %v57_v9 = vpop.f32.mrf.mxu0  ;;  %v62_v10 = vpop.f32.mrf.mxu1 }
  0x87   :  { %v58_v11 = vadd.f32 %v90_v8, %v57_v9  ;;  %v63_v12 = vadd.f32 %v90_v8, %v62_v10 }
  0x89   :  { %68 = vst.msk [vmem:[%s147_s3] sm:$0xff] %vm67_vm1, %v58_v11 }
  0x8a   :  { %70 = vst.msk [vmem:[%s147_s3 + $0x10] sm:$0xff] %vm67_vm1, %v63_v12 }
  0x8e   :  { %v59_v13 = vpop.f32.mrf.mxu0  ;;  %v64_v14 = vpop.f32.mrf.mxu1 }
  0x8f   :  { %v60_v15 = vadd.f32 %v90_v8, %v59_v13  ;;  %v65_v16 = vadd.f32 %v90_v8, %v64_v14 }
  0x91   :  { %69 = vst.msk [vmem:[%s147_s3 + $0x8] sm:$0xff] %vm67_vm1, %v60_v15 }
  0x92   :  { %71 = vst.msk [vmem:[%s147_s3 + $0x18] sm:$0xff] %vm67_vm1, %v65_v16 }

// kernel: transformer_forward.25
= control target key start
LH: loop header
LB: loop body
LE: loop exit
PB: predicated region body
PF: predicated region fallthrough
CT: control target
= control target key end

     0   :  { %vm50_vm0 = vcmask 261120   ;;  %v231_v29 = vmov 32.0   ;;  %s347_s1 = inlined_call_operand.vmem [shape: bf16[32,32], index: 1, kind: input, shape index: {}]   ;;  %s348_s0 = inlined_call_operand.vmem [shape: f32[32,32], index: 0, kind: input, shape index: {}]   ;;  %s349_s2 = inlined_call_operand.vmem [shape: f32[1,32], index: 2, kind: input, shape index: {}]   ;;  %s350_s3 = inlined_call_operand.vmem [shape: f32[32,32], index: 3, kind: input, shape index: {}]   ;;  %s351_s4 = inlined_call_operand.vmem [shape: f32[1,32], index: 4, kind: input, shape index: {}]   ;;  %s352_s5 = inlined_call_operand.vmem [shape: f32[1,32], index: 5, kind: input, shape index: {}]   ;;  %s353_s6 = inlined_call_operand.vmem [shape: f32[32,32], index: 6, kind: output, shape index: {}]  }
   0x1   :  { %v214_v0 = vld [vmem:[%s347_s1 + $0x8] sm:$0xff]  ;;  %v213_v1 = vld [vmem:[%s347_s1] sm:$0xff]  ;;  %v26_v4 = vld [vmem:[%s348_s0 + $0x10] sm:$0xff]  ;;  %221 = vrcp.f32 %v231_v29 }
   0x2   :  { %v24_v2 = vld [vmem:[%s348_s0] sm:$0xff]  ;;  %v25_v3 = vld [vmem:[%s348_s0 + $0x8] sm:$0xff]  ;;  %63 = vmatpush.bf16.msra.mxu0 %v214_v0  ;;  %215 = vmatpush.bf16.msra.mxu1 %v214_v0  ;;  %v27_v5 = vld [vmem:[%s348_s0 + $0x18] sm:$0xff] }
   0x3   :  { %v28_v6 = vpack.c.bf16 %v25_v3, %v24_v2  ;;  %v29_v7 = vpack.c.bf16 %v27_v5, %v26_v4  ;;  %v218_v8 = vld [vmem:[%s349_s2] ss:$0 sm:$0xff]  ;;  %v78_v11 = vld [vmem:[%s350_s3 + $0x10] sm:$0xff]  ;;  %v79_v21 = vld [vmem:[%s350_s3 + $0x18] sm:$0xff] }
   0x4   :  { %v76_v12 = vld [vmem:[%s350_s3] sm:$0xff]  ;;  %v77_v22 = vld [vmem:[%s350_s3 + $0x8] sm:$0xff] }
   0x6   :  { %64 = vmatpush.bf16.msra.mxu0 %v213_v1  ;;  %216 = vmatpush.bf16.msra.mxu1 %v213_v1 }
   0x7   :  { %v222_v30 = vpop.eup %221 }
   0x8   :  { %v97_v31 = vmul.f32 32.0, %v222_v30  ;;  %vm101_vm1 = vweird.f32 %v222_v30 }
   0x9   :  { %211 = vmatmul.msk.bf16.vlgmr.msra.gmra.mxu0 %vm50_vm0, %v28_v6  ;;  %212 = vmatmul.msk.bf16.vlgmr.msra.gmra.mxu1 %vm50_vm0, %v29_v7 }
   0xa   :  { %v98_v32 = vsub.f32 1.0, %v97_v31 }
   0xc   :  { %v99_v33 = vmul.f32 %v222_v30, %v98_v32 }
   0xe   :  { %v100_v34 = vadd.f32 %v222_v30, %v99_v33 }
  0x10   :  { %v102_v35 = vsel %vm101_vm1, %v222_v30, %v100_v34 }
  0x86   :  { %v66_v9 = vpop.f32.mrf.mxu0  ;;  %v71_v10 = vpop.f32.mrf.mxu1 }
  0x87   :  { %v67_v13 = vadd.f32 %v218_v8, %v66_v9  ;;  %v72_v14 = vadd.f32 %v218_v8, %v71_v10 }
  0x89   :  { %v82_v15 = vadd.f32 %v78_v11, %v72_v14  ;;  %v80_v16 = vadd.f32 %v76_v12, %v67_v13 }
  0x8b   :  { %v90_v17 = vsel %vm50_vm0, %v82_v15, 0.0  ;;  %v84_v18 = vsel %vm50_vm0, %v80_v16, 0.0 }
  0x8c   :  { %91 = vadd.xlane.f32.xlu1 %v90_v17  ;;  %85 = vadd.xlane.f32.xlu0 %v84_v18  ;;  %v219_v18 = vld [vmem:[%s351_s4] ss:$0 sm:$0xff] }
  0x8e   :  { %v68_v19 = vpop.f32.mrf.mxu0  ;;  %v73_v20 = vpop.f32.mrf.mxu1 }
  0x8f   :  { %v69_v23 = vadd.f32 %v218_v8, %v68_v19  ;;  %v74_v24 = vadd.f32 %v218_v8, %v73_v20 }
  0x91   :  { %v83_v25 = vadd.f32 %v79_v21, %v74_v24  ;;  %v81_v26 = vadd.f32 %v77_v22, %v69_v23  ;;  %v220_v23 = vld [vmem:[%s352_s5] ss:$0 sm:$0xff] }
  0x93   :  { %v93_v27 = vsel %vm50_vm0, %v83_v25, 0.0  ;;  %v87_v28 = vsel %vm50_vm0, %v81_v26, 0.0 }
  0x94   :  { %94 = vadd.xlane.f32.xlu1 %v93_v27  ;;  %88 = vadd.xlane.f32.xlu0 %v87_v28 }
  0xff   :  { %v92_v36 = vpop.xlane.xlu1 %91  ;;  %v86_v37 = vpop.xlane.xlu0 %85 }
 0x100   :  { %v105_v38 = vmul.f32 %v102_v35, %v92_v36  ;;  %v103_v39 = vmul.f32 %v102_v35, %v86_v37 }
 0x102   :  { %v306_v40 = vsub.f32 %v82_v15, %v105_v38  ;;  %v107_v41 = vsub.f32 %v80_v16, %v103_v39 }
 0x104   :  { %v113_v42 = vmul.f32 %v306_v40, %v306_v40  ;;  %v111_v43 = vmul.f32 %v107_v41, %v107_v41 }
 0x106   :  { %v121_v44 = vsel %vm50_vm0, %v113_v42, 0.0  ;;  %v115_v45 = vsel %vm50_vm0, %v111_v43, 0.0 }
 0x107   :  { %v95_v46 = vpop.xlane.xlu1 %94  ;;  %122 = vadd.xlane.f32.xlu0 %v121_v44  ;;  %116 = vadd.xlane.f32.xlu2 %v115_v45  ;;  %v89_v47 = vpop.xlane.xlu0 %88 }
 0x108   :  { %v106_v48 = vmul.f32 %v102_v35, %v95_v46  ;;  %v104_v49 = vmul.f32 %v102_v35, %v89_v47 }
 0x10a   :  { %v312_v50 = vsub.f32 %v83_v25, %v106_v48  ;;  %v314_v51 = vsub.f32 %v81_v26, %v104_v49 }
 0x10c   :  { %v114_v52 = vmul.f32 %v312_v50, %v312_v50  ;;  %v112_v53 = vmul.f32 %v314_v51, %v314_v51 }
 0x10e   :  { %v124_v54 = vsel %vm50_vm0, %v114_v52, 0.0  ;;  %v118_v55 = vsel %vm50_vm0, %v112_v53, 0.0 }
 0x10f   :  { %125 = vadd.xlane.f32.xlu1 %v124_v54  ;;  %119 = vadd.xlane.f32.xlu2 %v118_v55 }
 0x17a   :  { %v117_v56 = vpop.xlane.xlu2 %116  ;;  %v123_v57 = vpop.xlane.xlu0 %122 }
 0x17b   :  { %v127_v58 = vmul.f32 %v117_v56, %v102_v35  ;;  %v129_v59 = vmul.f32 %v123_v57, %v102_v35 }
 0x17d   :  { %v131_v60 = vadd.f32 1e-05, %v127_v58  ;;  %v133_v61 = vadd.f32 1e-05, %v129_v59 }
 0x17f   :  { %223 = vrsqrt.f32 %v131_v60  ;;  %vm141_vm4 = vweird.f32 %v131_v60  ;;  %vm161_vm6 = vweird.f32 %v133_v61 }
 0x180   :  { %225 = vrsqrt.f32 %v133_v61 }
 0x182   :  { %v126_v62 = vpop.xlane.xlu1 %125  ;;  %v120_v63 = vpop.xlane.xlu2 %119 }
 0x183   :  { %v130_v0 = vmul.f32 %v126_v62, %v102_v35  ;;  %v128_v1 = vmul.f32 %v120_v63, %v102_v35 }
 0x185   :  { %v224_v2 = vpop.eup %223  ;;  %v134_v3 = vadd.f32 1e-05, %v130_v0  ;;  %v132_v4 = vadd.f32 1e-05, %v128_v1 }
 0x186   :  { %v226_v5 = vpop.eup %225  ;;  %v136_v6 = vmul.f32 %v224_v2, %v131_v60  ;;  %vm142_vm2 = vweird.f32 %v224_v2 }
 0x187   :  { %v156_v7 = vmul.f32 %v226_v5, %v133_v61  ;;  %227 = vrsqrt.f32 %v134_v3  ;;  %vm162_vm3 = vweird.f32 %v226_v5  ;;  %vm143_vm5 = vmor %vm141_vm4, %vm142_vm2  ;;  %vm171_vm10 = vweird.f32 %v134_v3 }
 0x188   :  { %v137_v8 = vmul.f32 %v224_v2, %v136_v6  ;;  %229 = vrsqrt.f32 %v132_v4  ;;  %vm163_vm7 = vmor %vm161_vm6, %vm162_vm3  ;;  %vm151_vm12 = vweird.f32 %v132_v4 }
 0x189   :  { %v157_v9 = vmul.f32 %v226_v5, %v156_v7 }
 0x18a   :  { %v138_v10 = vmul.f32 0.5, %v137_v8 }
 0x18b   :  { %v158_v11 = vmul.f32 0.5, %v157_v9 }
 0x18c   :  { %v139_v12 = vsub.f32 1.5, %v138_v10 }
 0x18d   :  { %v228_v13 = vpop.eup %227  ;;  %v159_v14 = vsub.f32 1.5, %v158_v11 }
 0x18e   :  { %v230_v15 = vpop.eup %229  ;;  %v140_v16 = vmul.f32 %v224_v2, %v139_v12  ;;  %v166_v17 = vmul.f32 %v228_v13, %v134_v3  ;;  %vm172_vm8 = vweird.f32 %v228_v13 }
 0x18f   :  { %v160_v19 = vmul.f32 %v226_v5, %v159_v14  ;;  %v146_v20 = vmul.f32 %v230_v15, %v132_v4  ;;  %vm152_vm9 = vweird.f32 %v230_v15  ;;  %vm173_vm11 = vmor %vm171_vm10, %vm172_vm8 }
 0x190   :  { %v144_v21 = vsel %vm143_vm5, %v224_v2, %v140_v16  ;;  %v167_v22 = vmul.f32 %v228_v13, %v166_v17  ;;  %vm153_vm13 = vmor %vm151_vm12, %vm152_vm9 }
 0x191   :  { %v175_v24 = vmul.f32 %v144_v21, %v107_v41  ;;  %v164_v25 = vsel %vm163_vm7, %v226_v5, %v160_v19  ;;  %v147_v26 = vmul.f32 %v230_v15, %v146_v20 }
 0x192   :  { %v177_v27 = vmul.f32 %v164_v25, %v306_v40  ;;  %v168_v28 = vmul.f32 0.5, %v167_v22 }
 0x193   :  { %v183_v29 = vmul.f32 %v219_v18, %v175_v24  ;;  %v148_v30 = vmul.f32 0.5, %v147_v26 }
 0x194   :  { %v185_v31 = vmul.f32 %v219_v18, %v177_v27  ;;  %v169_v32 = vsub.f32 1.5, %v168_v28 }
 0x195   :  { %v191_v33 = vadd.f32 %v220_v23, %v183_v29  ;;  %v149_v34 = vsub.f32 1.5, %v148_v30 }
 0x196   :  { %v193_v35 = vadd.f32 %v220_v23, %v185_v31  ;;  %v170_v36 = vmul.f32 %v228_v13, %v169_v32 }
 0x197   :  { %195 = vst.msk [vmem:[%s353_s6] sm:$0xff] %vm50_vm0, %v191_v33  ;;  %v150_v37 = vmul.f32 %v230_v15, %v149_v34 }
 0x198   :  { %197 = vst.msk [vmem:[%s353_s6 + $0x10] sm:$0xff] %vm50_vm0, %v193_v35  ;;  %v174_v38 = vsel %vm173_vm11, %v228_v13, %v170_v36 }
 0x199   :  { %v178_v39 = vmul.f32 %v174_v38, %v312_v50  ;;  %v154_v40 = vsel %vm153_vm13, %v230_v15, %v150_v37 }
 0x19a   :  { %v176_v41 = vmul.f32 %v154_v40, %v314_v51 }
 0x19b   :  { %v186_v42 = vmul.f32 %v219_v18, %v178_v39 }
 0x19c   :  { %v184_v43 = vmul.f32 %v219_v18, %v176_v41 }
 0x19d   :  { %v194_v44 = vadd.f32 %v220_v23, %v186_v42 }
 0x19e   :  { %v192_v45 = vadd.f32 %v220_v23, %v184_v43 }
 0x19f   :  { %198 = vst.msk [vmem:[%s353_s6 + $0x18] sm:$0xff] %vm50_vm0, %v194_v44 }
 0x1a0   :  { %196 = vst.msk [vmem:[%s353_s6 + $0x8] sm:$0xff] %vm50_vm0, %v192_v45 }

// kernel: transformer_forward.26
= control target key start
LH: loop header
LB: loop body
LE: loop exit
PB: predicated region body
PF: predicated region fallthrough
CT: control target
= control target key end

     0   :  { %vm31_vm0 = vcmask 261120   ;;  %v370_v12 = vmov 0.0   ;;  %vm130_vm1 = vcmask 523264   ;;  %v371_v57 = vmov 32.0   ;;  %s519_s1 = inlined_call_operand.vmem [shape: bf16[32,64], index: 1, kind: input, shape index: {}]   ;;  %s520_s0 = inlined_call_operand.vmem [shape: f32[32,32], index: 0, kind: input, shape index: {}]   ;;  %s521_s2 = inlined_call_operand.vmem [shape: f32[1,64], index: 2, kind: input, shape index: {}]   ;;  %s522_s3 = inlined_call_operand.vmem [shape: bf16[64,32], index: 3, kind: input, shape index: {}]   ;;  %s523_s4 = inlined_call_operand.vmem [shape: f32[1,32], index: 4, kind: input, shape index: {}]   ;;  %s524_s5 = inlined_call_operand.vmem [shape: f32[1,32], index: 5, kind: input, shape index: {}]   ;;  %s525_s6 = inlined_call_operand.vmem [shape: f32[1,32], index: 6, kind: input, shape index: {}]   ;;  %s526_s7 = inlined_call_operand.vmem [shape: f32[32,32], index: 7, kind: output, shape index: {}]  }
   0x1   :  { %v335_v0 = vld [vmem:[%s519_s1 + $0x8] sm:$0xff]  ;;  %v334_v1 = vld [vmem:[%s519_s1] sm:$0xff]  ;;  %v431_v4 = vld [vmem:[%s520_s0 + $0x10] sm:$0xff]  ;;  %32 = vst.msk [vmem:[#allocation2] sm:$0xff] %vm31_vm0, %v370_v12 }
   0x2   :  { %v421_v2 = vld [vmem:[%s520_s0] sm:$0xff]  ;;  %v426_v3 = vld [vmem:[%s520_s0 + $0x8] sm:$0xff]  ;;  %75 = vmatpush.bf16.msra.mxu0 %v335_v0  ;;  %340 = vmatpush.bf16.msra.mxu3 %v335_v0  ;;  %v436_v5 = vld [vmem:[%s520_s0 + $0x18] sm:$0xff]  ;;  %33 = vst.msk [vmem:[#allocation2 + $0x8] sm:$0xff] %vm31_vm0, %v370_v12 }
   0x3   :  { %v40_v6 = vpack.c.bf16 %v426_v3, %v421_v2  ;;  %v41_v7 = vpack.c.bf16 %v436_v5, %v431_v4  ;;  %v339_v8 = vld [vmem:[%s522_s3 + $0x18] sm:$0xff]  ;;  %v338_v9 = vld [vmem:[%s522_s3 + $0x10] sm:$0xff]  ;;  %v337_v10 = vld [vmem:[%s522_s3 + $0x8] sm:$0xff]  ;;  %34 = vst.msk [vmem:[#allocation2 + $0x10] sm:$0xff] %vm31_vm0, %v370_v12 }
   0x4   :  { %141 = vmatpush.bf16.msra.mxu1 %v339_v8  ;;  %342 = vmatpush.bf16.msra.mxu2 %v339_v8  ;;  %v336_v11 = vld [vmem:[%s522_s3] sm:$0xff]  ;;  %35 = vst.msk [vmem:[#allocation2 + $0x18] sm:$0xff] %vm31_vm0, %v370_v12 }
   0x5   :  { %v348_v14 = vld [vmem:[%s521_s2] ss:$0 sm:$0xff] }
   0x6   :  { %76 = vmatpush.bf16.msra.mxu0 %v334_v1  ;;  %341 = vmatpush.bf16.msra.mxu3 %v334_v1  ;;  %v349_v32 = vld [vmem:[%s523_s4] ss:$0 sm:$0xff] }
   0x8   :  { %142 = vmatpush.bf16.msra.mxu1 %v338_v9  ;;  %343 = vmatpush.bf16.msra.mxu2 %v338_v9  ;;  %v92_v28 = vld [vmem:[#allocation2] sm:$0xff] }
   0x9   :  { %314 = vmatmul.msk.bf16.vlgmr.msra.gmra.mxu0 %vm31_vm0, %v40_v6  ;;  %315 = vmatmul.msk.bf16.vlgmr.msra.gmra.mxu3 %vm31_vm0, %v41_v7  ;;  %v93_v31 = vld [vmem:[#allocation2 + $0x8] sm:$0xff] }
   0xa   :  { %v94_v35 = vld [vmem:[#allocation2 + $0x10] sm:$0xff] }
   0xb   :  { %v95_v42 = vld [vmem:[#allocation2 + $0x18] sm:$0xff] }
   0xc   :  { %143 = vmatpush.bf16.msra.mxu1 %v337_v10  ;;  %344 = vmatpush.bf16.msra.mxu2 %v337_v10 }
  0x10   :  { %144 = vmatpush.bf16.msra.mxu1 %v336_v11  ;;  %345 = vmatpush.bf16.msra.mxu2 %v336_v11 }
  0x86   :  { %v78_v13 = vpop.f32.mrf.mxu0 }
  0x87   :  { %v79_v15 = vadd.f32 %v348_v14, %v78_v13 }
  0x89   :  { %352 = vtanh.f32 %v79_v15 }
  0x8c   :  { %v83_v16 = vpop.f32.mrf.mxu3 }
  0x8d   :  { %v84_v19 = vadd.f32 %v348_v14, %v83_v16 }
  0x8e   :  { %v80_v17 = vpop.f32.mrf.mxu0 }
  0x8f   :  { %v81_v18 = vadd.f32 %v348_v14, %v80_v17  ;;  %v353_v21 = vpop.eup %352 }
  0x91   :  { %354 = vtanh.f32 %v81_v18 }
  0x92   :  { %356 = vtanh.f32 %v84_v19 }
  0x94   :  { %v85_v20 = vpop.f32.mrf.mxu3 }
  0x95   :  { %v86_v22 = vadd.f32 %v348_v14, %v85_v20 }
  0x97   :  { %v355_v23 = vpop.eup %354  ;;  %358 = vtanh.f32 %v86_v22 }
  0x98   :  { %v96_v24 = vpack.c.bf16 %v355_v23, %v353_v21  ;;  %v357_v25 = vpop.eup %356  ;;  %360 = vrcp.f32 %v371_v57 }
  0x9a   :  { %332 = vmatmul.msk.bf16.vlgmr.msra.gmra.mxu1 %vm130_vm1, %v96_v24 }
  0x9d   :  { %v359_v26 = vpop.eup %358 }
  0x9e   :  { %v97_v27 = vpack.c.bf16 %v359_v26, %v357_v25  ;;  %v361_v58 = vpop.eup %360 }
  0x9f   :  { %v200_v59 = vmul.f32 32.0, %v361_v58  ;;  %vm204_vm2 = vweird.f32 %v361_v58 }
  0xa0   :  { %333 = vmatmul.msk.bf16.vlgmr.msra.gmra.mxu2 %vm130_vm1, %v97_v27 }
  0xa1   :  { %v201_v60 = vsub.f32 1.0, %v200_v59 }
  0xa3   :  { %v202_v61 = vmul.f32 %v361_v58, %v201_v60 }
  0xa5   :  { %v203_v62 = vadd.f32 %v361_v58, %v202_v61 }
  0xa7   :  { %v205_v63 = vsel %vm204_vm2, %v361_v58, %v203_v62 }
 0x117   :  { %v146_v29 = vpop.f32.mrf.mxu1 }
 0x118   :  { %v156_v30 = vadd.f32 %v146_v29, %v92_v28 }
 0x11a   :  { %160 = vst.msk [vmem:[#allocation2] sm:$0xff] %vm31_vm0, %v156_v30 }
 0x11f   :  { %v148_v33 = vpop.f32.mrf.mxu1 }
 0x120   :  { %v157_v34 = vadd.f32 %v148_v33, %v93_v31 }
 0x121   :  { %v167_v36 = vld [vmem:[#allocation2] sm:$0xff] }
 0x122   :  { %161 = vst.msk [vmem:[#allocation2 + $0x8] sm:$0xff] %vm31_vm0, %v157_v34  ;;  %v175_v37 = vadd.f32 %v349_v32, %v167_v36 }
 0x123   :  { %v151_v38 = vpop.f32.mrf.mxu2 }
 0x124   :  { %v158_v39 = vadd.f32 %v151_v38, %v94_v35  ;;  %v183_v40 = vadd.f32 %v175_v37, %v421_v2  ;;  %v350_v38 = vld [vmem:[%s524_s5] ss:$0 sm:$0xff] }
 0x126   :  { %162 = vst.msk [vmem:[#allocation2 + $0x10] sm:$0xff] %vm31_vm0, %v158_v39  ;;  %v187_v41 = vsel %vm31_vm0, %v183_v40, 0.0 }
 0x127   :  { %188 = vadd.xlane.f32.xlu0 %v187_v41 }
 0x129   :  { %v168_v43 = vld [vmem:[#allocation2 + $0x8] sm:$0xff] }
 0x12a   :  { %v176_v44 = vadd.f32 %v349_v32, %v168_v43  ;;  %v351_v43 = vld [vmem:[%s525_s6] ss:$0 sm:$0xff] }
 0x12b   :  { %v153_v45 = vpop.f32.mrf.mxu2 }
 0x12c   :  { %v159_v46 = vadd.f32 %v153_v45, %v95_v42  ;;  %v184_v47 = vadd.f32 %v176_v44, %v426_v3 }
 0x12d   :  { %v169_v48 = vld [vmem:[#allocation2 + $0x10] sm:$0xff] }
 0x12e   :  { %163 = vst.msk [vmem:[#allocation2 + $0x18] sm:$0xff] %vm31_vm0, %v159_v46  ;;  %v190_v49 = vsel %vm31_vm0, %v184_v47, 0.0  ;;  %v177_v50 = vadd.f32 %v349_v32, %v169_v48 }
 0x12f   :  { %191 = vadd.xlane.f32.xlu0 %v190_v49 }
 0x130   :  { %v185_v51 = vadd.f32 %v177_v50, %v431_v4 }
 0x132   :  { %v193_v52 = vsel %vm31_vm0, %v185_v51, 0.0 }
 0x133   :  { %194 = vadd.xlane.f32.xlu1 %v193_v52 }
 0x135   :  { %v170_v53 = vld [vmem:[#allocation2 + $0x18] sm:$0xff] }
 0x136   :  { %v178_v54 = vadd.f32 %v349_v32, %v170_v53 }
 0x138   :  { %v186_v55 = vadd.f32 %v178_v54, %v436_v5 }
 0x13a   :  { %v196_v56 = vsel %vm31_vm0, %v186_v55, 0.0 }
 0x13b   :  { %197 = vadd.xlane.f32.xlu1 %v196_v56 }
 0x19a   :  { %v189_v0 = vpop.xlane.xlu0 %188 }
 0x19b   :  { %v206_v1 = vmul.f32 %v205_v63, %v189_v0 }
 0x19d   :  { %v210_v2 = vsub.f32 %v183_v40, %v206_v1 }
 0x19f   :  { %v214_v3 = vmul.f32 %v210_v2, %v210_v2 }
 0x1a1   :  { %v218_v4 = vsel %vm31_vm0, %v214_v3, 0.0 }
 0x1a2   :  { %219 = vadd.xlane.f32.xlu2 %v218_v4  ;;  %v192_v5 = vpop.xlane.xlu0 %191 }
 0x1a3   :  { %v207_v6 = vmul.f32 %v205_v63, %v192_v5 }
 0x1a5   :  { %v479_v7 = vsub.f32 %v184_v47, %v207_v6 }
 0x1a6   :  { %v195_v8 = vpop.xlane.xlu1 %194 }
 0x1a7   :  { %v208_v9 = vmul.f32 %v205_v63, %v195_v8  ;;  %v215_v10 = vmul.f32 %v479_v7, %v479_v7 }
 0x1a9   :  { %v483_v11 = vsub.f32 %v185_v51, %v208_v9  ;;  %v221_v12 = vsel %vm31_vm0, %v215_v10, 0.0 }
 0x1aa   :  { %222 = vadd.xlane.f32.xlu2 %v221_v12 }
 0x1ab   :  { %v216_v13 = vmul.f32 %v483_v11, %v483_v11 }
 0x1ad   :  { %v224_v14 = vsel %vm31_vm0, %v216_v13, 0.0 }
 0x1ae   :  { %v198_v15 = vpop.xlane.xlu1 %197  ;;  %225 = vadd.xlane.f32.xlu0 %v224_v14 }
 0x1af   :  { %v209_v16 = vmul.f32 %v205_v63, %v198_v15 }
 0x1b1   :  { %v489_v17 = vsub.f32 %v186_v55, %v209_v16 }
 0x1b3   :  { %v217_v18 = vmul.f32 %v489_v17, %v489_v17 }
 0x1b5   :  { %v227_v19 = vsel %vm31_vm0, %v217_v18, 0.0 }
 0x1b6   :  { %228 = vadd.xlane.f32.xlu1 %v227_v19 }
 0x215   :  { %v220_v20 = vpop.xlane.xlu2 %219 }
 0x216   :  { %v230_v21 = vmul.f32 %v220_v20, %v205_v63 }
 0x218   :  { %v234_v22 = vadd.f32 1e-05, %v230_v21 }
 0x21a   :  { %362 = vrsqrt.f32 %v234_v22  ;;  %vm244_vm4 = vweird.f32 %v234_v22 }
 0x21d   :  { %v223_v23 = vpop.xlane.xlu2 %222 }
 0x21e   :  { %v231_v24 = vmul.f32 %v223_v23, %v205_v63 }
 0x220   :  { %v363_v25 = vpop.eup %362  ;;  %v235_v26 = vadd.f32 1e-05, %v231_v24 }
 0x221   :  { %v239_v27 = vmul.f32 %v363_v25, %v234_v22  ;;  %v226_v28 = vpop.xlane.xlu0 %225  ;;  %vm245_vm3 = vweird.f32 %v363_v25 }
 0x222   :  { %364 = vrsqrt.f32 %v235_v26  ;;  %v232_v29 = vmul.f32 %v226_v28, %v205_v63  ;;  %vm246_vm5 = vmor %vm244_vm4, %vm245_vm3  ;;  %vm254_vm7 = vweird.f32 %v235_v26 }
 0x223   :  { %v240_v30 = vmul.f32 %v363_v25, %v239_v27 }
 0x224   :  { %v236_v31 = vadd.f32 1e-05, %v232_v29 }
 0x225   :  { %v241_v32 = vmul.f32 0.5, %v240_v30 }
 0x226   :  { %366 = vrsqrt.f32 %v236_v31  ;;  %vm264_vm10 = vweird.f32 %v236_v31 }
 0x227   :  { %v242_v33 = vsub.f32 1.5, %v241_v32 }
 0x228   :  { %v365_v34 = vpop.eup %364 }
 0x229   :  { %v243_v35 = vmul.f32 %v363_v25, %v242_v33  ;;  %v249_v36 = vmul.f32 %v365_v34, %v235_v26  ;;  %v229_v37 = vpop.xlane.xlu1 %228  ;;  %vm255_vm6 = vweird.f32 %v365_v34 }
 0x22a   :  { %v233_v39 = vmul.f32 %v229_v37, %v205_v63  ;;  %vm256_vm8 = vmor %vm254_vm7, %vm255_vm6 }
 0x22b   :  { %v247_v40 = vsel %vm246_vm5, %v363_v25, %v243_v35  ;;  %v250_v41 = vmul.f32 %v365_v34, %v249_v36 }
 0x22c   :  { %v367_v42 = vpop.eup %366  ;;  %v278_v44 = vmul.f32 %v247_v40, %v210_v2  ;;  %v237_v45 = vadd.f32 1e-05, %v233_v39 }
 0x22d   :  { %v251_v46 = vmul.f32 0.5, %v250_v41  ;;  %v259_v47 = vmul.f32 %v367_v42, %v236_v31  ;;  %vm265_vm9 = vweird.f32 %v367_v42 }
 0x22e   :  { %v286_v48 = vmul.f32 %v350_v38, %v278_v44  ;;  %368 = vrsqrt.f32 %v237_v45  ;;  %vm266_vm11 = vmor %vm264_vm10, %vm265_vm9  ;;  %vm274_vm13 = vweird.f32 %v237_v45 }
 0x22f   :  { %v252_v49 = vsub.f32 1.5, %v251_v46  ;;  %v260_v50 = vmul.f32 %v367_v42, %v259_v47 }
 0x230   :  { %v294_v51 = vadd.f32 %v351_v43, %v286_v48 }
 0x231   :  { %v253_v52 = vmul.f32 %v365_v34, %v252_v49  ;;  %v261_v53 = vmul.f32 0.5, %v260_v50 }
 0x232   :  { %298 = vst.msk [vmem:[%s526_s7] sm:$0xff] %vm31_vm0, %v294_v51 }
 0x233   :  { %v257_v54 = vsel %vm256_vm8, %v365_v34, %v253_v52  ;;  %v262_v55 = vsub.f32 1.5, %v261_v53 }
 0x234   :  { %v369_v56 = vpop.eup %368  ;;  %v279_v57 = vmul.f32 %v257_v54, %v479_v7 }
 0x235   :  { %v263_v58 = vmul.f32 %v367_v42, %v262_v55  ;;  %v269_v59 = vmul.f32 %v369_v56, %v237_v45  ;;  %vm275_vm12 = vweird.f32 %v369_v56 }
 0x236   :  { %v287_v60 = vmul.f32 %v350_v38, %v279_v57  ;;  %vm276_vm14 = vmor %vm274_vm13, %vm275_vm12 }
 0x237   :  { %v267_v61 = vsel %vm266_vm11, %v367_v42, %v263_v58  ;;  %v270_v62 = vmul.f32 %v369_v56, %v269_v59 }
 0x238   :  { %v295_v63 = vadd.f32 %v351_v43, %v287_v60  ;;  %v280_v0 = vmul.f32 %v267_v61, %v483_v11 }
 0x239   :  { %v271_v1 = vmul.f32 0.5, %v270_v62 }
 0x23a   :  { %299 = vst.msk [vmem:[%s526_s7 + $0x8] sm:$0xff] %vm31_vm0, %v295_v63  ;;  %v288_v2 = vmul.f32 %v350_v38, %v280_v0 }
 0x23b   :  { %v272_v3 = vsub.f32 1.5, %v271_v1 }
 0x23c   :  { %v296_v4 = vadd.f32 %v351_v43, %v288_v2 }
 0x23d   :  { %v273_v5 = vmul.f32 %v369_v56, %v272_v3 }
 0x23e   :  { %300 = vst.msk [vmem:[%s526_s7 + $0x10] sm:$0xff] %vm31_vm0, %v296_v4 }
 0x23f   :  { %v277_v6 = vsel %vm276_vm14, %v369_v56, %v273_v5 }
 0x240   :  { %v281_v7 = vmul.f32 %v277_v6, %v489_v17 }
 0x242   :  { %v289_v8 = vmul.f32 %v350_v38, %v281_v7 }
 0x244   :  { %v297_v9 = vadd.f32 %v351_v43, %v289_v8 }
 0x246   :  { %301 = vst.msk [vmem:[%s526_s7 + $0x18] sm:$0xff] %vm31_vm0, %v297_v9 }

// kernel: transformer_forward.24
= control target key start
LH: loop header
LB: loop body
LE: loop exit
PB: predicated region body
PF: predicated region fallthrough
CT: control target
= control target key end

     0   :  { %vm121_vm0 = vcmask 64512   ;;  %vm368_vm1 = vcmask 130048   ;;  %s1297_s1 = inlined_call_operand.vmem [shape: f32[8,16,8], index: 1, kind: input, shape index: {}]   ;;  %s1298_s0 = inlined_call_operand.vmem [shape: f32[8,16,8], index: 0, kind: input, shape index: {}]   ;;  %s1299_s2 = inlined_call_operand.vmem [shape: f32[8,16,8], index: 2, kind: input, shape index: {}]   ;;  %s1300_s3 = inlined_call_operand.vmem [shape: f32[8,16,8], index: 3, kind: output, shape index: {}]  }
   0x1   :  { %v47_v0 = vld [vmem:[%s1297_s1] sm:$0xff]  ;;  %v48_v1 = vld [vmem:[%s1297_s1 + $0x8] sm:$0xff]  ;;  %v49_v2 = vld [vmem:[%s1297_s1 + $0x10] sm:$0xff] }
   0x2   :  { %v63_v3 = vpack.c.bf16 %v47_v0, %v47_v0  ;;  %v64_v4 = vpack.c.bf16 %v48_v1, %v48_v1  ;;  %v50_v5 = vld [vmem:[%s1297_s1 + $0x18] sm:$0xff]  ;;  %v65_v6 = vpack.c.bf16 %v49_v2, %v49_v2  ;;  %v51_v7 = vld [vmem:[%s1297_s1 + $0x20] sm:$0xff]  ;;  %v52_v8 = vld [vmem:[%s1297_s1 + $0x28] sm:$0xff] }
   0x3   :  { %v66_v9 = vpack.c.bf16 %v50_v5, %v50_v5  ;;  %v67_v10 = vpack.c.bf16 %v51_v7, %v51_v7  ;;  %v68_v11 = vpack.c.bf16 %v52_v8, %v52_v8  ;;  %v53_v12 = vld [vmem:[%s1297_s1 + $0x30] sm:$0xff]  ;;  %v54_v13 = vld [vmem:[%s1297_s1 + $0x38] sm:$0xff]  ;;  %v15_v14 = vld [vmem:[%s1298_s0] sm:$0xff] }
   0x4   :  { %v118_v15 = vunpack.c.l.b16 %v63_v3  ;;  %v119_v16 = vunpack.c.l.b16 %v64_v4  ;;  %v149_v17 = vunpack.c.l.b16 %v65_v6  ;;  %v69_v18 = vpack.c.bf16 %v53_v12, %v53_v12  ;;  %v16_v19 = vld [vmem:[%s1298_s0 + $0x8] sm:$0xff]  ;;  %v17_v20 = vld [vmem:[%s1298_s0 + $0x10] sm:$0xff]  ;;  %v18_v25 = vld [vmem:[%s1298_s0 + $0x18] sm:$0xff] }
   0x5   :  { %v150_v21 = vunpack.c.l.b16 %v66_v9  ;;  %v179_v22 = vunpack.c.l.b16 %v67_v10  ;;  %v180_v23 = vunpack.c.l.b16 %v68_v11  ;;  %v70_v24 = vpack.c.bf16 %v54_v13, %v54_v13  ;;  %v19_v34 = vld [vmem:[%s1298_s0 + $0x20] sm:$0xff]  ;;  %v20_v35 = vld [vmem:[%s1298_s0 + $0x28] sm:$0xff]  ;;  %v21_v40 = vld [vmem:[%s1298_s0 + $0x30] sm:$0xff] }
   0x6   :  { %v120_v26 = vpack.c.b16 %v119_v16, %v118_v15  ;;  %v209_v27 = vunpack.c.l.b16 %v69_v18  ;;  %v31_v28 = vpack.c.bf16 %v15_v14, %v15_v14  ;;  %v32_v29 = vpack.c.bf16 %v16_v19, %v16_v19  ;;  %v22_v41 = vld [vmem:[%s1298_s0 + $0x38] sm:$0xff]  ;;  %v59_v42 = vld [vmem:[%s1297_s1 + $0x60] sm:$0xff]  ;;  %v60_v47 = vld [vmem:[%s1297_s1 + $0x68] sm:$0xff] }
   0x7   :  { %v151_v30 = vpack.c.b16 %v150_v21, %v149_v17  ;;  %v181_v31 = vpack.c.b16 %v180_v23, %v179_v22  ;;  %v210_v32 = vunpack.c.l.b16 %v70_v24  ;;  %v33_v33 = vpack.c.bf16 %v17_v20, %v17_v20  ;;  %v61_v52 = vld [vmem:[%s1297_s1 + $0x70] sm:$0xff]  ;;  %v62_v57 = vld [vmem:[%s1297_s1 + $0x78] sm:$0xff]  ;;  %v55_v58 = vld [vmem:[%s1297_s1 + $0x40] sm:$0xff] }
   0x8   :  { %v126_v36 = vsel %vm121_vm0, %v120_v26, 0  ;;  %v113_v37 = vunpack.c.l.b16 %v31_v28  ;;  %v114_v38 = vunpack.c.l.b16 %v32_v29  ;;  %v34_v39 = vpack.c.bf16 %v18_v25, %v18_v25  ;;  %v56_v63 = vld [vmem:[%s1297_s1 + $0x48] sm:$0xff]  ;;  %v57_v8 = vld [vmem:[%s1297_s1 + $0x50] sm:$0xff]  ;;  %v58_v9 = vld [vmem:[%s1297_s1 + $0x58] sm:$0xff] }
   0x9   :  { %135 = vmatpush.bf16.xpose.msra.mxu0 %v126_v36  ;;  %v156_v43 = vsel %vm121_vm0, %v151_v30, 0  ;;  %v186_v44 = vsel %vm121_vm0, %v181_v31, 0  ;;  %v211_v45 = vpack.c.b16 %v210_v32, %v209_v27  ;;  %v144_v46 = vunpack.c.l.b16 %v33_v33  ;;  %v23_v17 = vld [vmem:[%s1298_s0 + $0x40] sm:$0xff]  ;;  %v24_v18 = vld [vmem:[%s1298_s0 + $0x48] sm:$0xff]  ;;  %v25_v28 = vld [vmem:[%s1298_s0 + $0x50] sm:$0xff] }
   0xa   :  { %165 = vmatpush.bf16.xpose.msra.mxu1 %v156_v43  ;;  %195 = vmatpush.bf16.xpose.msra.mxu2 %v186_v44  ;;  %v115_v48 = vpack.c.b16 %v114_v38, %v113_v37  ;;  %v145_v49 = vunpack.c.l.b16 %v34_v39  ;;  %v35_v50 = vpack.c.bf16 %v19_v34, %v19_v34  ;;  %v36_v51 = vpack.c.bf16 %v20_v35, %v20_v35  ;;  %v27_v23 = vld [vmem:[%s1298_s0 + $0x60] sm:$0xff]  ;;  %v28_v24 = vld [vmem:[%s1298_s0 + $0x68] sm:$0xff]  ;;  %v26_v29 = vld [vmem:[%s1298_s0 + $0x58] sm:$0xff] }
   0xb   :  { %v216_v53 = vsel %vm121_vm0, %v211_v45, 0  ;;  %v37_v54 = vpack.c.bf16 %v21_v40, %v21_v40  ;;  %v38_v55 = vpack.c.bf16 %v22_v41, %v22_v41  ;;  %v75_v56 = vpack.c.bf16 %v59_v42, %v59_v42  ;;  %v29_v33 = vld [vmem:[%s1298_s0 + $0x70] sm:$0xff]  ;;  %v30_v34 = vld [vmem:[%s1298_s0 + $0x78] sm:$0xff] }
   0xc   :  { %225 = vmatpush.bf16.xpose.msra.mxu3 %v216_v53  ;;  %v146_v59 = vpack.c.b16 %v145_v49, %v144_v46  ;;  %v174_v60 = vunpack.c.l.b16 %v35_v50  ;;  %v175_v61 = vunpack.c.l.b16 %v36_v51  ;;  %v76_v62 = vpack.c.bf16 %v60_v47, %v60_v47 }
   0xd   :  { %v204_v0 = vunpack.c.l.b16 %v37_v54  ;;  %v205_v1 = vunpack.c.l.b16 %v38_v55  ;;  %v299_v2 = vunpack.c.l.b16 %v75_v56  ;;  %v77_v3 = vpack.c.bf16 %v61_v52, %v61_v52 }
   0xe   :  { %v176_v4 = vpack.c.b16 %v175_v61, %v174_v60  ;;  %v300_v5 = vunpack.c.l.b16 %v76_v62  ;;  %v78_v6 = vpack.c.bf16 %v62_v57, %v62_v57  ;;  %v71_v7 = vpack.c.bf16 %v55_v58, %v55_v58 }
   0xf   :  { %v206_v10 = vpack.c.b16 %v205_v1, %v204_v0  ;;  %v329_v11 = vunpack.c.l.b16 %v77_v3  ;;  %v72_v12 = vpack.c.bf16 %v56_v63, %v56_v63  ;;  %v73_v19 = vpack.c.bf16 %v57_v8, %v57_v8 }
  0x10   :  { %805 = vmatmul.msk.bf16.vlgmr.msra.gmra.mxu0 %vm121_vm0, %v115_v48  ;;  %v301_v13 = vpack.c.b16 %v300_v5, %v299_v2  ;;  %v330_v14 = vunpack.c.l.b16 %v78_v6  ;;  %v239_v15 = vunpack.c.l.b16 %v71_v7  ;;  %v74_v20 = vpack.c.bf16 %v58_v9, %v58_v9 }
  0x11   :  { %806 = vmatmul.msk.bf16.vlgmr.msra.gmra.mxu1 %vm121_vm0, %v146_v59  ;;  %807 = vmatmul.msk.bf16.vlgmr.msra.gmra.mxu2 %vm121_vm0, %v176_v4  ;;  %v240_v16 = vunpack.c.l.b16 %v72_v12  ;;  %v269_v26 = vunpack.c.l.b16 %v73_v19  ;;  %v39_v31 = vpack.c.bf16 %v23_v17, %v23_v17  ;;  %v40_v32 = vpack.c.bf16 %v24_v18, %v24_v18 }
  0x12   :  { %v306_v21 = vsel %vm121_vm0, %v301_v13, 0  ;;  %v331_v22 = vpack.c.b16 %v330_v14, %v329_v11  ;;  %v270_v27 = vunpack.c.l.b16 %v74_v20  ;;  %v43_v37 = vpack.c.bf16 %v27_v23, %v27_v23 }
  0x13   :  { %808 = vmatmul.msk.bf16.vlgmr.msra.gmra.mxu3 %vm121_vm0, %v206_v10  ;;  %315 = vmatpush.bf16.xpose.msrb.mxu2 %v306_v21  ;;  %v241_v25 = vpack.c.b16 %v240_v16, %v239_v15  ;;  %v44_v38 = vpack.c.bf16 %v28_v24, %v28_v24  ;;  %v41_v39 = vpack.c.bf16 %v25_v28, %v25_v28  ;;  %v234_v44 = vunpack.c.l.b16 %v39_v31 }
  0x14   :  { %v336_v30 = vsel %vm121_vm0, %v331_v22, 0  ;;  %v271_v36 = vpack.c.b16 %v270_v27, %v269_v26  ;;  %v42_v40 = vpack.c.bf16 %v26_v29, %v26_v29  ;;  %v45_v42 = vpack.c.bf16 %v29_v33, %v29_v33 }
  0x15   :  { %345 = vmatpush.bf16.xpose.msrb.mxu3 %v336_v30  ;;  %v246_v35 = vsel %vm121_vm0, %v241_v25, 0  ;;  %v46_v43 = vpack.c.bf16 %v30_v34, %v30_v34  ;;  %v235_v45 = vunpack.c.l.b16 %v40_v32  ;;  %v294_v46 = vunpack.c.l.b16 %v43_v37 }
  0x16   :  { %255 = vmatpush.bf16.xpose.msrb.mxu0 %v246_v35  ;;  %v276_v41 = vsel %vm121_vm0, %v271_v36, 0  ;;  %v295_v47 = vunpack.c.l.b16 %v44_v38  ;;  %v264_v48 = vunpack.c.l.b16 %v41_v39  ;;  %v265_v49 = vunpack.c.l.b16 %v42_v40 }
  0x17   :  { %285 = vmatpush.bf16.xpose.msrb.mxu1 %v276_v41  ;;  %v324_v50 = vunpack.c.l.b16 %v45_v42  ;;  %v325_v51 = vunpack.c.l.b16 %v46_v43  ;;  %v236_v52 = vpack.c.b16 %v235_v45, %v234_v44 }
  0x18   :  { %v296_v53 = vpack.c.b16 %v295_v47, %v294_v46  ;;  %v266_v54 = vpack.c.b16 %v265_v49, %v264_v48 }
  0x19   :  { %v326_v55 = vpack.c.b16 %v325_v51, %v324_v50 }
  0x20   :  { %809 = vmatmul.msk.bf16.vlgmr.msrb.gmra.mxu0 %vm121_vm0, %v236_v52 }
  0x21   :  { %811 = vmatmul.msk.bf16.vlgmr.msrb.gmra.mxu2 %vm121_vm0, %v296_v53  ;;  %810 = vmatmul.msk.bf16.vlgmr.msrb.gmra.mxu1 %vm121_vm0, %v266_v54 }
  0x23   :  { %812 = vmatmul.msk.bf16.vlgmr.msrb.gmra.mxu3 %vm121_vm0, %v326_v55 }
  0x8d   :  { %v137_v56 = vpop.f32.mrf.mxu0 }
  0x8e   :  { %v1017_v57 = vmul.f32 0.17677669, %v137_v56  ;;  %v167_v58 = vpop.f32.mrf.mxu1 }
  0x8f   :  { %v1019_v59 = vmul.f32 0.17677669, %v167_v58 }
  0x90   :  { %v369_v60 = vsel %vm368_vm1, %v1017_v57, -inf }
  0x91   :  { %v375_v61 = vsel %vm368_vm1, %v1019_v59, -inf  ;;  %370 = vmax.xlane.f32.xlu2 %v369_v60 }
  0x92   :  { %376 = vmax.xlane.f32.xlu0 %v375_v61 }
  0x94   :  { %v197_v62 = vpop.f32.mrf.mxu2 }
  0x95   :  { %v1025_v63 = vmul.f32 0.17677669, %v197_v62  ;;  %v139_v0 = vpop.f32.mrf.mxu0 }
  0x96   :  { %v227_v1 = vpop.f32.mrf.mxu3  ;;  %v1027_v2 = vmul.f32 0.17677669, %v139_v0  ;;  %v169_v11 = vpop.f32.mrf.mxu1 }
  0x97   :  { %v1029_v3 = vmul.f32 0.17677669, %v227_v1  ;;  %v381_v4 = vsel %vm368_vm1, %v1025_v63, -inf  ;;  %v1047_v17 = vmul.f32 0.17677669, %v169_v11 }
  0x98   :  { %v372_v5 = vsel %vm368_vm1, %v1027_v2, -inf }
  0x99   :  { %v387_v6 = vsel %vm368_vm1, %v1029_v3, -inf  ;;  %373 = vmax.xlane.f32.xlu2 %v372_v5  ;;  %v378_v23 = vsel %vm368_vm1, %v1047_v17, -inf }
  0x9a   :  { %388 = vmax.xlane.f32.xlu1 %v387_v6  ;;  %382 = vmax.xlane.f32.xlu0 %v381_v4 }
  0x9c   :  { %v199_v7 = vpop.f32.mrf.mxu2 }
  0x9d   :  { %v1037_v8 = vmul.f32 0.17677669, %v199_v7  ;;  %v257_v14 = vpop.f32.mrf.mxu0 }
  0x9e   :  { %v229_v9 = vpop.f32.mrf.mxu3  ;;  %v1045_v15 = vmul.f32 0.17677669, %v257_v14  ;;  %v287_v22 = vpop.f32.mrf.mxu1 }
  0x9f   :  { %v1039_v10 = vmul.f32 0.17677669, %v229_v9  ;;  %v384_v13 = vsel %vm368_vm1, %v1037_v8, -inf  ;;  %v1071_v35 = vmul.f32 0.17677669, %v287_v22 }
  0xa0   :  { %v393_v21 = vsel %vm368_vm1, %v1045_v15, -inf }
  0xa1   :  { %v390_v12 = vsel %vm368_vm1, %v1039_v10, -inf  ;;  %v399_v37 = vsel %vm368_vm1, %v1071_v35, -inf }
  0xa2   :  { %391 = vmax.xlane.f32.xlu1 %v390_v12  ;;  %385 = vmax.xlane.f32.xlu0 %v384_v13 }
  0xa4   :  { %v317_v16 = vpop.f32.mrf.mxu2 }
  0xa5   :  { %v1049_v18 = vmul.f32 0.17677669, %v317_v16  ;;  %v259_v31 = vpop.f32.mrf.mxu0 }
  0xa6   :  { %v347_v19 = vpop.f32.mrf.mxu3  ;;  %v289_v33 = vpop.f32.mrf.mxu1  ;;  %v1069_v34 = vmul.f32 0.17677669, %v259_v31 }
  0xa7   :  { %v405_v20 = vsel %vm368_vm1, %v1049_v18, -inf  ;;  %v1057_v25 = vmul.f32 0.17677669, %v347_v19  ;;  %v1073_v36 = vmul.f32 0.17677669, %v289_v33 }
  0xa8   :  { %406 = vmax.xlane.f32.xlu2 %v405_v20  ;;  %v396_v38 = vsel %vm368_vm1, %v1069_v34, -inf }
  0xa9   :  { %v411_v29 = vsel %vm368_vm1, %v1057_v25, -inf  ;;  %v402_v39 = vsel %vm368_vm1, %v1073_v36, -inf }
  0xaa   :  { %379 = vmax.xlane.f32.xlu1 %v378_v23  ;;  %394 = vmax.xlane.f32.xlu0 %v393_v21 }
  0xac   :  { %v319_v24 = vpop.f32.mrf.mxu2 }
  0xad   :  { %v1059_v26 = vmul.f32 0.17677669, %v319_v24 }
  0xae   :  { %v349_v27 = vpop.f32.mrf.mxu3 }
  0xaf   :  { %v1061_v28 = vmul.f32 0.17677669, %v349_v27  ;;  %v408_v32 = vsel %vm368_vm1, %v1059_v26, -inf }
  0xb1   :  { %v414_v30 = vsel %vm368_vm1, %v1061_v28, -inf }
  0xb2   :  { %412 = vmax.xlane.f32.xlu1 %v411_v29  ;;  %415 = vmax.xlane.f32.xlu2 %v414_v30 }
  0xb3   :  { %409 = vmax.xlane.f32.xlu0 %v408_v32 }
  0xba   :  { %400 = vmax.xlane.f32.xlu2 %v399_v37  ;;  %397 = vmax.xlane.f32.xlu1 %v396_v38 }
  0xbb   :  { %403 = vmax.xlane.f32.xlu0 %v402_v39 }
 0x104   :  { %v371_v40 = vpop.xlane.xlu2 %370 }
 0x105   :  { %v377_v41 = vpop.xlane.xlu0 %376  ;;  %v417_v42 = vsub.f32 %v1017_v57, %v371_v40 }
 0x106   :  { %v419_v43 = vsub.f32 %v1019_v59, %v377_v41 }
 0x107   :  { %v433_v44 = vmul.f32 1.442695, %v417_v42 }
 0x108   :  { %v437_v45 = vmul.f32 1.442695, %v419_v43 }
 0x109   :  { %821 = vpow2.f32 %v433_v44 }
 0x10a   :  { %823 = vpow2.f32 %v437_v45 }
 0x10c   :  { %v374_v46 = vpop.xlane.xlu2 %373 }
 0x10d   :  { %v389_v47 = vpop.xlane.xlu1 %388  ;;  %v383_v48 = vpop.xlane.xlu0 %382  ;;  %v418_v55 = vsub.f32 %v1027_v2, %v374_v46 }
 0x10e   :  { %v423_v49 = vsub.f32 %v1029_v3, %v389_v47  ;;  %v421_v50 = vsub.f32 %v1025_v63, %v383_v48 }
 0x10f   :  { %v1085_v51 = vpop.eup %821  ;;  %v435_v58 = vmul.f32 1.442695, %v418_v55 }
 0x110   :  { %v1087_v52 = vpop.eup %823  ;;  %v445_v53 = vmul.f32 1.442695, %v423_v49  ;;  %v441_v54 = vmul.f32 1.442695, %v421_v50  ;;  %v465_v56 = vsel %vm368_vm1, %v1085_v51, 0.0 }
 0x111   :  { %466 = vadd.xlane.f32.xlu2 %v465_v56  ;;  %v471_v57 = vsel %vm368_vm1, %v1087_v52, 0.0 }
 0x112   :  { %825 = vpow2.f32 %v445_v53  ;;  %472 = vadd.xlane.f32.xlu1 %v471_v57 }
 0x113   :  { %827 = vpow2.f32 %v441_v54 }
 0x114   :  { %829 = vpow2.f32 %v435_v58  ;;  %v79_v58 = vld [vmem:[%s1299_s2] sm:$0xff] }
 0x115   :  { %v392_v59 = vpop.xlane.xlu1 %391  ;;  %v386_v60 = vpop.xlane.xlu0 %385 }
 0x116   :  { %v424_v61 = vsub.f32 %v1039_v10, %v392_v59  ;;  %v422_v62 = vsub.f32 %v1037_v8, %v386_v60  ;;  %v80_v59 = vld [vmem:[%s1299_s2 + $0x8] sm:$0xff]  ;;  %v95_v60 = vpack.c.bf16 %v79_v58, %v79_v58 }
 0x118   :  { %v1096_v63 = vpop.eup %825  ;;  %v447_v0 = vmul.f32 1.442695, %v424_v61  ;;  %v443_v1 = vmul.f32 1.442695, %v422_v62  ;;  %v96_v61 = vpack.c.bf16 %v80_v59, %v80_v59  ;;  %v83_v62 = vld [vmem:[%s1299_s2 + $0x20] sm:$0xff] }
 0x119   :  { %v1098_v2 = vpop.eup %827  ;;  %v483_v3 = vsel %vm368_vm1, %v1096_v63, 0.0 }
 0x11a   :  { %831 = vpow2.f32 %v447_v0  ;;  %484 = vadd.xlane.f32.xlu0 %v483_v3  ;;  %v477_v4 = vsel %vm368_vm1, %v1098_v2, 0.0  ;;  %v1105_v9 = vpop.eup %829  ;;  %v84_v0 = vld [vmem:[%s1299_s2 + $0x28] sm:$0xff]  ;;  %v99_v3 = vpack.c.bf16 %v83_v62, %v83_v62  ;;  %v89_v62 = vld [vmem:[%s1299_s2 + $0x50] sm:$0xff] }
 0x11b   :  { %833 = vpow2.f32 %v443_v1  ;;  %478 = vadd.xlane.f32.xlu1 %v477_v4  ;;  %v407_v5 = vpop.xlane.xlu2 %406  ;;  %v468_v20 = vsel %vm368_vm1, %v1105_v9, 0.0  ;;  %v85_v1 = vld [vmem:[%s1299_s2 + $0x30] sm:$0xff]  ;;  %v100_v4 = vpack.c.bf16 %v84_v0, %v84_v0 }
 0x11c   :  { %v429_v6 = vsub.f32 %v1049_v18, %v407_v5  ;;  %v86_v5 = vld [vmem:[%s1299_s2 + $0x38] sm:$0xff] }
 0x11d   :  { %v380_v7 = vpop.xlane.xlu1 %379  ;;  %v395_v8 = vpop.xlane.xlu0 %394 }
 0x11e   :  { %v420_v10 = vsub.f32 %v1047_v17, %v380_v7  ;;  %v457_v11 = vmul.f32 1.442695, %v429_v6  ;;  %v425_v12 = vsub.f32 %v1045_v15, %v395_v8  ;;  %v101_v6 = vpack.c.bf16 %v85_v1, %v85_v1 }
 0x11f   :  { %v568_v7 = vunpack.c.l.b16 %v95_v60  ;;  %v102_v8 = vpack.c.bf16 %v86_v5, %v86_v5  ;;  %v87_v60 = vld [vmem:[%s1299_s2 + $0x40] sm:$0xff] }
 0x120   :  { %v1109_v13 = vpop.eup %831  ;;  %v439_v14 = vmul.f32 1.442695, %v420_v10  ;;  %835 = vpow2.f32 %v457_v11  ;;  %v449_v16 = vmul.f32 1.442695, %v425_v12  ;;  %v569_v10 = vunpack.c.l.b16 %v96_v61  ;;  %v88_v61 = vld [vmem:[%s1299_s2 + $0x48] sm:$0xff] }
 0x121   :  { %v1111_v19 = vpop.eup %833  ;;  %v486_v17 = vsel %vm368_vm1, %v1109_v13, 0.0  ;;  %v624_v11 = vunpack.c.l.b16 %v99_v3  ;;  %v625_v12 = vunpack.c.l.b16 %v100_v4  ;;  %v103_v1 = vpack.c.bf16 %v87_v60, %v87_v60  ;;  %v90_v4 = vld [vmem:[%s1299_s2 + $0x58] sm:$0xff] }
 0x122   :  { %837 = vpow2.f32 %v439_v14  ;;  %469 = vadd.xlane.f32.xlu0 %v468_v20  ;;  %v480_v18 = vsel %vm368_vm1, %v1111_v19, 0.0  ;;  %v652_v14 = vunpack.c.l.b16 %v101_v6  ;;  %v570_v20 = vpack.c.b16 %v569_v10, %v568_v7 }
 0x123   :  { %839 = vpow2.f32 %v449_v16  ;;  %481 = vadd.xlane.f32.xlu2 %v480_v18  ;;  %487 = vadd.xlane.f32.xlu1 %v486_v17  ;;  %v653_v16 = vunpack.c.l.b16 %v102_v8  ;;  %v626_v18 = vpack.c.b16 %v625_v12, %v624_v11  ;;  %v104_v3 = vpack.c.bf16 %v88_v61, %v88_v61 }
 0x124   :  { %582 = vmatpush.bf16.msra.mxu0 %v570_v20  ;;  %v105_v6 = vpack.c.bf16 %v89_v62, %v89_v62  ;;  %v106_v7 = vpack.c.bf16 %v90_v4, %v90_v4  ;;  %v680_v10 = vunpack.c.l.b16 %v103_v1 }
 0x125   :  { %v413_v15 = vpop.xlane.xlu1 %412  ;;  %v416_v21 = vpop.xlane.xlu2 %415  ;;  %v654_v17 = vpack.c.b16 %v653_v16, %v652_v14  ;;  %638 = vmatpush.bf16.msra.mxu2 %v626_v18  ;;  %v681_v11 = vunpack.c.l.b16 %v104_v3 }
 0x126   :  { %v1119_v22 = vpop.eup %835  ;;  %v431_v23 = vsub.f32 %v1057_v25, %v413_v15  ;;  %v432_v24 = vsub.f32 %v1061_v28, %v416_v21  ;;  %v410_v27 = vpop.xlane.xlu0 %409  ;;  %v81_v21 = vld [vmem:[%s1299_s2 + $0x10] sm:$0xff]  ;;  %v708_v14 = vunpack.c.l.b16 %v105_v6  ;;  %v709_v16 = vunpack.c.l.b16 %v106_v7 }
 0x127   :  { %v430_v29 = vsub.f32 %v1059_v26, %v410_v27  ;;  %v501_v30 = vsel %vm368_vm1, %v1119_v22, 0.0  ;;  %666 = vmatpush.bf16.msra.mxu3 %v654_v17  ;;  %v682_v18 = vpack.c.b16 %v681_v11, %v680_v10 }
 0x128   :  { %v1126_v31 = vpop.eup %837  ;;  %v461_v32 = vmul.f32 1.442695, %v431_v23  ;;  %v463_v33 = vmul.f32 1.442695, %v432_v24  ;;  %v82_v23 = vld [vmem:[%s1299_s2 + $0x18] sm:$0xff]  ;;  %v97_v24 = vpack.c.bf16 %v81_v21, %v81_v21  ;;  %v710_v21 = vpack.c.b16 %v709_v16, %v708_v14 }
 0x129   :  { %v1128_v37 = vpop.eup %839  ;;  %v459_v38 = vmul.f32 1.442695, %v430_v29  ;;  %v474_v25 = vsel %vm368_vm1, %v1126_v31, 0.0  ;;  %v98_v27 = vpack.c.bf16 %v82_v23, %v82_v23  ;;  %694 = vmatpush.bf16.msrb.mxu0 %v682_v18 }
 0x12a   :  { %841 = vpow2.f32 %v461_v32  ;;  %502 = vadd.xlane.f32.xlu0 %v501_v30  ;;  %v489_v28 = vsel %vm368_vm1, %v1128_v37, 0.0  ;;  %v596_v29 = vunpack.c.l.b16 %v97_v24 }
 0x12b   :  { %843 = vpow2.f32 %v463_v33  ;;  %475 = vadd.xlane.f32.xlu2 %v474_v25  ;;  %490 = vadd.xlane.f32.xlu1 %v489_v28  ;;  %v597_v30 = vunpack.c.l.b16 %v98_v27  ;;  %v91_v28 = vld [vmem:[%s1299_s2 + $0x60] sm:$0xff] }
 0x12c   :  { %845 = vpow2.f32 %v459_v38 }
 0x12d   :  { %v401_v26 = vpop.xlane.xlu2 %400  ;;  %v398_v39 = vpop.xlane.xlu1 %397  ;;  %v598_v32 = vpack.c.b16 %v597_v30, %v596_v29 }
 0x12e   :  { %v427_v40 = vsub.f32 %v1071_v35, %v401_v26  ;;  %v426_v41 = vsub.f32 %v1069_v34, %v398_v39  ;;  %v404_v42 = vpop.xlane.xlu0 %403  ;;  %v92_v26 = vld [vmem:[%s1299_s2 + $0x68] sm:$0xff]  ;;  %v93_v39 = vld [vmem:[%s1299_s2 + $0x70] sm:$0xff] }
 0x12f   :  { %v428_v43 = vsub.f32 %v1073_v36, %v404_v42  ;;  %610 = vmatpush.bf16.msra.mxu1 %v598_v32  ;;  %v94_v42 = vld [vmem:[%s1299_s2 + $0x78] sm:$0xff] }
 0x130   :  { %v1137_v44 = vpop.eup %841  ;;  %v453_v45 = vmul.f32 1.442695, %v427_v40  ;;  %v451_v46 = vmul.f32 1.442695, %v426_v41  ;;  %v107_v40 = vpack.c.bf16 %v91_v28, %v91_v28  ;;  %v108_v41 = vpack.c.bf16 %v92_v26, %v92_v26 }
 0x131   :  { %v1139_v47 = vpop.eup %843  ;;  %v455_v48 = vmul.f32 1.442695, %v428_v43  ;;  %v507_v35 = vsel %vm368_vm1, %v1137_v44, 0.0  ;;  %v109_v43 = vpack.c.bf16 %v93_v39, %v93_v39 }
 0x132   :  { %v1141_v49 = vpop.eup %845  ;;  %847 = vpow2.f32 %v453_v45  ;;  %v510_v50 = vsel %vm368_vm1, %v1139_v47, 0.0  ;;  %v110_v45 = vpack.c.bf16 %v94_v42, %v94_v42 }
 0x133   :  { %849 = vpow2.f32 %v451_v46  ;;  %511 = vadd.xlane.f32.xlu0 %v510_v50  ;;  %508 = vadd.xlane.f32.xlu2 %v507_v35  ;;  %v504_v34 = vsel %vm368_vm1, %v1141_v49, 0.0  ;;  %v736_v46 = vunpack.c.l.b16 %v107_v40  ;;  %v764_v50 = vunpack.c.l.b16 %v109_v43 }
 0x134   :  { %851 = vpow2.f32 %v455_v48  ;;  %505 = vadd.xlane.f32.xlu1 %v504_v34  ;;  %v737_v48 = vunpack.c.l.b16 %v108_v41  ;;  %v765_v35 = vunpack.c.l.b16 %v110_v45  ;;  %722 = vmatpush.bf16.msrb.mxu1 %v710_v21 }
 0x136   :  { %v738_v34 = vpack.c.b16 %v737_v48, %v736_v46 }
 0x138   :  { %v1149_v36 = vpop.eup %847  ;;  %750 = vmatpush.bf16.msrb.mxu2 %v738_v34 }
 0x139   :  { %v1151_v53 = vpop.eup %849  ;;  %v495_v54 = vsel %vm368_vm1, %v1149_v36, 0.0 }
 0x13a   :  { %v1155_v55 = vpop.eup %851  ;;  %v492_v56 = vsel %vm368_vm1, %v1151_v53, 0.0 }
 0x13b   :  { %496 = vadd.xlane.f32.xlu0 %v495_v54  ;;  %v498_v57 = vsel %vm368_vm1, %v1155_v55, 0.0  ;;  %493 = vadd.xlane.f32.xlu2 %v492_v56  ;;  %v766_v54 = vpack.c.b16 %v765_v35, %v764_v50 }
 0x13c   :  { %499 = vadd.xlane.f32.xlu1 %v498_v57 }
 0x13d   :  { %778 = vmatpush.bf16.msrb.mxu3 %v766_v54 }
 0x184   :  { %v467_v33 = vpop.xlane.xlu2 %466 }
 0x185   :  { %v473_v15 = vpop.xlane.xlu1 %472  ;;  %853 = vrcp.f32 %v467_v33 }
 0x18b   :  { %v854_v57 = vpop.eup %853 }
 0x18c   :  { %v529_v8 = vmul.f32 %v854_v57, %v1085_v51 }
 0x18d   :  { %v485_v38 = vpop.xlane.xlu0 %484 }
 0x18e   :  { %v479_v25 = vpop.xlane.xlu1 %478  ;;  %v545_v24 = vpack.c.bf16 %v529_v8, %v529_v8 }
 0x18f   :  { %855 = vrcp.f32 %v479_v25 }
 0x190   :  { %857 = vrcp.f32 %v485_v38  ;;  %v563_v26 = vunpack.c.l.b16 %v545_v24 }
 0x195   :  { %v470_v56 = vpop.xlane.xlu0 %469  ;;  %v856_v0 = vpop.eup %855 }
 0x196   :  { %859 = vrcp.f32 %v470_v56  ;;  %v482_v58 = vpop.xlane.xlu2 %481  ;;  %v488_v59 = vpop.xlane.xlu1 %487  ;;  %v533_v12 = vmul.f32 %v856_v0, %v1098_v2 }
 0x197   :  { %861 = vrcp.f32 %v482_v58  ;;  %v858_v5 = vpop.eup %857 }
 0x198   :  { %863 = vrcp.f32 %v488_v59  ;;  %v535_v20 = vmul.f32 %v858_v5, %v1096_v63  ;;  %v549_v51 = vpack.c.bf16 %v533_v12, %v533_v12 }
 0x199   :  { %865 = vrcp.f32 %v473_v15 }
 0x19a   :  { %v551_v38 = vpack.c.bf16 %v535_v20, %v535_v20  ;;  %v619_v41 = vunpack.c.l.b16 %v549_v51 }
 0x19c   :  { %v860_v17 = vpop.eup %859  ;;  %v647_v43 = vunpack.c.l.b16 %v551_v38 }
 0x19d   :  { %v862_v23 = vpop.eup %861  ;;  %v530_v27 = vmul.f32 %v860_v17, %v1105_v9  ;;  %v503_v29 = vpop.xlane.xlu0 %502 }
 0x19e   :  { %v864_v30 = vpop.eup %863  ;;  %v534_v15 = vmul.f32 %v862_v23, %v1111_v19  ;;  %v476_v32 = vpop.xlane.xlu2 %475 }
 0x19f   :  { %v491_v33 = vpop.xlane.xlu1 %490  ;;  %v866_v2 = vpop.eup %865  ;;  %v546_v25 = vpack.c.bf16 %v530_v27, %v530_v27  ;;  %v536_v63 = vmul.f32 %v864_v30, %v1109_v13  ;;  %867 = vrcp.f32 %v476_v32 }
 0x1a0   :  { %v550_v28 = vpack.c.bf16 %v534_v15, %v534_v15  ;;  %v531_v9 = vmul.f32 %v866_v2, %v1087_v52  ;;  %869 = vrcp.f32 %v503_v29 }
 0x1a1   :  { %v564_v39 = vunpack.c.l.b16 %v546_v25  ;;  %v552_v40 = vpack.c.bf16 %v536_v63, %v536_v63 }
 0x1a2   :  { %v620_v42 = vunpack.c.l.b16 %v550_v28  ;;  %v547_v35 = vpack.c.bf16 %v531_v9, %v531_v9 }
 0x1a3   :  { %v565_v45 = vpack.c.b16 %v564_v39, %v563_v26  ;;  %v648_v19 = vunpack.c.l.b16 %v552_v40 }
 0x1a4   :  { %v621_v46 = vpack.c.b16 %v620_v42, %v619_v41  ;;  %v591_v58 = vunpack.c.l.b16 %v547_v35 }
 0x1a5   :  { %v868_v48 = vpop.eup %867  ;;  %v649_v50 = vpack.c.b16 %v648_v19, %v647_v43  ;;  %813 = vmatmul.msk.bf16.vlgmr.msra.gmra.mxu0 %vm368_vm1, %v565_v45 }
 0x1a6   :  { %v532_v13 = vmul.f32 %v868_v48, %v1126_v31  ;;  %v512_v34 = vpop.xlane.xlu0 %511  ;;  %v509_v54 = vpop.xlane.xlu2 %508  ;;  %815 = vmatmul.msk.bf16.vlgmr.msra.gmra.mxu2 %vm368_vm1, %v621_v46 }
 0x1a7   :  { %871 = vrcp.f32 %v512_v34  ;;  %816 = vmatmul.msk.bf16.vlgmr.msra.gmra.mxu3 %vm368_vm1, %v649_v50  ;;  %v506_v52 = vpop.xlane.xlu1 %505  ;;  %v870_v57 = vpop.eup %869 }
 0x1a8   :  { %v548_v56 = vpack.c.bf16 %v532_v13, %v532_v13  ;;  %873 = vrcp.f32 %v509_v54  ;;  %v541_v60 = vmul.f32 %v870_v57, %v1119_v22 }
 0x1a9   :  { %875 = vrcp.f32 %v506_v52 }
 0x1aa   :  { %v592_v59 = vunpack.c.l.b16 %v548_v56  ;;  %877 = vrcp.f32 %v491_v33  ;;  %v557_v8 = vpack.c.bf16 %v541_v60, %v541_v60 }
 0x1ac   :  { %v593_v61 = vpack.c.b16 %v592_v59, %v591_v58  ;;  %v731_v20 = vunpack.c.l.b16 %v557_v8 }
 0x1ad   :  { %v872_v62 = vpop.eup %871 }
 0x1ae   :  { %v874_v31 = vpop.eup %873  ;;  %v544_v0 = vmul.f32 %v872_v62, %v1139_v47  ;;  %v497_v1 = vpop.xlane.xlu0 %496  ;;  %814 = vmatmul.msk.bf16.vlgmr.msra.gmra.mxu1 %vm368_vm1, %v593_v61 }
 0x1af   :  { %v494_v3 = vpop.xlane.xlu2 %493  ;;  %v876_v4 = vpop.eup %875  ;;  %v543_v5 = vmul.f32 %v874_v31, %v1137_v44  ;;  %879 = vrcp.f32 %v497_v1 }
 0x1b0   :  { %v500_v6 = vpop.xlane.xlu1 %499  ;;  %v878_v7 = vpop.eup %877  ;;  %v560_v10 = vpack.c.bf16 %v544_v0, %v544_v0  ;;  %v542_v11 = vmul.f32 %v876_v4, %v1141_v49  ;;  %881 = vrcp.f32 %v494_v3 }
 0x1b1   :  { %v559_v22 = vpack.c.bf16 %v543_v5, %v543_v5  ;;  %883 = vrcp.f32 %v500_v6  ;;  %v537_v47 = vmul.f32 %v878_v7, %v1128_v37 }
 0x1b2   :  { %v558_v12 = vpack.c.bf16 %v542_v11, %v542_v11  ;;  %v760_v14 = vunpack.c.l.b16 %v560_v10 }
 0x1b3   :  { %v759_v16 = vunpack.c.l.b16 %v559_v22  ;;  %v553_v29 = vpack.c.bf16 %v537_v47, %v537_v47 }
 0x1b4   :  { %v732_v18 = vunpack.c.l.b16 %v558_v12 }
 0x1b5   :  { %v880_v17 = vpop.eup %879  ;;  %v761_v21 = vpack.c.b16 %v760_v14, %v759_v16  ;;  %v675_v32 = vunpack.c.l.b16 %v553_v29 }
 0x1b6   :  { %v882_v44 = vpop.eup %881  ;;  %v733_v23 = vpack.c.b16 %v732_v18, %v731_v20  ;;  %v539_v24 = vmul.f32 %v880_v17, %v1149_v36 }
 0x1b7   :  { %v884_v27 = vpop.eup %883  ;;  %v538_v49 = vmul.f32 %v882_v44, %v1151_v53  ;;  %820 = vmatmul.msk.bf16.vlgmr.msrb.gmra.mxu3 %vm368_vm1, %v761_v21 }
 0x1b8   :  { %v555_v30 = vpack.c.bf16 %v539_v24, %v539_v24  ;;  %v540_v51 = vmul.f32 %v884_v27, %v1155_v55  ;;  %819 = vmatmul.msk.bf16.vlgmr.msrb.gmra.mxu2 %vm368_vm1, %v733_v23 }
 0x1b9   :  { %v554_v37 = vpack.c.bf16 %v538_v49, %v538_v49 }
 0x1ba   :  { %v556_v15 = vpack.c.bf16 %v540_v51, %v540_v51  ;;  %v703_v2 = vunpack.c.l.b16 %v555_v30 }
 0x1bb   :  { %v676_v33 = vunpack.c.l.b16 %v554_v37 }
 0x1bc   :  { %v704_v38 = vunpack.c.l.b16 %v556_v15 }
 0x1bd   :  { %v677_v25 = vpack.c.b16 %v676_v33, %v675_v32 }
 0x1be   :  { %v705_v63 = vpack.c.b16 %v704_v38, %v703_v2 }
 0x1bf   :  { %817 = vmatmul.msk.bf16.vlgmr.msrb.gmra.mxu0 %vm368_vm1, %v677_v25 }
 0x1c0   :  { %818 = vmatmul.msk.bf16.vlgmr.msrb.gmra.mxu1 %vm368_vm1, %v705_v63 }
 0x222   :  { %v584_v36 = vpop.f32.mrf.mxu0 }
 0x223   :  { %785 = vst.msk [vmem:[%s1300_s3] sm:$0xff] %vm121_vm0, %v584_v36 }
 0x229   :  { %v640_v53 = vpop.f32.mrf.mxu2 }
 0x22a   :  { %v586_v55 = vpop.f32.mrf.mxu0  ;;  %789 = vst.msk [vmem:[%s1300_s3 + $0x20] sm:$0xff] %vm121_vm0, %v640_v53  ;;  %v668_v28 = vpop.f32.mrf.mxu3 }
 0x22b   :  { %786 = vst.msk [vmem:[%s1300_s3 + $0x8] sm:$0xff] %vm121_vm0, %v586_v55  ;;  %v612_v26 = vpop.f32.mrf.mxu1 }
 0x22c   :  { %791 = vst.msk [vmem:[%s1300_s3 + $0x30] sm:$0xff] %vm121_vm0, %v668_v28 }
 0x22d   :  { %787 = vst.msk [vmem:[%s1300_s3 + $0x10] sm:$0xff] %vm121_vm0, %v612_v26 }
 0x231   :  { %v642_v39 = vpop.f32.mrf.mxu2 }
 0x232   :  { %790 = vst.msk [vmem:[%s1300_s3 + $0x28] sm:$0xff] %vm121_vm0, %v642_v39  ;;  %v670_v40 = vpop.f32.mrf.mxu3 }
 0x233   :  { %792 = vst.msk [vmem:[%s1300_s3 + $0x38] sm:$0xff] %vm121_vm0, %v670_v40  ;;  %v614_v9 = vpop.f32.mrf.mxu1 }
 0x234   :  { %788 = vst.msk [vmem:[%s1300_s3 + $0x18] sm:$0xff] %vm121_vm0, %v614_v9 }
 0x23a   :  { %v780_v41 = vpop.f32.mrf.mxu3 }
 0x23b   :  { %v752_v42 = vpop.f32.mrf.mxu2  ;;  %799 = vst.msk [vmem:[%s1300_s3 + $0x70] sm:$0xff] %vm121_vm0, %v780_v41 }
 0x23c   :  { %797 = vst.msk [vmem:[%s1300_s3 + $0x60] sm:$0xff] %vm121_vm0, %v752_v42  ;;  %v696_v43 = vpop.f32.mrf.mxu0 }
 0x23d   :  { %793 = vst.msk [vmem:[%s1300_s3 + $0x40] sm:$0xff] %vm121_vm0, %v696_v43  ;;  %v724_v45 = vpop.f32.mrf.mxu1 }
 0x23e   :  { %795 = vst.msk [vmem:[%s1300_s3 + $0x50] sm:$0xff] %vm121_vm0, %v724_v45 }
 0x242   :  { %v782_v19 = vpop.f32.mrf.mxu3 }
 0x243   :  { %v754_v46 = vpop.f32.mrf.mxu2  ;;  %800 = vst.msk [vmem:[%s1300_s3 + $0x78] sm:$0xff] %vm121_vm0, %v782_v19 }
 0x244   :  { %798 = vst.msk [vmem:[%s1300_s3 + $0x68] sm:$0xff] %vm121_vm0, %v754_v46  ;;  %v698_v48 = vpop.f32.mrf.mxu0 }
 0x245   :  { %794 = vst.msk [vmem:[%s1300_s3 + $0x48] sm:$0xff] %vm121_vm0, %v698_v48  ;;  %v726_v50 = vpop.f32.mrf.mxu1 }
 0x246   :  { %796 = vst.msk [vmem:[%s1300_s3 + $0x58] sm:$0xff] %vm121_vm0, %v726_v50 }

</bundles_post_ra>
